<compile_context>
chip_gen: v7x
topology: tpu7x:2x2x1
jax: 0.10.0
libtpu: 0.0.40
codegen_flags: <defaults>
</compile_context>

<pallas_src>
import math
import functools

import jax
import jax.numpy as jnp
from jax import lax
from jax.experimental import pallas as pl
from jax.experimental.pallas import tpu as pltpu


def _layernorm(x, w, b, eps=1e-5):
    # x: (rows, E); w, b: (1, E). Biased variance -> matches nn.LayerNorm.
    mean = jnp.mean(x, axis=-1, keepdims=True)
    xc = x - mean
    var = jnp.mean(xc * xc, axis=-1, keepdims=True)
    return xc * lax.rsqrt(var + eps) * w + b


def _gelu_exact(x):
    # nn.GELU() default (approximate='none'): 0.5*x*(1+erf(x/sqrt(2)))
    return 0.5 * x * (1.0 + lax.erf(x * (1.0 / math.sqrt(2.0))))


def block_kernel(
    x_ref, colkeep_ref,
    ln1_w_ref, ln1_b_ref,
    wqkv_ref, bqkv_ref, wp_ref, bp_ref,
    ln2_w_ref, ln2_b_ref,
    w1_ref, b1_ref, w2_ref, b2_ref,
    out_ref,
    *, n_head, fused_heads,
):
    xb = x_ref[...]                              # (Bb, S, E) f32
    Bb, S, E = xb.shape
    dh = E // n_head
    neg_min = jnp.finfo(jnp.float32).min
    w_dtype = wqkv_ref.dtype                     # matmul operand dtype (f32 or bf16)

    # All Bb batch rows stacked -> every projection matmul sees M = Bb*S rows.
    x = xb.reshape(Bb * S, E)

    # Causal + trajectory column-kill mask: built ONCE per grid step, shared across all
    # Bb rows and all heads (no dense (S,S) mask read from HBM, integer compare only).
    rows = lax.broadcasted_iota(jnp.int32, (S, S), 0)
    cols = lax.broadcasted_iota(jnp.int32, (S, S), 1)
    keep = (rows >= cols) & (colkeep_ref[...] != 0)              # (S, S) bool

    # ---- ln1 + fused QKV projection (one wide MXU matmul, f32 accumulation) ----
    h = _layernorm(x, ln1_w_ref[...], ln1_b_ref[...])
    qkv = jnp.dot(h.astype(w_dtype), wqkv_ref[...],
                  preferred_element_type=jnp.float32) + bqkv_ref[...]   # (Bb*S, 3E)

    if fused_heads:
        # One reshape + one transpose per operand (single relayout); heads and batch rows
        # batched onto one leading axis so attention is two batched einsums.
        def split_heads(t):                      # (Bb*S, E) -> (Bb*nh, S, dh)
            t = t.reshape(Bb, S, n_head, dh)
            return jnp.transpose(t, (0, 2, 1, 3)).reshape(Bb * n_head, S, dh)

        def merge_heads(t):                      # (Bb*nh, S, dh) -> (Bb*S, E)
            t = jnp.transpose(t.reshape(Bb, n_head, S, dh), (0, 2, 1, 3))
            return t.reshape(Bb * S, E)
    else:
        # Conservative relayout (per-head lane slices + stack/concat); used with Bb == 1.
        def split_heads(t):                      # (S, E) -> (nh, S, dh)
            return jnp.stack(
                [t[:, hh * dh:(hh + 1) * dh] for hh in range(n_head)], axis=0)

        def merge_heads(t):                      # (nh, S, dh) -> (S, E)
            return jnp.concatenate([t[hh] for hh in range(n_head)], axis=-1)

    # 1/sqrt(dh) is already folded into Wq/bq (wrapper). K consumed untransposed
    # (contraction over the last dim of both operands, no in-kernel .T).
    qh = split_heads(qkv[:, :E])
    kh = split_heads(qkv[:, E:2 * E])
    vh = split_heads(qkv[:, 2 * E:])

    scores = jnp.einsum('gqd,gkd->gqk', qh, kh,
                        preferred_element_type=jnp.float32)             # (G, S, S)
    scores = jnp.where(keep[None], scores, neg_min)                     # one masked select
    m = jnp.max(scores, axis=-1, keepdims=True)
    e = jnp.exp(scores - m)
    denom = jnp.sum(e, axis=-1, keepdims=True)
    probs = e * pl.reciprocal(denom, approx=True)    # EUP reciprocal, frees VALU slots
    ctx = jnp.einsum('gqk,gkd->gqd', probs, vh,
                     preferred_element_type=jnp.float32)                # (G, S, dh)

    attn = merge_heads(ctx)                                             # (Bb*S, E)
    attn = jnp.dot(attn.astype(w_dtype), wp_ref[...],
                   preferred_element_type=jnp.float32) + bp_ref[...]
    # attn_drop / resid_drop are identity (eval mode).
    x1 = attn + x

    # ---- ln2 + MLP (exact erf GELU to match nn.GELU() default) ----
    h2 = _layernorm(x1, ln2_w_ref[...], ln2_b_ref[...])
    ff = jnp.dot(h2.astype(w_dtype), w1_ref[...],
                 preferred_element_type=jnp.float32) + b1_ref[...]
    ff = _gelu_exact(ff)
    ff = jnp.dot(ff.astype(w_dtype), w2_ref[...],
                 preferred_element_type=jnp.float32) + b2_ref[...]
    # drop is identity (eval mode).
    out_ref[...] = (x1 + ff).reshape(Bb, S, E).astype(out_ref.dtype)


# ----------------------------- wrapper-side helpers -----------------------------------

def _device_kind():
    try:
        return jax.devices()[0].device_kind.lower()
    except Exception:
        return ""


def _is_v5e():
    kind = _device_kind()
    return ("v5 lite" in kind) or ("v5e" in kind)


def _default_weight_dtype():
    # bf16 weights halve weight DMA / VMEM (f32 accumulation keeps accuracy); most valuable
    # on bandwidth-limited v5e.  TODO(synk): fp8 weight path gated to v7x.
    return jnp.bfloat16 if _is_v5e() else jnp.float32


def _vmem_cap_bytes():
    # ~80% of physical VMEM (~51 MiB on v7x's 64 MiB/TC, ~102 MiB on v5e/v6e's 128 MiB).
    try:
        cap = getattr(pltpu.get_tpu_info(), "vmem_capacity_bytes", None)
        if cap:
            return int(cap * 0.8)
    except Exception:
        pass
    return 48 << 20


def _round_up(v, m):
    return (v + m - 1) // m * m


def _pick_rows_per_step(batch, seq):
    # Fill the MXU M dimension (~128 rows on v5e's 128x128 MXU, ~256 on v6e/v7x) and
    # amortize per-grid-step pipeline overhead over several batch rows.
    target = 128 if _is_v5e() else 256
    bb = max(1, min(batch, target // max(seq, 1)))
    while batch % bb:
        bb -= 1
    return bb


def block_forward(x, params, n_head, joined_dim, *, weight_dtype=None, rows_per_step=None):
    """Fused TrajectoryTransformer Block forward (eval mode).

    `params` follows the PyTorch module, with Linear weights stored (in, out): y = x@W + b.
    """
    (ln1_w, ln1_b, wq, bq, wk, bk, wv, bv, wp, bp,
     ln2_w, ln2_b, w1, b1, w2, b2) = params
    B, S, E = x.shape
    H4 = 4 * E
    dh = E // n_head
    scale = 1.0 / math.sqrt(dh)
    if weight_dtype is None:
        weight_dtype = _default_weight_dtype()
    x = x.astype(jnp.float32)

    # Batch rows per grid step (grid = B // Bb).
    if rows_per_step is None:
        bb_fast = _pick_rows_per_step(B, S)
    else:
        bb_fast = max(1, min(int(rows_per_step), B))
        while B % bb_fast:
            bb_fast -= 1

    # Fold attention scale into the Q projection; fuse Q/K/V into one (E, 3E) weight.
    # (Scale is folded before the optional bf16 cast; quantization delta is negligible.)
    wqkv = jnp.concatenate([wq * scale, wk, wv], axis=1).astype(weight_dtype)
    bqkv = jnp.concatenate([bq * scale, bk, bv], axis=0).reshape(1, 3 * E).astype(jnp.float32)

    def row(v):
        return jnp.asarray(v, jnp.float32).reshape(1, -1)

    # Trajectory column-kill pattern as a tiny (1, S) int32 vector (no dense (S,S) mask).
    col_keep = ((jnp.arange(S) % joined_dim) != (joined_dim - 1)).astype(jnp.int32).reshape(1, S)

    ops = (col_keep,
           row(ln1_w), row(ln1_b),
           wqkv, bqkv,
           wp.astype(weight_dtype), row(bp),
           row(ln2_w), row(ln2_b),
           w1.astype(weight_dtype), row(b1),
           w2.astype(weight_dtype), row(b2))

    w_isz = jnp.dtype(weight_dtype).itemsize
    lane = lambda n: _round_up(max(n, 1), 128)
    sub = lambda n: _round_up(max(n, 1), 8)

    def vmem_limit_bytes(bb, weight_buffers):
        # Real (lane/sublane padded) working set + headroom, capped per chip generation.
        rows_p = sub(bb * S)
        weight_bytes = (sub(E) * lane(3 * E) + sub(E) * lane(E)
                        + sub(E) * lane(H4) + sub(H4) * lane(E)) * w_isz
        vec_bytes = 4 * 8 * (6 * lane(E) + lane(3 * E) + lane(H4) + lane(S))
        io_bytes = 2 * 2 * rows_p * lane(E) * 4                    # x + out, double-buffered
        act_bytes = 4 * (rows_p * (10 * lane(E) + 2 * lane(3 * E) + 2 * lane(H4))
                         + bb * n_head * sub(S) * (3 * lane(S) + 3 * lane(dh))
                         + 2 * sub(S) * lane(S))
        working = weight_buffers * weight_bytes + 2 * vec_bytes + io_bytes + act_bytes
        return int(min(_vmem_cap_bytes(), working + (8 << 20)))

    def call(fast):
        bb = bb_fast if fast else 1
        if fast:
            # Constant across the grid -> single-buffer (the default second pipeline
            # buffer would never be used since the block index never changes).
            def const(shape):
                return pl.BlockSpec(shape, lambda b: (0, 0), pipeline_mode=pl.Buffered(1))
        else:
            def const(shape):
                return pl.BlockSpec(shape, lambda b: (0, 0))

        in_specs = [
            pl.BlockSpec((bb, S, E), lambda b: (b, 0, 0)),   # x: bb batch rows per step
            const((1, S)),                                   # column-kill vector
            const((1, E)), const((1, E)),                    # ln1 w, b
            const((E, 3 * E)), const((1, 3 * E)),            # fused Wqkv, bqkv
            const((E, E)), const((1, E)),                    # Wproj, bproj
            const((1, E)), const((1, E)),                    # ln2 w, b
            const((E, H4)), const((1, H4)),                  # W1, b1
            const((H4, E)), const((1, E)),                   # W2, b2
        ]
        kernel = functools.partial(block_kernel, n_head=n_head, fused_heads=fast)
        out = pl.pallas_call(
            kernel,
            out_shape=jax.ShapeDtypeStruct((B, S, E), jnp.float32),
            grid_spec=pltpu.PrefetchScalarGridSpec(
                num_scalar_prefetch=0,
                grid=(B // bb,),
                in_specs=in_specs,
                out_specs=pl.BlockSpec((bb, S, E), lambda b: (b, 0, 0)),
            ),
            compiler_params=pltpu.CompilerParams(
                # TODO(synk): on v7x confirm the batch axis shards across both TensorCores
                # (switch to pltpu.CORE_PARALLEL / pl.core_map if a core sits idle).
                dimension_semantics=("parallel",),
                vmem_limit_bytes=vmem_limit_bytes(bb, 1 if fast else 2),
            ),
        )(x, *ops)
        return jax.block_until_ready(out)

    try:
        return call(True)
    except Exception:
        # Conservative fallback (previously-proven per-row kernel, double-buffered weights)
        # in case this jax/Mosaic build rejects pl.Buffered(1) or the head relayout.
        return call(False)


def reference_block(x, mask, params, n_head):
    (ln1_w, ln1_b, wq, bq, wk, bk, wv, bv, wp, bp,
     ln2_w, ln2_b, w1, b1, w2, b2) = params
    B, S, E = x.shape
    dh = E // n_head

    def ln(t, w, b, eps=1e-5):
        mu = jnp.mean(t, -1, keepdims=True)
        var = jnp.mean((t - mu) ** 2, -1, keepdims=True)
        return (t - mu) / jnp.sqrt(var + eps) * w + b

    residual = x
    h = ln(x, ln1_w, ln1_b)
    q = (h @ wq + bq).reshape(B, S, n_head, dh).transpose(0, 2, 1, 3)
    k = (h @ wk + bk).reshape(B, S, n_head, dh).transpose(0, 2, 1, 3)
    v = (h @ wv + bv).reshape(B, S, n_head, dh).transpose(0, 2, 1, 3)
    scores = jnp.einsum('bhqd,bhkd->bhqk', q, k) / math.sqrt(dh)
    scores = jnp.where(mask[None, None] > 0, scores, jnp.finfo(jnp.float32).min)
    probs = jax.nn.softmax(scores, axis=-1)
    attn = jnp.einsum('bhqk,bhkd->bhqd', probs, v).transpose(0, 2, 1, 3).reshape(B, S, E)
    attn = attn @ wp + bp
    x1 = attn + residual
    h2 = ln(x1, ln2_w, ln2_b)
    h2 = h2 @ w1 + b1
    h2 = 0.5 * h2 * (1.0 + lax.erf(h2 / math.sqrt(2.0)))
    h2 = h2 @ w2 + b2
    return x1 + h2


if __name__ == "__main__":
    # Small config consistent with TrajectoryTransformer Block
    B, S, E = 4, 8, 32
    n_head = 4
    block_size = 16
    observation_dim, action_dim = 3, 2
    joined_dim = observation_dim + action_dim + 2  # = 7

    key = jax.random.PRNGKey(0)
    keys = jax.random.split(key, 16)

    def init(k, shape, scale=0.05):
        return (scale * jax.random.normal(k, shape)).astype(jnp.float32)

    x = jax.random.normal(keys[0], (B, S, E), dtype=jnp.float32)

    params = (
        jnp.ones((E,), jnp.float32), jnp.zeros((E,), jnp.float32),        # ln1 w, b
        init(keys[1], (E, E)), init(keys[2], (E,)),                       # Wq, bq (in,out)
        init(keys[3], (E, E)), init(keys[4], (E,)),                       # Wk, bk
        init(keys[5], (E, E)), init(keys[6], (E,)),                       # Wv, bv
        init(keys[7], (E, E)), init(keys[8], (E,)),                       # Wproj, bproj
        jnp.ones((E,), jnp.float32), jnp.zeros((E,), jnp.float32),        # ln2 w, b
        init(keys[9], (E, 4 * E)), init(keys[10], (4 * E,)),              # W1, b1
        init(keys[11], (4 * E, E)), init(keys[12], (E,)),                 # W2, b2
    )

    # PyTorch-style mask (built at block_size, column-killed, sliced) for the reference.
    full_mask = jnp.tril(jnp.ones((block_size, block_size), jnp.float32))
    cols = jnp.arange(block_size)
    col_kill = (cols % joined_dim) == (joined_dim - 1)
    full_mask = jnp.where(col_kill[None, :], 0.0, full_mask)
    mask = full_mask[:S, :S]

    ref = reference_block(x, mask, params, n_head)

    # f32 weights, rows-per-step picked automatically (whole batch per grid step here).
    out = jax.block_until_ready(
        block_forward(x, params, n_head, joined_dim, weight_dtype=jnp.float32))
    assert out.shape == ref.shape
    assert jnp.allclose(out, ref, atol=2e-3, rtol=2e-3), "f32 mismatch vs reference"

    # bf16 weights (f32 accumulation) + explicit 2-rows-per-step to exercise a grid > 1.
    out_bf16 = jax.block_until_ready(
        block_forward(x, params, n_head, joined_dim,
                      weight_dtype=jnp.bfloat16, rows_per_step=2))
    assert out_bf16.shape == ref.shape
    assert jnp.allclose(out_bf16, ref, atol=5e-2, rtol=5e-2), "bf16 mismatch vs reference"

    print("KERNEL_OK")
</pallas_src>

<mosaic_0001>
module attributes {stable_mosaic.version = 11 : i64} {
  func.func @block_kernel(%arg0: i32, %arg1: memref<4x8x32xf32, #tpu.memory_space<vmem>>, %arg2: memref<1x8xi32, #tpu.memory_space<vmem>>, %arg3: memref<1x32xf32, #tpu.memory_space<vmem>>, %arg4: memref<1x32xf32, #tpu.memory_space<vmem>>, %arg5: memref<32x96xf32, #tpu.memory_space<vmem>>, %arg6: memref<1x96xf32, #tpu.memory_space<vmem>>, %arg7: memref<32x32xf32, #tpu.memory_space<vmem>>, %arg8: memref<1x32xf32, #tpu.memory_space<vmem>>, %arg9: memref<1x32xf32, #tpu.memory_space<vmem>>, %arg10: memref<1x32xf32, #tpu.memory_space<vmem>>, %arg11: memref<32x128xf32, #tpu.memory_space<vmem>>, %arg12: memref<1x128xf32, #tpu.memory_space<vmem>>, %arg13: memref<128x32xf32, #tpu.memory_space<vmem>>, %arg14: memref<1x32xf32, #tpu.memory_space<vmem>>, %arg15: memref<4x8x32xf32, #tpu.memory_space<vmem>>) attributes {dimension_semantics = [#tpu.dimension_semantics<parallel>], iteration_bounds = array<i64: 1>, scalar_prefetch = 0 : i64, scratch_operands = 0 : i64, tpu.core_type = #tpu.core_type<tc>, window_params = [{transform_indices = @transform_0, window_bounds = array<i64: 4, 8, 32>}, {pipeline_mode = #tpu.pipeline_mode<synchronous>, transform_indices = @transform_1, window_bounds = array<i64: 1, 8>}, {pipeline_mode = #tpu.pipeline_mode<synchronous>, transform_indices = @transform_2, window_bounds = array<i64: 1, 32>}, {pipeline_mode = #tpu.pipeline_mode<synchronous>, transform_indices = @transform_3, window_bounds = array<i64: 1, 32>}, {pipeline_mode = #tpu.pipeline_mode<synchronous>, transform_indices = @transform_4, window_bounds = array<i64: 32, 96>}, {pipeline_mode = #tpu.pipeline_mode<synchronous>, transform_indices = @transform_5, window_bounds = array<i64: 1, 96>}, {pipeline_mode = #tpu.pipeline_mode<synchronous>, transform_indices = @transform_6, window_bounds = array<i64: 32, 32>}, {pipeline_mode = #tpu.pipeline_mode<synchronous>, transform_indices = @transform_7, window_bounds = array<i64: 1, 32>}, {pipeline_mode = #tpu.pipeline_mode<synchronous>, transform_indices = @transform_8, window_bounds = array<i64: 1, 32>}, {pipeline_mode = #tpu.pipeline_mode<synchronous>, transform_indices = @transform_9, window_bounds = array<i64: 1, 32>}, {pipeline_mode = #tpu.pipeline_mode<synchronous>, transform_indices = @transform_10, window_bounds = array<i64: 32, 128>}, {pipeline_mode = #tpu.pipeline_mode<synchronous>, transform_indices = @transform_11, window_bounds = array<i64: 1, 128>}, {pipeline_mode = #tpu.pipeline_mode<synchronous>, transform_indices = @transform_12, window_bounds = array<i64: 128, 32>}, {pipeline_mode = #tpu.pipeline_mode<synchronous>, transform_indices = @transform_13, window_bounds = array<i64: 1, 32>}, {transform_indices = @transform_14, window_bounds = array<i64: 4, 8, 32>}]} {
    %c0 = arith.constant 0 : index
    %c0_0 = arith.constant 0 : index
    %c0_1 = arith.constant 0 : index
    %0 = vector.load %arg1[%c0, %c0_0, %c0_1] : memref<4x8x32xf32, #tpu.memory_space<vmem>>, vector<4x8x32xf32>
    %1 = vector.shape_cast %0 : vector<4x8x32xf32> to vector<32x32xf32>
    %2 = tpu.iota {dimensions = array<i32: 0>} : vector<8x8xi32>
    %3 = tpu.iota {dimensions = array<i32: 1>} : vector<8x8xi32>
    %4 = arith.cmpi sge, %2, %3 : vector<8x8xi32>
    %c0_2 = arith.constant 0 : index
    %c0_3 = arith.constant 0 : index
    %5 = vector.load %arg2[%c0_2, %c0_3] : memref<1x8xi32, #tpu.memory_space<vmem>>, vector<1x8xi32>
    %c0_i32 = arith.constant 0 : i32
    %6 = vector.broadcast %c0_i32 : i32 to vector<1x8xi32>
    %7 = arith.cmpi ne, %5, %6 : vector<1x8xi32>
    %8 = vector.broadcast %7 : vector<1x8xi1> to vector<8x8xi1>
    %9 = arith.andi %4, %8 : vector<8x8xi1>
    %c0_4 = arith.constant 0 : index
    %c0_5 = arith.constant 0 : index
    %10 = vector.load %arg3[%c0_4, %c0_5] : memref<1x32xf32, #tpu.memory_space<vmem>>, vector<1x32xf32>
    %c0_6 = arith.constant 0 : index
    %c0_7 = arith.constant 0 : index
    %11 = vector.load %arg4[%c0_6, %c0_7] : memref<1x32xf32, #tpu.memory_space<vmem>>, vector<1x32xf32>
    %cst = arith.constant dense<0.000000e+00> : vector<32xf32>
    %12 = vector.multi_reduction <add>, %1, %cst [1] : vector<32x32xf32> to vector<32xf32>
    %13 = vector.shape_cast %12 : vector<32xf32> to vector<32x1xf32>
    %cst_8 = arith.constant 3.200000e+01 : f32
    %14 = vector.broadcast %cst_8 : f32 to vector<32x1xf32>
    %15 = arith.divf %13, %14 : vector<32x1xf32>
    %16 = vector.broadcast %15 : vector<32x1xf32> to vector<32x32xf32>
    %17 = arith.subf %1, %16 : vector<32x32xf32>
    %18 = arith.mulf %17, %17 : vector<32x32xf32>
    %cst_9 = arith.constant dense<0.000000e+00> : vector<32xf32>
    %19 = vector.multi_reduction <add>, %18, %cst_9 [1] : vector<32x32xf32> to vector<32xf32>
    %20 = vector.shape_cast %19 : vector<32xf32> to vector<32x1xf32>
    %cst_10 = arith.constant 3.200000e+01 : f32
    %21 = vector.broadcast %cst_10 : f32 to vector<32x1xf32>
    %22 = arith.divf %20, %21 : vector<32x1xf32>
    %cst_11 = arith.constant 9.99999974E-6 : f32
    %23 = vector.broadcast %cst_11 : f32 to vector<32x1xf32>
    %24 = arith.addf %22, %23 : vector<32x1xf32>
    %25 = math.rsqrt %24 : vector<32x1xf32>
    %26 = vector.broadcast %25 : vector<32x1xf32> to vector<32x32xf32>
    %27 = arith.mulf %17, %26 : vector<32x32xf32>
    %28 = vector.broadcast %10 : vector<1x32xf32> to vector<32x32xf32>
    %29 = arith.mulf %27, %28 : vector<32x32xf32>
    %30 = vector.broadcast %11 : vector<1x32xf32> to vector<32x32xf32>
    %31 = arith.addf %29, %30 : vector<32x32xf32>
    %c0_12 = arith.constant 0 : index
    %c0_13 = arith.constant 0 : index
    %32 = vector.load %arg5[%c0_12, %c0_13] : memref<32x96xf32, #tpu.memory_space<vmem>>, vector<32x96xf32>
    %cst_14 = arith.constant dense<0.000000e+00> : vector<32x96xf32>
    %33 = tpu.matmul %31, %32, %cst_14 {dimension_numbers = #tpu.dot_dimension_numbers<[1], [0], [0], [1], [0, 0, 1, 1], [], []>} : vector<32x32xf32>, vector<32x96xf32>, vector<32x96xf32> -> vector<32x96xf32>
    %c0_15 = arith.constant 0 : index
    %c0_16 = arith.constant 0 : index
    %34 = vector.load %arg6[%c0_15, %c0_16] : memref<1x96xf32, #tpu.memory_space<vmem>>, vector<1x96xf32>
    %35 = vector.broadcast %34 : vector<1x96xf32> to vector<32x96xf32>
    %36 = arith.addf %33, %35 : vector<32x96xf32>
    %37 = vector.extract_strided_slice %36 {offsets = [0, 0], sizes = [32, 32], strides = [1, 1]} : vector<32x96xf32> to vector<32x32xf32>
    %38 = vector.shape_cast %37 : vector<32x32xf32> to vector<4x8x4x8xf32>
    %39 = tpu.transpose %38, [0, 2, 1, 3] : vector<4x8x4x8xf32> -> vector<4x4x8x8xf32>
    %40 = vector.shape_cast %39 : vector<4x4x8x8xf32> to vector<16x8x8xf32>
    %41 = vector.extract_strided_slice %36 {offsets = [0, 32], sizes = [32, 32], strides = [1, 1]} : vector<32x96xf32> to vector<32x32xf32>
    %42 = vector.shape_cast %41 : vector<32x32xf32> to vector<4x8x4x8xf32>
    %43 = tpu.transpose %42, [0, 2, 1, 3] : vector<4x8x4x8xf32> -> vector<4x4x8x8xf32>
    %44 = vector.shape_cast %43 : vector<4x4x8x8xf32> to vector<16x8x8xf32>
    %45 = vector.extract_strided_slice %36 {offsets = [0, 64], sizes = [32, 32], strides = [1, 1]} : vector<32x96xf32> to vector<32x32xf32>
    %46 = vector.shape_cast %45 : vector<32x32xf32> to vector<4x8x4x8xf32>
    %47 = tpu.transpose %46, [0, 2, 1, 3] : vector<4x8x4x8xf32> -> vector<4x4x8x8xf32>
    %48 = vector.shape_cast %47 : vector<4x4x8x8xf32> to vector<16x8x8xf32>
    "tpu.trace_start"() <{level = 10 : i32, message = "gqd,gkd->gqk"}> : () -> ()
    %cst_17 = arith.constant dense<0.000000e+00> : vector<16x8x8xf32>
    %49 = tpu.matmul %40, %44, %cst_17 {dimension_numbers = #tpu.dot_dimension_numbers<[2], [2], [1], [1], [0, 0, 0, 1, 1, 1], [0], [0]>} : vector<16x8x8xf32>, vector<16x8x8xf32>, vector<16x8x8xf32> -> vector<16x8x8xf32>
    "tpu.trace_stop"() : () -> ()
    %50 = vector.shape_cast %9 : vector<8x8xi1> to vector<1x8x8xi1>
    %cst_18 = arith.constant -3.40282347E+38 : f32
    %51 = vector.shape_cast %50 : vector<1x8x8xi1> to vector<1x8x8xi1>
    %52 = vector.broadcast %51 : vector<1x8x8xi1> to vector<16x8x8xi1>
    %53 = vector.broadcast %cst_18 : f32 to vector<16x8x8xf32>
    %54 = arith.select %52, %49, %53 : vector<16x8x8xi1>, vector<16x8x8xf32>
    %cst_19 = arith.constant dense<0xFF800000> : vector<16x8xf32>
    %55 = vector.multi_reduction <maximumf>, %54, %cst_19 [2] : vector<16x8x8xf32> to vector<16x8xf32>
    %56 = vector.shape_cast %55 : vector<16x8xf32> to vector<16x8x1xf32>
    %57 = vector.broadcast %56 : vector<16x8x1xf32> to vector<16x8x8xf32>
    %58 = arith.subf %54, %57 : vector<16x8x8xf32>
    %59 = math.exp %58 : vector<16x8x8xf32>
    %cst_20 = arith.constant dense<0.000000e+00> : vector<16x8xf32>
    %60 = vector.multi_reduction <add>, %59, %cst_20 [2] : vector<16x8x8xf32> to vector<16x8xf32>
    %61 = vector.shape_cast %60 : vector<16x8xf32> to vector<16x8x1xf32>
    %62 = tpu.reciprocal %61 {approx = true} : vector<16x8x1xf32> -> vector<16x8x1xf32>
    %63 = vector.broadcast %62 : vector<16x8x1xf32> to vector<16x8x8xf32>
    %64 = arith.mulf %59, %63 : vector<16x8x8xf32>
    "tpu.trace_start"() <{level = 10 : i32, message = "gqk,gkd->gqd"}> : () -> ()
    %cst_21 = arith.constant dense<0.000000e+00> : vector<16x8x8xf32>
    %65 = tpu.matmul %64, %48, %cst_21 {dimension_numbers = #tpu.dot_dimension_numbers<[2], [1], [1], [2], [0, 0, 0, 1, 1, 2], [0], [0]>} : vector<16x8x8xf32>, vector<16x8x8xf32>, vector<16x8x8xf32> -> vector<16x8x8xf32>
    "tpu.trace_stop"() : () -> ()
    %66 = vector.shape_cast %65 : vector<16x8x8xf32> to vector<4x4x8x8xf32>
    %67 = tpu.transpose %66, [0, 2, 1, 3] : vector<4x4x8x8xf32> -> vector<4x8x4x8xf32>
    %68 = vector.shape_cast %67 : vector<4x8x4x8xf32> to vector<32x32xf32>
    %c0_22 = arith.constant 0 : index
    %c0_23 = arith.constant 0 : index
    %69 = vector.load %arg7[%c0_22, %c0_23] : memref<32x32xf32, #tpu.memory_space<vmem>>, vector<32x32xf32>
    %cst_24 = arith.constant dense<0.000000e+00> : vector<32x32xf32>
    %70 = tpu.matmul %68, %69, %cst_24 {dimension_numbers = #tpu.dot_dimension_numbers<[1], [0], [0], [1], [0, 0, 1, 1], [], []>} : vector<32x32xf32>, vector<32x32xf32>, vector<32x32xf32> -> vector<32x32xf32>
    %c0_25 = arith.constant 0 : index
    %c0_26 = arith.constant 0 : index
    %71 = vector.load %arg8[%c0_25, %c0_26] : memref<1x32xf32, #tpu.memory_space<vmem>>, vector<1x32xf32>
    %72 = vector.broadcast %71 : vector<1x32xf32> to vector<32x32xf32>
    %73 = arith.addf %70, %72 : vector<32x32xf32>
    %74 = arith.addf %73, %1 : vector<32x32xf32>
    %c0_27 = arith.constant 0 : index
    %c0_28 = arith.constant 0 : index
    %75 = vector.load %arg9[%c0_27, %c0_28] : memref<1x32xf32, #tpu.memory_space<vmem>>, vector<1x32xf32>
    %c0_29 = arith.constant 0 : index
    %c0_30 = arith.constant 0 : index
    %76 = vector.load %arg10[%c0_29, %c0_30] : memref<1x32xf32, #tpu.memory_space<vmem>>, vector<1x32xf32>
    %cst_31 = arith.constant dense<0.000000e+00> : vector<32xf32>
    %77 = vector.multi_reduction <add>, %74, %cst_31 [1] : vector<32x32xf32> to vector<32xf32>
    %78 = vector.shape_cast %77 : vector<32xf32> to vector<32x1xf32>
    %cst_32 = arith.constant 3.200000e+01 : f32
    %79 = vector.broadcast %cst_32 : f32 to vector<32x1xf32>
    %80 = arith.divf %78, %79 : vector<32x1xf32>
    %81 = vector.broadcast %80 : vector<32x1xf32> to vector<32x32xf32>
    %82 = arith.subf %74, %81 : vector<32x32xf32>
    %83 = arith.mulf %82, %82 : vector<32x32xf32>
    %cst_33 = arith.constant dense<0.000000e+00> : vector<32xf32>
    %84 = vector.multi_reduction <add>, %83, %cst_33 [1] : vector<32x32xf32> to vector<32xf32>
    %85 = vector.shape_cast %84 : vector<32xf32> to vector<32x1xf32>
    %cst_34 = arith.constant 3.200000e+01 : f32
    %86 = vector.broadcast %cst_34 : f32 to vector<32x1xf32>
    %87 = arith.divf %85, %86 : vector<32x1xf32>
    %cst_35 = arith.constant 9.99999974E-6 : f32
    %88 = vector.broadcast %cst_35 : f32 to vector<32x1xf32>
    %89 = arith.addf %87, %88 : vector<32x1xf32>
    %90 = math.rsqrt %89 : vector<32x1xf32>
    %91 = vector.broadcast %90 : vector<32x1xf32> to vector<32x32xf32>
    %92 = arith.mulf %82, %91 : vector<32x32xf32>
    %93 = vector.broadcast %75 : vector<1x32xf32> to vector<32x32xf32>
    %94 = arith.mulf %92, %93 : vector<32x32xf32>
    %95 = vector.broadcast %76 : vector<1x32xf32> to vector<32x32xf32>
    %96 = arith.addf %94, %95 : vector<32x32xf32>
    %c0_36 = arith.constant 0 : index
    %c0_37 = arith.constant 0 : index
    %97 = vector.load %arg11[%c0_36, %c0_37] : memref<32x128xf32, #tpu.memory_space<vmem>>, vector<32x128xf32>
    %cst_38 = arith.constant dense<0.000000e+00> : vector<32x128xf32>
    %98 = tpu.matmul %96, %97, %cst_38 {dimension_numbers = #tpu.dot_dimension_numbers<[1], [0], [0], [1], [0, 0, 1, 1], [], []>} : vector<32x32xf32>, vector<32x128xf32>, vector<32x128xf32> -> vector<32x128xf32>
    %c0_39 = arith.constant 0 : index
    %c0_40 = arith.constant 0 : index
    %99 = vector.load %arg12[%c0_39, %c0_40] : memref<1x128xf32, #tpu.memory_space<vmem>>, vector<1x128xf32>
    %100 = vector.broadcast %99 : vector<1x128xf32> to vector<32x128xf32>
    %101 = arith.addf %98, %100 : vector<32x128xf32>
    %cst_41 = arith.constant 5.000000e-01 : f32
    %102 = vector.broadcast %cst_41 : f32 to vector<32x128xf32>
    %103 = arith.mulf %102, %101 : vector<32x128xf32>
    %cst_42 = arith.constant 0.707106769 : f32
    %104 = vector.broadcast %cst_42 : f32 to vector<32x128xf32>
    %105 = arith.mulf %101, %104 : vector<32x128xf32>
    %106 = math.erf %105 : vector<32x128xf32>
    %cst_43 = arith.constant 1.000000e+00 : f32
    %107 = vector.broadcast %cst_43 : f32 to vector<32x128xf32>
    %108 = arith.addf %107, %106 : vector<32x128xf32>
    %109 = arith.mulf %103, %108 : vector<32x128xf32>
    %c0_44 = arith.constant 0 : index
    %c0_45 = arith.constant 0 : index
    %110 = vector.load %arg13[%c0_44, %c0_45] : memref<128x32xf32, #tpu.memory_space<vmem>>, vector<128x32xf32>
    %cst_46 = arith.constant dense<0.000000e+00> : vector<32x32xf32>
    %111 = tpu.matmul %109, %110, %cst_46 {dimension_numbers = #tpu.dot_dimension_numbers<[1], [0], [0], [1], [0, 0, 1, 1], [], []>} : vector<32x128xf32>, vector<128x32xf32>, vector<32x32xf32> -> vector<32x32xf32>
    %c0_47 = arith.constant 0 : index
    %c0_48 = arith.constant 0 : index
    %112 = vector.load %arg14[%c0_47, %c0_48] : memref<1x32xf32, #tpu.memory_space<vmem>>, vector<1x32xf32>
    %113 = vector.broadcast %112 : vector<1x32xf32> to vector<32x32xf32>
    %114 = arith.addf %111, %113 : vector<32x32xf32>
    %115 = arith.addf %74, %114 : vector<32x32xf32>
    %116 = vector.shape_cast %115 : vector<32x32xf32> to vector<4x8x32xf32>
    %c0_49 = arith.constant 0 : index
    %c0_50 = arith.constant 0 : index
    %c0_51 = arith.constant 0 : index
    %117 = vector.load %arg15[%c0_49, %c0_50, %c0_51] : memref<4x8x32xf32, #tpu.memory_space<vmem>>, vector<4x8x32xf32>
    tpu.vector_store %arg15[%c0_49, %c0_50, %c0_51], %116 {strides = array<i32>} : memref<4x8x32xf32, #tpu.memory_space<vmem>>, vector<4x8x32xf32>,
    return
  }
  func.func @transform_0(%arg0: i32) -> (i32, i32, i32) {
    %c0_i32 = arith.constant 0 : i32
    %c0_i32_0 = arith.constant 0 : i32
    %c0_i32_1 = arith.constant 0 : i32
    return %arg0, %c0_i32, %c0_i32_0 : i32, i32, i32
  }
  func.func @transform_1(%arg0: i32) -> (i32, i32) {
    %c0_i32 = arith.constant 0 : i32
    %c0_i32_0 = arith.constant 0 : i32
    %c0_i32_1 = arith.constant 0 : i32
    return %c0_i32, %c0_i32_0 : i32, i32
  }
  func.func @transform_2(%arg0: i32) -> (i32, i32) {
    %c0_i32 = arith.constant 0 : i32
    %c0_i32_0 = arith.constant 0 : i32
    %c0_i32_1 = arith.constant 0 : i32
    return %c0_i32, %c0_i32_0 : i32, i32
  }
  func.func @transform_3(%arg0: i32) -> (i32, i32) {
    %c0_i32 = arith.constant 0 : i32
    %c0_i32_0 = arith.constant 0 : i32
    %c0_i32_1 = arith.constant 0 : i32
    return %c0_i32, %c0_i32_0 : i32, i32
  }
  func.func @transform_4(%arg0: i32) -> (i32, i32) {
    %c0_i32 = arith.constant 0 : i32
    %c0_i32_0 = arith.constant 0 : i32
    %c0_i32_1 = arith.constant 0 : i32
    return %c0_i32, %c0_i32_0 : i32, i32
  }
  func.func @transform_5(%arg0: i32) -> (i32, i32) {
    %c0_i32 = arith.constant 0 : i32
    %c0_i32_0 = arith.constant 0 : i32
    %c0_i32_1 = arith.constant 0 : i32
    return %c0_i32, %c0_i32_0 : i32, i32
  }
  func.func @transform_6(%arg0: i32) -> (i32, i32) {
    %c0_i32 = arith.constant 0 : i32
    %c0_i32_0 = arith.constant 0 : i32
    %c0_i32_1 = arith.constant 0 : i32
    return %c0_i32, %c0_i32_0 : i32, i32
  }
  func.func @transform_7(%arg0: i32) -> (i32, i32) {
    %c0_i32 = arith.constant 0 : i32
    %c0_i32_0 = arith.constant 0 : i32
    %c0_i32_1 = arith.constant 0 : i32
    return %c0_i32, %c0_i32_0 : i32, i32
  }
  func.func @transform_8(%arg0: i32) -> (i32, i32) {
    %c0_i32 = arith.constant 0 : i32
    %c0_i32_0 = arith.constant 0 : i32
    %c0_i32_1 = arith.constant 0 : i32
    return %c0_i32, %c0_i32_0 : i32, i32
  }
  func.func @transform_9(%arg0: i32) -> (i32, i32) {
    %c0_i32 = arith.constant 0 : i32
    %c0_i32_0 = arith.constant 0 : i32
    %c0_i32_1 = arith.constant 0 : i32
    return %c0_i32, %c0_i32_0 : i32, i32
  }
  func.func @transform_10(%arg0: i32) -> (i32, i32) {
    %c0_i32 = arith.constant 0 : i32
    %c0_i32_0 = arith.constant 0 : i32
    %c0_i32_1 = arith.constant 0 : i32
    return %c0_i32, %c0_i32_0 : i32, i32
  }
  func.func @transform_11(%arg0: i32) -> (i32, i32) {
    %c0_i32 = arith.constant 0 : i32
    %c0_i32_0 = arith.constant 0 : i32
    %c0_i32_1 = arith.constant 0 : i32
    return %c0_i32, %c0_i32_0 : i32, i32
  }
  func.func @transform_12(%arg0: i32) -> (i32, i32) {
    %c0_i32 = arith.constant 0 : i32
    %c0_i32_0 = arith.constant 0 : i32
    %c0_i32_1 = arith.constant 0 : i32
    return %c0_i32, %c0_i32_0 : i32, i32
  }
  func.func @transform_13(%arg0: i32) -> (i32, i32) {
    %c0_i32 = arith.constant 0 : i32
    %c0_i32_0 = arith.constant 0 : i32
    %c0_i32_1 = arith.constant 0 : i32
    return %c0_i32, %c0_i32_0 : i32, i32
  }
  func.func @transform_14(%arg0: i32) -> (i32, i32, i32) {
    %c0_i32 = arith.constant 0 : i32
    %c0_i32_0 = arith.constant 0 : i32
    %c0_i32_1 = arith.constant 0 : i32
    return %arg0, %c0_i32, %c0_i32_0 : i32, i32, i32
  }
}

module attributes {stable_mosaic.version = 11 : i64} {
  func.func @block_kernel(%arg0: i32, %arg1: memref<1x8x32xf32, #tpu.memory_space<vmem>>, %arg2: memref<1x8xi32, #tpu.memory_space<vmem>>, %arg3: memref<1x32xf32, #tpu.memory_space<vmem>>, %arg4: memref<1x32xf32, #tpu.memory_space<vmem>>, %arg5: memref<32x96xf32, #tpu.memory_space<vmem>>, %arg6: memref<1x96xf32, #tpu.memory_space<vmem>>, %arg7: memref<32x32xf32, #tpu.memory_space<vmem>>, %arg8: memref<1x32xf32, #tpu.memory_space<vmem>>, %arg9: memref<1x32xf32, #tpu.memory_space<vmem>>, %arg10: memref<1x32xf32, #tpu.memory_space<vmem>>, %arg11: memref<32x128xf32, #tpu.memory_space<vmem>>, %arg12: memref<1x128xf32, #tpu.memory_space<vmem>>, %arg13: memref<128x32xf32, #tpu.memory_space<vmem>>, %arg14: memref<1x32xf32, #tpu.memory_space<vmem>>, %arg15: memref<1x8x32xf32, #tpu.memory_space<vmem>>) attributes {dimension_semantics = [#tpu.dimension_semantics<parallel>], iteration_bounds = array<i64: 4>, scalar_prefetch = 0 : i64, scratch_operands = 0 : i64, tpu.core_type = #tpu.core_type<tc>, window_params = [{transform_indices = @transform_0, window_bounds = array<i64: 1, 8, 32>}, {pipeline_mode = #tpu.pipeline_mode<synchronous>, transform_indices = @transform_1, window_bounds = array<i64: 1, 8>}, {pipeline_mode = #tpu.pipeline_mode<synchronous>, transform_indices = @transform_2, window_bounds = array<i64: 1, 32>}, {pipeline_mode = #tpu.pipeline_mode<synchronous>, transform_indices = @transform_3, window_bounds = array<i64: 1, 32>}, {pipeline_mode = #tpu.pipeline_mode<synchronous>, transform_indices = @transform_4, window_bounds = array<i64: 32, 96>}, {pipeline_mode = #tpu.pipeline_mode<synchronous>, transform_indices = @transform_5, window_bounds = array<i64: 1, 96>}, {pipeline_mode = #tpu.pipeline_mode<synchronous>, transform_indices = @transform_6, window_bounds = array<i64: 32, 32>}, {pipeline_mode = #tpu.pipeline_mode<synchronous>, transform_indices = @transform_7, window_bounds = array<i64: 1, 32>}, {pipeline_mode = #tpu.pipeline_mode<synchronous>, transform_indices = @transform_8, window_bounds = array<i64: 1, 32>}, {pipeline_mode = #tpu.pipeline_mode<synchronous>, transform_indices = @transform_9, window_bounds = array<i64: 1, 32>}, {pipeline_mode = #tpu.pipeline_mode<synchronous>, transform_indices = @transform_10, window_bounds = array<i64: 32, 128>}, {pipeline_mode = #tpu.pipeline_mode<synchronous>, transform_indices = @transform_11, window_bounds = array<i64: 1, 128>}, {pipeline_mode = #tpu.pipeline_mode<synchronous>, transform_indices = @transform_12, window_bounds = array<i64: 128, 32>}, {pipeline_mode = #tpu.pipeline_mode<synchronous>, transform_indices = @transform_13, window_bounds = array<i64: 1, 32>}, {transform_indices = @transform_14, window_bounds = array<i64: 1, 8, 32>}]} {
    %c0 = arith.constant 0 : index
    %c0_0 = arith.constant 0 : index
    %c0_1 = arith.constant 0 : index
    %0 = vector.load %arg1[%c0, %c0_0, %c0_1] : memref<1x8x32xf32, #tpu.memory_space<vmem>>, vector<1x8x32xf32>
    %1 = vector.shape_cast %0 : vector<1x8x32xf32> to vector<8x32xf32>
    %2 = tpu.iota {dimensions = array<i32: 0>} : vector<8x8xi32>
    %3 = tpu.iota {dimensions = array<i32: 1>} : vector<8x8xi32>
    %4 = arith.cmpi sge, %2, %3 : vector<8x8xi32>
    %c0_2 = arith.constant 0 : index
    %c0_3 = arith.constant 0 : index
    %5 = vector.load %arg2[%c0_2, %c0_3] : memref<1x8xi32, #tpu.memory_space<vmem>>, vector<1x8xi32>
    %c0_i32 = arith.constant 0 : i32
    %6 = vector.broadcast %c0_i32 : i32 to vector<1x8xi32>
    %7 = arith.cmpi ne, %5, %6 : vector<1x8xi32>
    %8 = vector.broadcast %7 : vector<1x8xi1> to vector<8x8xi1>
    %9 = arith.andi %4, %8 : vector<8x8xi1>
    %c0_4 = arith.constant 0 : index
    %c0_5 = arith.constant 0 : index
    %10 = vector.load %arg3[%c0_4, %c0_5] : memref<1x32xf32, #tpu.memory_space<vmem>>, vector<1x32xf32>
    %c0_6 = arith.constant 0 : index
    %c0_7 = arith.constant 0 : index
    %11 = vector.load %arg4[%c0_6, %c0_7] : memref<1x32xf32, #tpu.memory_space<vmem>>, vector<1x32xf32>
    %cst = arith.constant dense<0.000000e+00> : vector<8xf32>
    %12 = vector.multi_reduction <add>, %1, %cst [1] : vector<8x32xf32> to vector<8xf32>
    %13 = vector.shape_cast %12 : vector<8xf32> to vector<8x1xf32>
    %cst_8 = arith.constant 3.200000e+01 : f32
    %14 = vector.broadcast %cst_8 : f32 to vector<8x1xf32>
    %15 = arith.divf %13, %14 : vector<8x1xf32>
    %16 = vector.broadcast %15 : vector<8x1xf32> to vector<8x32xf32>
    %17 = arith.subf %1, %16 : vector<8x32xf32>
    %18 = arith.mulf %17, %17 : vector<8x32xf32>
    %cst_9 = arith.constant dense<0.000000e+00> : vector<8xf32>
    %19 = vector.multi_reduction <add>, %18, %cst_9 [1] : vector<8x32xf32> to vector<8xf32>
    %20 = vector.shape_cast %19 : vector<8xf32> to vector<8x1xf32>
    %cst_10 = arith.constant 3.200000e+01 : f32
    %21 = vector.broadcast %cst_10 : f32 to vector<8x1xf32>
    %22 = arith.divf %20, %21 : vector<8x1xf32>
    %cst_11 = arith.constant 9.99999974E-6 : f32
    %23 = vector.broadcast %cst_11 : f32 to vector<8x1xf32>
    %24 = arith.addf %22, %23 : vector<8x1xf32>
    %25 = math.rsqrt %24 : vector<8x1xf32>
    %26 = vector.broadcast %25 : vector<8x1xf32> to vector<8x32xf32>
    %27 = arith.mulf %17, %26 : vector<8x32xf32>
    %28 = vector.broadcast %10 : vector<1x32xf32> to vector<8x32xf32>
    %29 = arith.mulf %27, %28 : vector<8x32xf32>
    %30 = vector.broadcast %11 : vector<1x32xf32> to vector<8x32xf32>
    %31 = arith.addf %29, %30 : vector<8x32xf32>
    %c0_12 = arith.constant 0 : index
    %c0_13 = arith.constant 0 : index
    %32 = vector.load %arg5[%c0_12, %c0_13] : memref<32x96xf32, #tpu.memory_space<vmem>>, vector<32x96xf32>
    %cst_14 = arith.constant dense<0.000000e+00> : vector<8x96xf32>
    %33 = tpu.matmul %31, %32, %cst_14 {dimension_numbers = #tpu.dot_dimension_numbers<[1], [0], [0], [1], [0, 0, 1, 1], [], []>} : vector<8x32xf32>, vector<32x96xf32>, vector<8x96xf32> -> vector<8x96xf32>
    %c0_15 = arith.constant 0 : index
    %c0_16 = arith.constant 0 : index
    %34 = vector.load %arg6[%c0_15, %c0_16] : memref<1x96xf32, #tpu.memory_space<vmem>>, vector<1x96xf32>
    %35 = vector.broadcast %34 : vector<1x96xf32> to vector<8x96xf32>
    %36 = arith.addf %33, %35 : vector<8x96xf32>
    %37 = vector.extract_strided_slice %36 {offsets = [0, 0], sizes = [8, 32], strides = [1, 1]} : vector<8x96xf32> to vector<8x32xf32>
    %38 = vector.extract_strided_slice %37 {offsets = [0, 0], sizes = [8, 8], strides = [1, 1]} : vector<8x32xf32> to vector<8x8xf32>
    %39 = vector.extract_strided_slice %37 {offsets = [0, 8], sizes = [8, 8], strides = [1, 1]} : vector<8x32xf32> to vector<8x8xf32>
    %40 = vector.extract_strided_slice %37 {offsets = [0, 16], sizes = [8, 8], strides = [1, 1]} : vector<8x32xf32> to vector<8x8xf32>
    %41 = vector.extract_strided_slice %37 {offsets = [0, 24], sizes = [8, 8], strides = [1, 1]} : vector<8x32xf32> to vector<8x8xf32>
    %42 = vector.shape_cast %38 : vector<8x8xf32> to vector<1x8x8xf32>
    %43 = vector.shape_cast %39 : vector<8x8xf32> to vector<1x8x8xf32>
    %44 = vector.shape_cast %40 : vector<8x8xf32> to vector<1x8x8xf32>
    %45 = vector.shape_cast %41 : vector<8x8xf32> to vector<1x8x8xf32>
    %46 = tpu.concatenate %42, %43, %44, %45 in 0 : vector<1x8x8xf32>, vector<1x8x8xf32>, vector<1x8x8xf32>, vector<1x8x8xf32> -> vector<4x8x8xf32>
    %47 = vector.extract_strided_slice %36 {offsets = [0, 32], sizes = [8, 32], strides = [1, 1]} : vector<8x96xf32> to vector<8x32xf32>
    %48 = vector.extract_strided_slice %47 {offsets = [0, 0], sizes = [8, 8], strides = [1, 1]} : vector<8x32xf32> to vector<8x8xf32>
    %49 = vector.extract_strided_slice %47 {offsets = [0, 8], sizes = [8, 8], strides = [1, 1]} : vector<8x32xf32> to vector<8x8xf32>
    %50 = vector.extract_strided_slice %47 {offsets = [0, 16], sizes = [8, 8], strides = [1, 1]} : vector<8x32xf32> to vector<8x8xf32>
    %51 = vector.extract_strided_slice %47 {offsets = [0, 24], sizes = [8, 8], strides = [1, 1]} : vector<8x32xf32> to vector<8x8xf32>
    %52 = vector.shape_cast %48 : vector<8x8xf32> to vector<1x8x8xf32>
    %53 = vector.shape_cast %49 : vector<8x8xf32> to vector<1x8x8xf32>
    %54 = vector.shape_cast %50 : vector<8x8xf32> to vector<1x8x8xf32>
    %55 = vector.shape_cast %51 : vector<8x8xf32> to vector<1x8x8xf32>
    %56 = tpu.concatenate %52, %53, %54, %55 in 0 : vector<1x8x8xf32>, vector<1x8x8xf32>, vector<1x8x8xf32>, vector<1x8x8xf32> -> vector<4x8x8xf32>
    %57 = vector.extract_strided_slice %36 {offsets = [0, 64], sizes = [8, 32], strides = [1, 1]} : vector<8x96xf32> to vector<8x32xf32>
    %58 = vector.extract_strided_slice %57 {offsets = [0, 0], sizes = [8, 8], strides = [1, 1]} : vector<8x32xf32> to vector<8x8xf32>
    %59 = vector.extract_strided_slice %57 {offsets = [0, 8], sizes = [8, 8], strides = [1, 1]} : vector<8x32xf32> to vector<8x8xf32>
    %60 = vector.extract_strided_slice %57 {offsets = [0, 16], sizes = [8, 8], strides = [1, 1]} : vector<8x32xf32> to vector<8x8xf32>
    %61 = vector.extract_strided_slice %57 {offsets = [0, 24], sizes = [8, 8], strides = [1, 1]} : vector<8x32xf32> to vector<8x8xf32>
    %62 = vector.shape_cast %58 : vector<8x8xf32> to vector<1x8x8xf32>
    %63 = vector.shape_cast %59 : vector<8x8xf32> to vector<1x8x8xf32>
    %64 = vector.shape_cast %60 : vector<8x8xf32> to vector<1x8x8xf32>
    %65 = vector.shape_cast %61 : vector<8x8xf32> to vector<1x8x8xf32>
    %66 = tpu.concatenate %62, %63, %64, %65 in 0 : vector<1x8x8xf32>, vector<1x8x8xf32>, vector<1x8x8xf32>, vector<1x8x8xf32> -> vector<4x8x8xf32>
    "tpu.trace_start"() <{level = 10 : i32, message = "gqd,gkd->gqk"}> : () -> ()
    %cst_17 = arith.constant dense<0.000000e+00> : vector<4x8x8xf32>
    %67 = tpu.matmul %46, %56, %cst_17 {dimension_numbers = #tpu.dot_dimension_numbers<[2], [2], [1], [1], [0, 0, 0, 1, 1, 1], [0], [0]>} : vector<4x8x8xf32>, vector<4x8x8xf32>, vector<4x8x8xf32> -> vector<4x8x8xf32>
    "tpu.trace_stop"() : () -> ()
    %68 = vector.shape_cast %9 : vector<8x8xi1> to vector<1x8x8xi1>
    %cst_18 = arith.constant -3.40282347E+38 : f32
    %69 = vector.shape_cast %68 : vector<1x8x8xi1> to vector<1x8x8xi1>
    %70 = vector.broadcast %69 : vector<1x8x8xi1> to vector<4x8x8xi1>
    %71 = vector.broadcast %cst_18 : f32 to vector<4x8x8xf32>
    %72 = arith.select %70, %67, %71 : vector<4x8x8xi1>, vector<4x8x8xf32>
    %cst_19 = arith.constant dense<0xFF800000> : vector<4x8xf32>
    %73 = vector.multi_reduction <maximumf>, %72, %cst_19 [2] : vector<4x8x8xf32> to vector<4x8xf32>
    %74 = vector.shape_cast %73 : vector<4x8xf32> to vector<4x8x1xf32>
    %75 = vector.broadcast %74 : vector<4x8x1xf32> to vector<4x8x8xf32>
    %76 = arith.subf %72, %75 : vector<4x8x8xf32>
    %77 = math.exp %76 : vector<4x8x8xf32>
    %cst_20 = arith.constant dense<0.000000e+00> : vector<4x8xf32>
    %78 = vector.multi_reduction <add>, %77, %cst_20 [2] : vector<4x8x8xf32> to vector<4x8xf32>
    %79 = vector.shape_cast %78 : vector<4x8xf32> to vector<4x8x1xf32>
    %80 = tpu.reciprocal %79 {approx = true} : vector<4x8x1xf32> -> vector<4x8x1xf32>
    %81 = vector.broadcast %80 : vector<4x8x1xf32> to vector<4x8x8xf32>
    %82 = arith.mulf %77, %81 : vector<4x8x8xf32>
    "tpu.trace_start"() <{level = 10 : i32, message = "gqk,gkd->gqd"}> : () -> ()
    %cst_21 = arith.constant dense<0.000000e+00> : vector<4x8x8xf32>
    %83 = tpu.matmul %82, %66, %cst_21 {dimension_numbers = #tpu.dot_dimension_numbers<[2], [1], [1], [2], [0, 0, 0, 1, 1, 2], [0], [0]>} : vector<4x8x8xf32>, vector<4x8x8xf32>, vector<4x8x8xf32> -> vector<4x8x8xf32>
    "tpu.trace_stop"() : () -> ()
    %84 = vector.extract_strided_slice %83 {offsets = [0, 0, 0], sizes = [1, 8, 8], strides = [1, 1, 1]} : vector<4x8x8xf32> to vector<1x8x8xf32>
    %85 = vector.shape_cast %84 : vector<1x8x8xf32> to vector<8x8xf32>
    %86 = vector.extract_strided_slice %83 {offsets = [1, 0, 0], sizes = [1, 8, 8], strides = [1, 1, 1]} : vector<4x8x8xf32> to vector<1x8x8xf32>
    %87 = vector.shape_cast %86 : vector<1x8x8xf32> to vector<8x8xf32>
    %88 = vector.extract_strided_slice %83 {offsets = [2, 0, 0], sizes = [1, 8, 8], strides = [1, 1, 1]} : vector<4x8x8xf32> to vector<1x8x8xf32>
    %89 = vector.shape_cast %88 : vector<1x8x8xf32> to vector<8x8xf32>
    %90 = vector.extract_strided_slice %83 {offsets = [3, 0, 0], sizes = [1, 8, 8], strides = [1, 1, 1]} : vector<4x8x8xf32> to vector<1x8x8xf32>
    %91 = vector.shape_cast %90 : vector<1x8x8xf32> to vector<8x8xf32>
    %92 = tpu.concatenate %85, %87, %89, %91 in 1 : vector<8x8xf32>, vector<8x8xf32>, vector<8x8xf32>, vector<8x8xf32> -> vector<8x32xf32>
    %c0_22 = arith.constant 0 : index
    %c0_23 = arith.constant 0 : index
    %93 = vector.load %arg7[%c0_22, %c0_23] : memref<32x32xf32, #tpu.memory_space<vmem>>, vector<32x32xf32>
    %cst_24 = arith.constant dense<0.000000e+00> : vector<8x32xf32>
    %94 = tpu.matmul %92, %93, %cst_24 {dimension_numbers = #tpu.dot_dimension_numbers<[1], [0], [0], [1], [0, 0, 1, 1], [], []>} : vector<8x32xf32>, vector<32x32xf32>, vector<8x32xf32> -> vector<8x32xf32>
    %c0_25 = arith.constant 0 : index
    %c0_26 = arith.constant 0 : index
    %95 = vector.load %arg8[%c0_25, %c0_26] : memref<1x32xf32, #tpu.memory_space<vmem>>, vector<1x32xf32>
    %96 = vector.broadcast %95 : vector<1x32xf32> to vector<8x32xf32>
    %97 = arith.addf %94, %96 : vector<8x32xf32>
    %98 = arith.addf %97, %1 : vector<8x32xf32>
    %c0_27 = arith.constant 0 : index
    %c0_28 = arith.constant 0 : index
    %99 = vector.load %arg9[%c0_27, %c0_28] : memref<1x32xf32, #tpu.memory_space<vmem>>, vector<1x32xf32>
    %c0_29 = arith.constant 0 : index
    %c0_30 = arith.constant 0 : index
    %100 = vector.load %arg10[%c0_29, %c0_30] : memref<1x32xf32, #tpu.memory_space<vmem>>, vector<1x32xf32>
    %cst_31 = arith.constant dense<0.000000e+00> : vector<8xf32>
    %101 = vector.multi_reduction <add>, %98, %cst_31 [1] : vector<8x32xf32> to vector<8xf32>
    %102 = vector.shape_cast %101 : vector<8xf32> to vector<8x1xf32>
    %cst_32 = arith.constant 3.200000e+01 : f32
    %103 = vector.broadcast %cst_32 : f32 to vector<8x1xf32>
    %104 = arith.divf %102, %103 : vector<8x1xf32>
    %105 = vector.broadcast %104 : vector<8x1xf32> to vector<8x32xf32>
    %106 = arith.subf %98, %105 : vector<8x32xf32>
    %107 = arith.mulf %106, %106 : vector<8x32xf32>
    %cst_33 = arith.constant dense<0.000000e+00> : vector<8xf32>
    %108 = vector.multi_reduction <add>, %107, %cst_33 [1] : vector<8x32xf32> to vector<8xf32>
    %109 = vector.shape_cast %108 : vector<8xf32> to vector<8x1xf32>
    %cst_34 = arith.constant 3.200000e+01 : f32
    %110 = vector.broadcast %cst_34 : f32 to vector<8x1xf32>
    %111 = arith.divf %109, %110 : vector<8x1xf32>
    %cst_35 = arith.constant 9.99999974E-6 : f32
    %112 = vector.broadcast %cst_35 : f32 to vector<8x1xf32>
    %113 = arith.addf %111, %112 : vector<8x1xf32>
    %114 = math.rsqrt %113 : vector<8x1xf32>
    %115 = vector.broadcast %114 : vector<8x1xf32> to vector<8x32xf32>
    %116 = arith.mulf %106, %115 : vector<8x32xf32>
    %117 = vector.broadcast %99 : vector<1x32xf32> to vector<8x32xf32>
    %118 = arith.mulf %116, %117 : vector<8x32xf32>
    %119 = vector.broadcast %100 : vector<1x32xf32> to vector<8x32xf32>
    %120 = arith.addf %118, %119 : vector<8x32xf32>
    %c0_36 = arith.constant 0 : index
    %c0_37 = arith.constant 0 : index
    %121 = vector.load %arg11[%c0_36, %c0_37] : memref<32x128xf32, #tpu.memory_space<vmem>>, vector<32x128xf32>
    %cst_38 = arith.constant dense<0.000000e+00> : vector<8x128xf32>
    %122 = tpu.matmul %120, %121, %cst_38 {dimension_numbers = #tpu.dot_dimension_numbers<[1], [0], [0], [1], [0, 0, 1, 1], [], []>} : vector<8x32xf32>, vector<32x128xf32>, vector<8x128xf32> -> vector<8x128xf32>
    %c0_39 = arith.constant 0 : index
    %c0_40 = arith.constant 0 : index
    %123 = vector.load %arg12[%c0_39, %c0_40] : memref<1x128xf32, #tpu.memory_space<vmem>>, vector<1x128xf32>
    %124 = vector.broadcast %123 : vector<1x128xf32> to vector<8x128xf32>
    %125 = arith.addf %122, %124 : vector<8x128xf32>
    %cst_41 = arith.constant 5.000000e-01 : f32
    %126 = vector.broadcast %cst_41 : f32 to vector<8x128xf32>
    %127 = arith.mulf %126, %125 : vector<8x128xf32>
    %cst_42 = arith.constant 0.707106769 : f32
    %128 = vector.broadcast %cst_42 : f32 to vector<8x128xf32>
    %129 = arith.mulf %125, %128 : vector<8x128xf32>
    %130 = math.erf %129 : vector<8x128xf32>
    %cst_43 = arith.constant 1.000000e+00 : f32
    %131 = vector.broadcast %cst_43 : f32 to vector<8x128xf32>
    %132 = arith.addf %131, %130 : vector<8x128xf32>
    %133 = arith.mulf %127, %132 : vector<8x128xf32>
    %c0_44 = arith.constant 0 : index
    %c0_45 = arith.constant 0 : index
    %134 = vector.load %arg13[%c0_44, %c0_45] : memref<128x32xf32, #tpu.memory_space<vmem>>, vector<128x32xf32>
    %cst_46 = arith.constant dense<0.000000e+00> : vector<8x32xf32>
    %135 = tpu.matmul %133, %134, %cst_46 {dimension_numbers = #tpu.dot_dimension_numbers<[1], [0], [0], [1], [0, 0, 1, 1], [], []>} : vector<8x128xf32>, vector<128x32xf32>, vector<8x32xf32> -> vector<8x32xf32>
    %c0_47 = arith.constant 0 : index
    %c0_48 = arith.constant 0 : index
    %136 = vector.load %arg14[%c0_47, %c0_48] : memref<1x32xf32, #tpu.memory_space<vmem>>, vector<1x32xf32>
    %137 = vector.broadcast %136 : vector<1x32xf32> to vector<8x32xf32>
    %138 = arith.addf %135, %137 : vector<8x32xf32>
    %139 = arith.addf %98, %138 : vector<8x32xf32>
    %140 = vector.shape_cast %139 : vector<8x32xf32> to vector<1x8x32xf32>
    %c0_49 = arith.constant 0 : index
    %c0_50 = arith.constant 0 : index
    %c0_51 = arith.constant 0 : index
    %141 = vector.load %arg15[%c0_49, %c0_50, %c0_51] : memref<1x8x32xf32, #tpu.memory_space<vmem>>, vector<1x8x32xf32>
    tpu.vector_store %arg15[%c0_49, %c0_50, %c0_51], %140 {strides = array<i32>} : memref<1x8x32xf32, #tpu.memory_space<vmem>>, vector<1x8x32xf32>,
    return
  }
  func.func @transform_0(%arg0: i32) -> (i32, i32, i32) {
    %c0_i32 = arith.constant 0 : i32
    %c0_i32_0 = arith.constant 0 : i32
    %c0_i32_1 = arith.constant 0 : i32
    return %arg0, %c0_i32, %c0_i32_0 : i32, i32, i32
  }
  func.func @transform_1(%arg0: i32) -> (i32, i32) {
    %c0_i32 = arith.constant 0 : i32
    %c0_i32_0 = arith.constant 0 : i32
    %c0_i32_1 = arith.constant 0 : i32
    return %c0_i32, %c0_i32_0 : i32, i32
  }
  func.func @transform_2(%arg0: i32) -> (i32, i32) {
    %c0_i32 = arith.constant 0 : i32
    %c0_i32_0 = arith.constant 0 : i32
    %c0_i32_1 = arith.constant 0 : i32
    return %c0_i32, %c0_i32_0 : i32, i32
  }
  func.func @transform_3(%arg0: i32) -> (i32, i32) {
    %c0_i32 = arith.constant 0 : i32
    %c0_i32_0 = arith.constant 0 : i32
    %c0_i32_1 = arith.constant 0 : i32
    return %c0_i32, %c0_i32_0 : i32, i32
  }
  func.func @transform_4(%arg0: i32) -> (i32, i32) {
    %c0_i32 = arith.constant 0 : i32
    %c0_i32_0 = arith.constant 0 : i32
    %c0_i32_1 = arith.constant 0 : i32
    return %c0_i32, %c0_i32_0 : i32, i32
  }
  func.func @transform_5(%arg0: i32) -> (i32, i32) {
    %c0_i32 = arith.constant 0 : i32
    %c0_i32_0 = arith.constant 0 : i32
    %c0_i32_1 = arith.constant 0 : i32
    return %c0_i32, %c0_i32_0 : i32, i32
  }
  func.func @transform_6(%arg0: i32) -> (i32, i32) {
    %c0_i32 = arith.constant 0 : i32
    %c0_i32_0 = arith.constant 0 : i32
    %c0_i32_1 = arith.constant 0 : i32
    return %c0_i32, %c0_i32_0 : i32, i32
  }
  func.func @transform_7(%arg0: i32) -> (i32, i32) {
    %c0_i32 = arith.constant 0 : i32
    %c0_i32_0 = arith.constant 0 : i32
    %c0_i32_1 = arith.constant 0 : i32
    return %c0_i32, %c0_i32_0 : i32, i32
  }
  func.func @transform_8(%arg0: i32) -> (i32, i32) {
    %c0_i32 = arith.constant 0 : i32
    %c0_i32_0 = arith.constant 0 : i32
    %c0_i32_1 = arith.constant 0 : i32
    return %c0_i32, %c0_i32_0 : i32, i32
  }
  func.func @transform_9(%arg0: i32) -> (i32, i32) {
    %c0_i32 = arith.constant 0 : i32
    %c0_i32_0 = arith.constant 0 : i32
    %c0_i32_1 = arith.constant 0 : i32
    return %c0_i32, %c0_i32_0 : i32, i32
  }
  func.func @transform_10(%arg0: i32) -> (i32, i32) {
    %c0_i32 = arith.constant 0 : i32
    %c0_i32_0 = arith.constant 0 : i32
    %c0_i32_1 = arith.constant 0 : i32
    return %c0_i32, %c0_i32_0 : i32, i32
  }
  func.func @transform_11(%arg0: i32) -> (i32, i32) {
    %c0_i32 = arith.constant 0 : i32
    %c0_i32_0 = arith.constant 0 : i32
    %c0_i32_1 = arith.constant 0 : i32
    return %c0_i32, %c0_i32_0 : i32, i32
  }
  func.func @transform_12(%arg0: i32) -> (i32, i32) {
    %c0_i32 = arith.constant 0 : i32
    %c0_i32_0 = arith.constant 0 : i32
    %c0_i32_1 = arith.constant 0 : i32
    return %c0_i32, %c0_i32_0 : i32, i32
  }
  func.func @transform_13(%arg0: i32) -> (i32, i32) {
    %c0_i32 = arith.constant 0 : i32
    %c0_i32_0 = arith.constant 0 : i32
    %c0_i32_1 = arith.constant 0 : i32
    return %c0_i32, %c0_i32_0 : i32, i32
  }
  func.func @transform_14(%arg0: i32) -> (i32, i32, i32) {
    %c0_i32 = arith.constant 0 : i32
    %c0_i32_0 = arith.constant 0 : i32
    %c0_i32_1 = arith.constant 0 : i32
    return %arg0, %c0_i32, %c0_i32_0 : i32, i32, i32
  }
}

</mosaic_0001>

<bundles_post_ra>
// kernel: tpu_custom_call.1
= control target key start
LH: loop header
LB: loop body
LE: loop exit
PB: predicated region body
PF: predicated region fallthrough
CT: control target
= control target key end

     0   :  { %vm68_vm0 = vcmask 261120   ;;  %s7608_s0 = inlined_call_operand.vmem [shape: f32[4,8,32], index: 0, kind: input, shape index: {}]   ;;  %s7609_s1 = inlined_call_operand.vmem [shape: s32[1,8], index: 1, kind: input, shape index: {}]   ;;  %s7610_s2 = inlined_call_operand.vmem [shape: f32[1,32], index: 2, kind: input, shape index: {}]   ;;  %s7611_s3 = inlined_call_operand.vmem [shape: f32[1,32], index: 3, kind: input, shape index: {}]   ;;  %s7612_s4 = inlined_call_operand.vmem [shape: f32[32,96], index: 4, kind: input, shape index: {}]   ;;  %s7613_s5 = inlined_call_operand.vmem [shape: f32[1,96], index: 5, kind: input, shape index: {}]   ;;  %s7614_s6 = inlined_call_operand.vmem [shape: f32[32,32], index: 6, kind: input, shape index: {}]   ;;  %s7615_s7 = inlined_call_operand.vmem [shape: f32[1,32], index: 7, kind: input, shape index: {}]   ;;  %s7616_s8 = inlined_call_operand.vmem [shape: f32[1,32], index: 8, kind: input, shape index: {}]   ;;  %s7617_s9 = inlined_call_operand.vmem [shape: f32[1,32], index: 9, kind: input, shape index: {}]   ;;  %s7618_s10 = inlined_call_operand.vmem [shape: f32[32,128], index: 10, kind: input, shape index: {}]   ;;  %s7619_s11 = inlined_call_operand.vmem [shape: f32[1,128], index: 11, kind: input, shape index: {}]   ;;  %s7620_s12 = inlined_call_operand.vmem [shape: f32[128,32], index: 12, kind: input, shape index: {}]   ;;  %s7621_s13 = inlined_call_operand.vmem [shape: f32[1,32], index: 13, kind: input, shape index: {}]   ;;  %s7622_s14 = inlined_call_operand.hbm [shape: f32[4,8,32], index: 14, kind: output, shape index: {}]  }
   0x1   :  { %v48_v0 = vld [vmem:[%s7608_s0] sm:$0xff]  ;;  %v50_v1 = vld [vmem:[%s7608_s0 + $0x10] sm:$0xff]  ;;  %v49_v2 = vld [vmem:[%s7608_s0 + $0x8] sm:$0xff] }
   0x2   :  { %v69_v3 = vsel %vm68_vm0, %v48_v0, 0.0  ;;  %v75_v4 = vsel %vm68_vm0, %v50_v1, 0.0  ;;  %v51_v5 = vld [vmem:[%s7608_s0 + $0x18] sm:$0xff] }
   0x3   :  { %19 = vsyncpa [#allocation3], 0  ;;  %70 = vadd.xlane.f32.xlu0 %v69_v3  ;;  %76 = vadd.xlane.f32.xlu1 %v75_v4  ;;  %v72_v6 = vsel %vm68_vm0, %v49_v2, 0.0  ;;  %v78_v7 = vsel %vm68_vm0, %v51_v5, 0.0  ;;  %v142_v28 = vld [vmem:[%s7612_s4] sm:$0xff]  ;;  %v143_v29 = vld [vmem:[%s7612_s4 + $0x8] sm:$0xff] }
   0x4   :  { %v144_v30 = vld [vmem:[%s7612_s4 + $0x10] sm:$0xff]  ;;  %v6097_v31 = vpack.c.bf16 %v143_v29, %v142_v28  ;;  %v145_v32 = vld [vmem:[%s7612_s4 + $0x18] sm:$0xff]  ;;  %v5649_v47 = vld [vmem:[%s7610_s2] ss:$0 sm:$0xff]  ;;  %s6284_s16 = smov 112   ;;  %s6285_s17 = smov 120  }
   0x5   :  { %v6101_v33 = vpack.c.bf16 %v145_v32, %v144_v30  ;;  %v5650_v49 = vld [vmem:[%s7611_s3] ss:$0 sm:$0xff]  ;;  %s6286_s18 = smov 104   ;;  %s6290_s19 = smov 64   ;;  %vm6292_vm1 = vmmov 0   ;;  %vm2018_vm2 = vcmask 64512  }
   0x6   :  { %6098 = vmatprep.subr.bf16.mxu0 %v6097_v31  ;;  %s6295_s26 = smov 16   ;;  %s6296_s30 = smov 24   ;;  %vm5193_vm7 = vcmask 130048   ;;  %vm5198_vm8 = vcmask 195584  }
   0x7   :  { %73 = vadd.xlane.f32.xlu0 %v72_v6  ;;  %79 = vadd.xlane.f32.xlu1 %v78_v7 }
   0x8   :  { %6100 = vmatpush3.bf16.msra.mxu0 %v6097_v31 }
   0x9   :  { %6102 = vmatprep.subr.bf16.mxu0 %v6101_v33 }
   0xc   :  { %6104 = vmatpush3.bf16.msra.mxu0 %v6101_v33 }
  0x90   :  { %v71_v8 = vpop.xlane.xlu0 %70  ;;  %v77_v9 = vpop.xlane.xlu1 %76 }
  0x91   :  { %v82_v10 = vmul.f32 0.03125, %v71_v8  ;;  %v84_v11 = vmul.f32 0.03125, %v77_v9  ;;  %v7623_v9 = vlaneseq }
  0x93   :  { %v86_v12 = vsub.f32 %v48_v0, %v82_v10  ;;  %v88_v13 = vsub.f32 %v50_v1, %v84_v11  ;;  %v5651_v0 = vld [vmem:[%s7613_s5] ss:$0 sm:$0xff]  ;;  %s6287_s5 = smov 96   ;;  %v6288_v10 = vmov 1983009808  }
  0x94   :  { %v74_v14 = vpop.xlane.xlu0 %73  ;;  %v80_v15 = vpop.xlane.xlu1 %79  ;;  %v293_v11 = vunpack.c.l.s4 %v6288_v10 }
  0x95   :  { %v83_v16 = vmul.f32 0.03125, %v74_v14  ;;  %v85_v17 = vmul.f32 0.03125, %v80_v15  ;;  %v90_v18 = vmul.f32 %v86_v12, %v86_v12  ;;  %v92_v19 = vmul.f32 %v88_v13, %v88_v13 }
  0x96   :  { %v6442_v14 = vshrl.u32 %v7623_v9, 7  ;;  %v294_v15 = vunpack.c.0.s8 %v293_v11 }
  0x97   :  { %v87_v20 = vsub.f32 %v49_v2, %v83_v16  ;;  %v89_v21 = vsub.f32 %v51_v5, %v85_v17  ;;  %v94_v22 = vsel %vm68_vm0, %v90_v18, 0.0  ;;  %v100_v23 = vsel %vm68_vm0, %v92_v19, 0.0 }
  0x98   :  { %95 = vadd.xlane.f32.xlu0 %v94_v22  ;;  %v6453_v19 = vsub.s32 %v294_v15, %v6442_v14 }
  0x99   :  { %v91_v24 = vmul.f32 %v87_v20, %v87_v20  ;;  %v93_v25 = vmul.f32 %v89_v21, %v89_v21 }
  0x9b   :  { %v97_v26 = vsel %vm68_vm0, %v91_v24, 0.0  ;;  %v103_v27 = vsel %vm68_vm0, %v93_v25, 0.0 }
  0x9c   :  { %101 = vadd.xlane.f32.xlu0 %v100_v23  ;;  %98 = vadd.xlane.f32.xlu1 %v97_v26 }
  0xa0   :  { %104 = vadd.xlane.f32.xlu1 %v103_v27 }
 0x125   :  { %v96_v34 = vpop.xlane.xlu0 %95 }
 0x126   :  { %v106_v35 = vmul.f32 0.03125, %v96_v34 }
 0x128   :  { %v110_v36 = vadd.f32 1e-05, %v106_v35 }
 0x129   :  { %v99_v37 = vpop.xlane.xlu1 %98  ;;  %v102_v38 = vpop.xlane.xlu0 %101 }
 0x12a   :  { %6168 = vrsqrt.f32 %v110_v36  ;;  %v107_v39 = vmul.f32 0.03125, %v99_v37  ;;  %v108_v40 = vmul.f32 0.03125, %v102_v38 }
 0x12c   :  { %v111_v41 = vadd.f32 1e-05, %v107_v39  ;;  %v112_v42 = vadd.f32 1e-05, %v108_v40 }
 0x12d   :  { %v105_v43 = vpop.xlane.xlu1 %104 }
 0x12e   :  { %6170 = vrsqrt.f32 %v111_v41  ;;  %v109_v44 = vmul.f32 0.03125, %v105_v43 }
 0x12f   :  { %6172 = vrsqrt.f32 %v112_v42 }
 0x130   :  { %v113_v45 = vadd.f32 1e-05, %v109_v44 }
 0x132   :  { %6174 = vrsqrt.f32 %v113_v45 }
 0x134   :  { %v6169_v46 = vpop.eup %6168 }
 0x135   :  { %v118_v48 = vmul.f32 %v6169_v46, %v86_v12  ;;  %v6289_v12 = vmov 1934713408  }
 0x137   :  { %v128_v50 = vmul.f32 %v5649_v47, %v118_v48 }
 0x138   :  { %v6171_v51 = vpop.eup %6170 }
 0x139   :  { %v6173_v52 = vpop.eup %6172  ;;  %v138_v53 = vadd.f32 %v5650_v49, %v128_v50  ;;  %v119_v54 = vmul.f32 %v6171_v51, %v87_v20 }
 0x13a   :  { %v120_v55 = vmul.f32 %v6173_v52, %v88_v13  ;;  %v325_v13 = vunpack.c.l.s4 %v6289_v12 }
 0x13b   :  { %5865 = vmatprep.mubr.msk.f32.mxu0 %vm68_vm0, %v138_v53  ;;  %v129_v56 = vmul.f32 %v5649_v47, %v119_v54 }
 0x13c   :  { %v6175_v57 = vpop.eup %6174  ;;  %v130_v58 = vmul.f32 %v5649_v47, %v120_v55  ;;  %v326_v18 = vunpack.c.0.s8 %v325_v13 }
 0x13d   :  { %v139_v59 = vadd.f32 %v5650_v49, %v129_v56  ;;  %v121_v60 = vmul.f32 %v6175_v57, %v89_v21 }
 0x13e   :  { %v140_v61 = vadd.f32 %v5650_v49, %v130_v58  ;;  %v6468_v25 = vsub.s32 %v326_v18, %v6442_v14 }
 0x13f   :  { %5866 = vmatmul.mubr.msk.f32.vlgmr.msra.gmra.mrb[0].mxu0 %vm68_vm0, %v139_v59  ;;  %v131_v62 = vmul.f32 %v5649_v47, %v121_v60 }
 0x140   :  { %5868 = vmatprep.mubr.msk.f32.mxu0 %vm68_vm0, %v140_v61 }
 0x141   :  { %v141_v63 = vadd.f32 %v5650_v49, %v131_v62 }
 0x143   :  { %5869 = vmatmul.mubr.msk.f32.gmra.mrb[2].mxu0 %vm68_vm0, %v141_v63 }
 0x212   :  { %v5867_v1 = vpop.f32.mrb[0].mxu0 }
 0x213   :  { %v231_v2 = vpop.f32.mrb[1].mxu0  ;;  %v6423_v6 = vadd.f32 %v5867_v1, %v5651_v0 }
 0x214   :  { %v6419_v3 = vadd.f32 %v5651_v0, %v231_v2 }
 0x216   :  { %266 = vrot.lane.b32.xlu1 %v6419_v3, %s6284_s16  ;;  %254 = vrot.lane.b32.xlu0 %v6419_v3, %s6285_s17  ;;  %v5870_v4 = vpop.f32.mrb[2].mxu0 }
 0x217   :  { %v241_v5 = vpop.f32.mrb[3].mxu0  ;;  %v6433_v8 = vadd.f32 %v5870_v4, %v5651_v0 }
 0x218   :  { %v6427_v7 = vadd.f32 %v5651_v0, %v241_v5 }
 0x21a   :  { %278 = vrot.lane.b32.xlu1 %v6419_v3, %s6286_s18  ;;  %268 = vrot.lane.b32.xlu0 %v6423_v6, %s6284_s16 }
 0x21e   :  { %256 = vrot.lane.b32.xlu1 %v6423_v6, %s6285_s17  ;;  %258 = vrot.lane.b32.xlu0 %v6427_v7, %s6285_s17 }
 0x222   :  { %280 = vrot.lane.b32.xlu1 %v6423_v6, %s6286_s18  ;;  %282 = vrot.lane.b32.xlu0 %v6427_v7, %s6286_s18 }
 0x226   :  { %270 = vrot.lane.b32.xlu1 %v6427_v7, %s6284_s16  ;;  %272 = vrot.lane.b32.xlu0 %v6433_v8, %s6284_s16 }
 0x22a   :  { %260 = vrot.lane.b32.xlu1 %v6433_v8, %s6285_s17  ;;  %834 = vrot.lane.b32.xlu0 %v6419_v3, %s6287_s5 }
 0x22e   :  { %284 = vrot.lane.b32.xlu1 %v6433_v8, %s6286_s18 }
 0x288   :  { %v6444_v16 = vpop.permute.xlu1 %266  ;;  %v6446_v17 = vpop.permute.xlu0 %254 }
 0x289   :  { %850 = vrot.lane.b32.xlu0 %v6444_v16, %s6287_s5  ;;  %842 = vrot.lane.b32.xlu1 %v6446_v17, %s6287_s5  ;;  %v290_v20 = vcombine.low %v6419_v3, %v6444_v16  ;;  %v291_v21 = vcombine.high %v6419_v3, %v6444_v16 }
 0x28b   :  { %v298_v27 = vrot.slane %v290_v20, %v6453_v19  ;;  %v305_v28 = vrot.slane %v291_v21, %v6453_v19 }
 0x28c   :  { %v6459_v22 = vpop.permute.xlu1 %278  ;;  %v6470_v26 = vpop.permute.xlu0 %268 }
 0x28d   :  { %v306_v23 = vcombine.low %v6446_v17, %v6459_v22  ;;  %v307_v24 = vcombine.high %v6446_v17, %v6459_v22  ;;  %836 = vrot.lane.b32.xlu0 %v6423_v6, %s6287_s5  ;;  %858 = vrot.lane.b32.xlu1 %v6459_v22, %s6287_s5  ;;  %v358_v40 = vcombine.low %v6423_v6, %v6470_v26 }
 0x28e   :  { %v359_v41 = vcombine.high %v6423_v6, %v6470_v26 }
 0x28f   :  { %v314_v29 = vrot.slane %v306_v23, %v6453_v19  ;;  %v321_v30 = vrot.slane %v307_v24, %v6453_v19  ;;  %v366_v54 = vrot.slane %v358_v40, %v6453_v19 }
 0x290   :  { %v6478_v31 = vpop.permute.xlu1 %256  ;;  %v6492_v42 = vpop.permute.xlu0 %258  ;;  %v373_v55 = vrot.slane %v359_v41, %v6453_v19 }
 0x291   :  { %v322_v32 = vcombine.low %v298_v27, %v314_v29  ;;  %v323_v33 = vcombine.high %v298_v27, %v314_v29  ;;  %v338_v34 = vcombine.low %v305_v28, %v321_v30  ;;  %v339_v35 = vcombine.high %v305_v28, %v321_v30  ;;  %852 = vrot.lane.b32.xlu0 %v6470_v26, %s6287_s5 }
 0x292   :  { %844 = vrot.lane.b32.xlu1 %v6478_v31, %s6287_s5  ;;  %v6291_v29 = vmov 0.0  }
 0x293   :  { %v330_v36 = vrot.slane %v322_v32, %v6468_v25  ;;  %v337_v37 = vrot.slane %v323_v33, %v6468_v25  ;;  %v346_v38 = vrot.slane %v338_v34, %v6468_v25  ;;  %v353_v39 = vrot.slane %v339_v35, %v6468_v25  ;;  %5871 = vmatprep.subr.mxu0 %v6291_v29 }
 0x294   :  { %v6494_v43 = vpop.permute.xlu1 %280  ;;  %v6516_v1 = vpop.permute.xlu0 %282  ;;  %5876 = vmatprep.subr.mxu1 %v6291_v29  ;;  %5873 = vmatprep.mubr.msk.f32.mxu0 %vm6292_vm1, %v6291_v29 }
 0x295   :  { %v562_v44 = vcombine.low %v330_v36, %v337_v37  ;;  %v5656_v45 = vcombine.high %v330_v36, %v337_v37  ;;  %v578_v46 = vcombine.low %v346_v38, %v353_v39  ;;  %v5657_v47 = vcombine.high %v346_v38, %v353_v39  ;;  %838 = vrot.lane.b32.xlu0 %v6427_v7, %s6287_s5 }
 0x296   :  { %v374_v48 = vcombine.low %v6478_v31, %v6494_v43  ;;  %v375_v49 = vcombine.high %v6478_v31, %v6494_v43  ;;  %860 = vrot.lane.b32.xlu1 %v6494_v43, %s6287_s5  ;;  %5878 = vmatprep.mubr.msk.f32.mxu1 %vm6292_vm1, %v6291_v29 }
 0x297   :  { %v569_v50 = vrot.slane %v562_v44, %v6453_v19  ;;  %v577_v51 = vrot.slane %v5656_v45, %v6453_v19  ;;  %v585_v52 = vrot.slane %v578_v46, %v6453_v19  ;;  %v593_v53 = vrot.slane %v5657_v47, %v6453_v19 }
 0x298   :  { %v382_v56 = vrot.slane %v374_v48, %v6453_v19  ;;  %v389_v57 = vrot.slane %v375_v49, %v6453_v19  ;;  %v6512_v58 = vpop.permute.xlu1 %270  ;;  %v6530_v20 = vpop.permute.xlu0 %272 }
 0x299   :  { %v594_v59 = vcombine.low %v569_v50, %v577_v51  ;;  %v610_v60 = vcombine.low %v585_v52, %v593_v53  ;;  %854 = vrot.lane.b32.xlu0 %v6512_v58, %s6287_s5  ;;  %v595_v33 = vcombine.high %v569_v50, %v577_v51  ;;  %v611_v36 = vcombine.high %v585_v52, %v593_v53 }
 0x29a   :  { %v390_v61 = vcombine.low %v366_v54, %v382_v56  ;;  %v391_v62 = vcombine.high %v366_v54, %v382_v56  ;;  %v406_v63 = vcombine.low %v373_v55, %v389_v57  ;;  %v407_v0 = vcombine.high %v373_v55, %v389_v57  ;;  %846 = vrot.lane.b32.xlu1 %v6492_v42, %s6287_s5 }
 0x29b   :  { %v6546_v30 = vrot.slane %v594_v59, %v6468_v25  ;;  %v6549_v32 = vrot.slane %v610_v60, %v6468_v25  ;;  %v6563_v35 = vrot.slane %v595_v33, %v6468_v25  ;;  %v6570_v40 = vrot.slane %v611_v36, %v6468_v25 }
 0x29c   :  { %v398_v2 = vrot.slane %v390_v61, %v6468_v25  ;;  %v405_v4 = vrot.slane %v391_v62, %v6468_v25  ;;  %v414_v5 = vrot.slane %v406_v63, %v6468_v25  ;;  %v421_v10 = vrot.slane %v407_v0, %v6468_v25  ;;  %v6528_v18 = vpop.permute.xlu1 %260 }
 0x29d   :  { %840 = vrot.lane.b32.xlu0 %v6433_v8, %s6287_s5  ;;  %v627_v34 = vcombine.high %v6546_v30, %v6549_v32  ;;  %v628_v45 = vcombine.low %v6563_v35, %v6570_v40  ;;  %v442_v52 = vcombine.low %v6492_v42, %v6516_v1  ;;  %v443_v53 = vcombine.high %v6492_v42, %v6516_v1 }
 0x29e   :  { %v630_v11 = vcombine.low %v398_v2, %v405_v4  ;;  %v5658_v12 = vcombine.high %v398_v2, %v405_v4  ;;  %v646_v13 = vcombine.low %v414_v5, %v421_v10  ;;  %v5659_v15 = vcombine.high %v414_v5, %v421_v10  ;;  %862 = vrot.lane.b32.xlu1 %v6516_v1, %s6287_s5 }
 0x29f   :  { %v494_v55 = vcombine.low %v6433_v8, %v6530_v20  ;;  %v495_v56 = vcombine.high %v6433_v8, %v6530_v20  ;;  %v450_v57 = vrot.slane %v442_v52, %v6453_v19  ;;  %v457_v59 = vrot.slane %v443_v53, %v6453_v19 }
 0x2a0   :  { %v637_v21 = vrot.slane %v630_v11, %v6453_v19  ;;  %v645_v23 = vrot.slane %v5658_v12, %v6453_v19  ;;  %v653_v24 = vrot.slane %v646_v13, %v6453_v19  ;;  %v661_v27 = vrot.slane %v5659_v15, %v6453_v19  ;;  %v6540_v28 = vpop.permute.xlu1 %284 }
 0x2a1   :  { %856 = vrot.lane.b32.xlu0 %v6530_v20, %s6287_s5  ;;  %v502_v4 = vrot.slane %v494_v55, %v6453_v19  ;;  %v509_v5 = vrot.slane %v495_v56, %v6453_v19 }
 0x2a2   :  { %848 = vrot.lane.b32.xlu1 %v6528_v18, %s6287_s5  ;;  %v662_v37 = vcombine.low %v637_v21, %v645_v23  ;;  %v678_v38 = vcombine.low %v653_v24, %v661_v27  ;;  %v663_v39 = vcombine.high %v637_v21, %v645_v23  ;;  %v679_v48 = vcombine.high %v653_v24, %v661_v27 }
 0x2a4   :  { %v6573_v41 = vrot.slane %v662_v37, %v6468_v25  ;;  %v6576_v44 = vrot.slane %v678_v38, %v6468_v25  ;;  %v6589_v47 = vrot.slane %v663_v39, %v6468_v25  ;;  %v6592_v49 = vrot.slane %v679_v48, %v6468_v25 }
 0x2a5   :  { %1426 = vrot.lane.b32.xlu0 %v6419_v3, %s6290_s19  ;;  %v626_v3 = vcombine.low %v6546_v30, %v6549_v32 }
 0x2a6   :  { %864 = vrot.lane.b32.xlu1 %v6540_v28, %s6287_s5  ;;  %v694_v46 = vcombine.low %v6573_v41, %v6576_v44  ;;  %v696_v50 = vcombine.low %v6589_v47, %v6592_v49  ;;  %v697_v51 = vcombine.high %v6589_v47, %v6592_v49 }
 0x2a9   :  { %1428 = vrot.lane.b32.xlu0 %v6423_v6, %s6290_s19  ;;  %v629_v6 = vcombine.high %v6563_v35, %v6570_v40 }
 0x2aa   :  { %1434 = vrot.lane.b32.xlu1 %v6446_v17, %s6290_s19  ;;  %v695_v17 = vcombine.high %v6573_v41, %v6576_v44 }
 0x2ae   :  { %1442 = vrot.lane.b32.xlu1 %v6444_v16, %s6290_s19  ;;  %v426_v16 = vcombine.low %v6427_v7, %v6512_v58 }
 0x2b2   :  { %1450 = vrot.lane.b32.xlu1 %v6459_v22, %s6290_s19  ;;  %v427_v22 = vcombine.high %v6427_v7, %v6512_v58 }
 0x2b4   :  { %v441_v54 = vrot.slane %v427_v22, %v6453_v19 }
 0x2b6   :  { %1436 = vrot.lane.b32.xlu1 %v6478_v31, %s6290_s19  ;;  %v510_v31 = vcombine.low %v6528_v18, %v6540_v28  ;;  %v474_v0 = vcombine.low %v441_v54, %v457_v59  ;;  %v475_v2 = vcombine.high %v441_v54, %v457_v59 }
 0x2b8   :  { %v518_v60 = vrot.slane %v510_v31, %v6453_v19  ;;  %v482_v23 = vrot.slane %v474_v0, %v6468_v25  ;;  %v489_v24 = vrot.slane %v475_v2, %v6468_v25 }
 0x2ba   :  { %1444 = vrot.lane.b32.xlu1 %v6470_v26, %s6290_s19  ;;  %v511_v26 = vcombine.high %v6528_v18, %v6540_v28  ;;  %v526_v10 = vcombine.low %v502_v4, %v518_v60  ;;  %v527_v11 = vcombine.high %v502_v4, %v518_v60  ;;  %v714_v48 = vcombine.low %v482_v23, %v489_v24 }
 0x2bc   :  { %v525_v61 = vrot.slane %v511_v26, %v6453_v19  ;;  %v534_v27 = vrot.slane %v526_v10, %v6468_v25  ;;  %v541_v33 = vrot.slane %v527_v11, %v6468_v25  ;;  %v835_v26 = vpop.permute.xlu0 %834  ;;  %v721_v55 = vrot.slane %v714_v48, %v6453_v19 }
 0x2be   :  { %1452 = vrot.lane.b32.xlu1 %v6494_v43, %s6290_s19  ;;  %v434_v43 = vrot.slane %v426_v16, %v6453_v19  ;;  %v542_v12 = vcombine.low %v509_v5, %v525_v61  ;;  %v543_v13 = vcombine.high %v509_v5, %v525_v61  ;;  %v5661_v16 = vcombine.high %v482_v23, %v489_v24 }
 0x2bf   :  { %v766_v22 = vcombine.low %v534_v27, %v541_v33  ;;  %v5662_v52 = vcombine.high %v534_v27, %v541_v33 }
 0x2c0   :  { %v458_v62 = vcombine.low %v434_v43, %v450_v57  ;;  %v459_v63 = vcombine.high %v434_v43, %v450_v57  ;;  %v550_v36 = vrot.slane %v542_v12, %v6468_v25  ;;  %v557_v37 = vrot.slane %v543_v13, %v6468_v25 }
 0x2c1   :  { %v729_v56 = vrot.slane %v5661_v16, %v6453_v19  ;;  %v773_v57 = vrot.slane %v766_v22, %v6453_v19  ;;  %v781_v59 = vrot.slane %v5662_v52, %v6453_v19 }
 0x2c2   :  { %v466_v15 = vrot.slane %v458_v62, %v6468_v25  ;;  %v473_v21 = vrot.slane %v459_v63, %v6468_v25  ;;  %v782_v53 = vcombine.low %v550_v36, %v557_v37  ;;  %v5663_v31 = vcombine.high %v550_v36, %v557_v37 }
 0x2c3   :  { %v746_v2 = vcombine.low %v721_v55, %v729_v56  ;;  %v747_v5 = vcombine.high %v721_v55, %v729_v56  ;;  %v798_v10 = vcombine.low %v773_v57, %v781_v59  ;;  %v799_v27 = vcombine.high %v773_v57, %v781_v59 }
 0x2c4   :  { %v698_v38 = vcombine.low %v466_v15, %v473_v21  ;;  %v5660_v39 = vcombine.high %v466_v15, %v473_v21  ;;  %v789_v60 = vrot.slane %v782_v53, %v6453_v19  ;;  %v797_v61 = vrot.slane %v5663_v31, %v6453_v19 }
 0x2c5   :  { %v6650_v24 = vrot.slane %v746_v2, %v6468_v25  ;;  %v6659_v48 = vrot.slane %v798_v10, %v6468_v25  ;;  %v6673_v56 = vrot.slane %v799_v27, %v6468_v25 }
 0x2c6   :  { %v705_v43 = vrot.slane %v698_v38, %v6453_v19  ;;  %v713_v54 = vrot.slane %v5660_v39, %v6453_v19  ;;  %v814_v11 = vcombine.low %v789_v60, %v797_v61  ;;  %v815_v33 = vcombine.high %v789_v60, %v797_v61 }
 0x2c7   :  { %v6656_v39 = vrot.slane %v747_v5, %v6468_v25 }
 0x2c8   :  { %v730_v0 = vcombine.low %v705_v43, %v713_v54  ;;  %v731_v4 = vcombine.high %v705_v43, %v713_v54  ;;  %v6662_v16 = vrot.slane %v814_v11, %v6468_v25  ;;  %v6676_v57 = vrot.slane %v815_v33, %v6468_v25 }
 0x2ca   :  { %v6647_v23 = vrot.slane %v730_v0, %v6468_v25  ;;  %v6653_v38 = vrot.slane %v731_v4, %v6468_v25 }
 0x2cc   :  { %v762_v54 = vcombine.low %v6647_v23, %v6650_v24 }
 0x2fb   :  { %v843_v62 = vpop.permute.xlu1 %842  ;;  %v851_v63 = vpop.permute.xlu0 %850 }
 0x2fc   :  { %v882_v12 = vcombine.low %v835_v26, %v851_v63  ;;  %v883_v13 = vcombine.high %v835_v26, %v851_v63 }
 0x2fe   :  { %v890_v22 = vrot.slane %v882_v12, %v6453_v19  ;;  %v897_v52 = vrot.slane %v883_v13, %v6453_v19 }
 0x2ff   :  { %v837_v15 = vpop.permute.xlu0 %836  ;;  %v859_v21 = vpop.permute.xlu1 %858 }
 0x300   :  { %v898_v36 = vcombine.low %v843_v62, %v859_v21  ;;  %v899_v37 = vcombine.high %v843_v62, %v859_v21 }
 0x302   :  { %v906_v53 = vrot.slane %v898_v36, %v6453_v19  ;;  %v913_v31 = vrot.slane %v899_v37, %v6453_v19 }
 0x303   :  { %v853_v26 = vpop.permute.xlu0 %852 }
 0x304   :  { %v845_v43 = vpop.permute.xlu1 %844  ;;  %v914_v59 = vcombine.low %v890_v22, %v906_v53  ;;  %v915_v60 = vcombine.high %v890_v22, %v906_v53  ;;  %v930_v61 = vcombine.low %v897_v52, %v913_v31  ;;  %v931_v62 = vcombine.high %v897_v52, %v913_v31 }
 0x305   :  { %v950_v63 = vcombine.low %v837_v15, %v853_v26  ;;  %v951_v0 = vcombine.high %v837_v15, %v853_v26 }
 0x306   :  { %v922_v5 = vrot.slane %v914_v59, %v6468_v25  ;;  %v929_v10 = vrot.slane %v915_v60, %v6468_v25  ;;  %v938_v11 = vrot.slane %v930_v61, %v6468_v25  ;;  %v945_v12 = vrot.slane %v931_v62, %v6468_v25 }
 0x307   :  { %v839_v13 = vpop.permute.xlu0 %838  ;;  %v958_v31 = vrot.slane %v950_v63, %v6453_v19  ;;  %v965_v26 = vrot.slane %v951_v0, %v6453_v19 }
 0x308   :  { %v861_v21 = vpop.permute.xlu1 %860  ;;  %v1154_v37 = vcombine.low %v922_v5, %v929_v10  ;;  %v5664_v22 = vcombine.high %v922_v5, %v929_v10  ;;  %v1170_v52 = vcombine.low %v938_v11, %v945_v12  ;;  %v5665_v53 = vcombine.high %v938_v11, %v945_v12 }
 0x309   :  { %v966_v59 = vcombine.low %v845_v43, %v861_v21  ;;  %v967_v60 = vcombine.high %v845_v43, %v861_v21 }
 0x30a   :  { %v1161_v61 = vrot.slane %v1154_v37, %v6453_v19  ;;  %v1169_v62 = vrot.slane %v5664_v22, %v6453_v19  ;;  %v6699_v9 = vrot.slane %v1170_v52, %v6453_v19  ;;  %v6702_v33 = vrot.slane %v5665_v53, %v6453_v19 }
 0x30b   :  { %v855_v36 = vpop.permute.xlu0 %854  ;;  %v974_v5 = vrot.slane %v966_v59, %v6453_v19  ;;  %v981_v10 = vrot.slane %v967_v60, %v6453_v19 }
 0x30c   :  { %v847_v63 = vpop.permute.xlu1 %846  ;;  %v1018_v11 = vcombine.low %v839_v13, %v855_v36  ;;  %v1019_v0 = vcombine.high %v839_v13, %v855_v36  ;;  %v1186_v12 = vcombine.low %v1161_v61, %v1169_v62  ;;  %v1187_v43 = vcombine.high %v1161_v61, %v1169_v62 }
 0x30d   :  { %v1202_v21 = vcombine.low %v6699_v9, %v6702_v33  ;;  %v1203_v37 = vcombine.high %v6699_v9, %v6702_v33  ;;  %v982_v22 = vcombine.low %v958_v31, %v974_v5  ;;  %v983_v52 = vcombine.high %v958_v31, %v974_v5 }
 0x30e   :  { %v998_v53 = vcombine.low %v965_v26, %v981_v10  ;;  %v999_v27 = vcombine.high %v965_v26, %v981_v10  ;;  %v1026_v15 = vrot.slane %v1018_v11, %v6453_v19  ;;  %v1033_v59 = vrot.slane %v1019_v0, %v6453_v19 }
 0x30f   :  { %v841_v60 = vpop.permute.xlu0 %840  ;;  %v1194_v4 = vrot.slane %v1186_v12, %v6468_v25  ;;  %v1210_v13 = vrot.slane %v1202_v21, %v6468_v25  ;;  %v990_v36 = vrot.slane %v982_v22, %v6468_v25  ;;  %v997_v61 = vrot.slane %v983_v52, %v6468_v25 }
 0x310   :  { %v1006_v62 = vrot.slane %v998_v53, %v6468_v25  ;;  %v1013_v9 = vrot.slane %v999_v27, %v6468_v25  ;;  %v863_v33 = vpop.permute.xlu1 %862  ;;  %v1201_v22 = vrot.slane %v1187_v43, %v6468_v25 }
 0x311   :  { %v1034_v31 = vcombine.low %v847_v63, %v863_v33  ;;  %v1035_v26 = vcombine.high %v847_v63, %v863_v33  ;;  %v1218_v5 = vcombine.low %v1194_v4, %v1210_v13  ;;  %v1219_v10 = vcombine.high %v1194_v4, %v1210_v13 }
 0x312   :  { %v1222_v11 = vcombine.low %v990_v36, %v997_v61  ;;  %v5666_v0 = vcombine.high %v990_v36, %v997_v61  ;;  %v1238_v2 = vcombine.low %v1006_v62, %v1013_v9  ;;  %v5667_v55 = vcombine.high %v1006_v62, %v1013_v9 }
 0x313   :  { %v1042_v12 = vrot.slane %v1034_v31, %v6453_v19  ;;  %v1049_v21 = vrot.slane %v1035_v26, %v6453_v19  ;;  %5872 = vmatpush3.xpose.msk.msra.mxu0 %vm2018_vm2, %v1218_v5  ;;  %5877 = vmatpush3.xpose.msk.msra.mxu1 %vm2018_vm2, %v1219_v10  ;;  %v857_v9 = vpop.permute.xlu0 %856 }
 0x314   :  { %v1229_v27 = vrot.slane %v1222_v11, %v6453_v19  ;;  %v1237_v63 = vrot.slane %v5666_v0, %v6453_v19  ;;  %v1245_v4 = vrot.slane %v1238_v2, %v6453_v19  ;;  %v1253_v52 = vrot.slane %v5667_v55, %v6453_v19  ;;  %v849_v53 = vpop.permute.xlu1 %848  ;;  %5881 = vmatprep.subr.mxu1 %v6291_v29 }
 0x315   :  { %v1050_v13 = vcombine.low %v1026_v15, %v1042_v12  ;;  %v1051_v36 = vcombine.high %v1026_v15, %v1042_v12  ;;  %v1066_v61 = vcombine.low %v1033_v59, %v1049_v21  ;;  %v1067_v62 = vcombine.high %v1033_v59, %v1049_v21  ;;  %5886 = vmatprep.subr.mxu0 %v6291_v29 }
 0x316   :  { %v1254_v33 = vcombine.low %v1229_v27, %v1237_v63  ;;  %v1255_v43 = vcombine.high %v1229_v27, %v1237_v63  ;;  %v1270_v31 = vcombine.low %v1245_v4, %v1253_v52  ;;  %v1271_v26 = vcombine.high %v1245_v4, %v1253_v52  ;;  %5874 = vmatmul.mubr.msk.f32.vlgmr.msra.gmra.mrb[4].mxu0 %vm2018_vm2, %v626_v3 }
 0x317   :  { %v1058_v55 = vrot.slane %v1050_v13, %v6468_v25  ;;  %v1065_v2 = vrot.slane %v1051_v36, %v6468_v25  ;;  %v1074_v15 = vrot.slane %v1066_v61, %v6468_v25  ;;  %v1081_v59 = vrot.slane %v1067_v62, %v6468_v25  ;;  %5879 = vmatmul.mubr.msk.f32.vlgmr.msra.gmra.mrb[0].mxu1 %vm2018_vm2, %v627_v34 }
 0x318   :  { %v1086_v5 = vcombine.low %v841_v60, %v857_v9  ;;  %v1087_v10 = vcombine.high %v841_v60, %v857_v9  ;;  %v1217_v11 = vrot.slane %v1203_v37, %v6468_v25  ;;  %v865_v0 = vpop.permute.xlu1 %864  ;;  %5883 = vmatprep.mubr.msk.f32.mxu1 %vm6292_vm1, %v6291_v29  ;;  %5888 = vmatprep.mubr.msk.f32.mxu0 %vm6292_vm1, %v6291_v29 }
 0x319   :  { %v1290_v3 = vcombine.low %v1058_v55, %v1065_v2  ;;  %v5668_v12 = vcombine.high %v1058_v55, %v1065_v2  ;;  %v1306_v21 = vcombine.low %v1074_v15, %v1081_v59  ;;  %v5669_v27 = vcombine.high %v1074_v15, %v1081_v59 }
 0x31a   :  { %v1094_v63 = vrot.slane %v1086_v5, %v6453_v19  ;;  %v1101_v30 = vrot.slane %v1087_v10, %v6453_v19  ;;  %v1220_v32 = vcombine.low %v1201_v22, %v1217_v11  ;;  %v1221_v34 = vcombine.high %v1201_v22, %v1217_v11 }
 0x31b   :  { %v6749_v60 = vrot.slane %v1290_v3, %v6453_v19  ;;  %v6752_v37 = vrot.slane %v5668_v12, %v6453_v19  ;;  %v6755_v4 = vrot.slane %v1306_v21, %v6453_v19  ;;  %v6758_v52 = vrot.slane %v5669_v27, %v6453_v19 }
 0x31c   :  { %5882 = vmatpush3.xpose.msk.msra.mxu1 %vm2018_vm2, %v1220_v32  ;;  %5887 = vmatpush3.xpose.msk.msra.mxu0 %vm2018_vm2, %v1221_v34  ;;  %v1102_v13 = vcombine.low %v849_v53, %v865_v0  ;;  %v1103_v36 = vcombine.high %v849_v53, %v865_v0  ;;  %v1262_v22 = vrot.slane %v1254_v33, %v6468_v25  ;;  %v6763_v61 = vpop.permute.xlu1 %1434 }
 0x31d   :  { %v1322_v62 = vcombine.low %v6749_v60, %v6752_v37  ;;  %v1323_v9 = vcombine.high %v6749_v60, %v6752_v37  ;;  %v1338_v55 = vcombine.low %v6755_v4, %v6758_v52  ;;  %v1339_v2 = vcombine.high %v6755_v4, %v6758_v52  ;;  %5891 = vmatprep.subr.mxu1 %v6291_v29 }
 0x31e   :  { %v1110_v53 = vrot.slane %v1102_v13, %v6453_v19  ;;  %v1117_v33 = vrot.slane %v1103_v36, %v6453_v19  ;;  %5896 = vmatprep.subr.mxu0 %v6291_v29  ;;  %v1278_v15 = vrot.slane %v1270_v31, %v6468_v25  ;;  %v1269_v59 = vrot.slane %v1255_v43, %v6468_v25 }
 0x31f   :  { %5884 = vmatmul.mubr.msk.f32.vlgmr.msra.gmra.mrb[2].mxu1 %vm2018_vm2, %v628_v45  ;;  %5889 = vmatmul.mubr.msk.f32.vlgmr.msra.gmra.mrb[6].mxu0 %vm2018_vm2, %v629_v6  ;;  %v1285_v5 = vrot.slane %v1271_v26, %v6468_v25  ;;  %v6789_v10 = vrot.slane %v1322_v62, %v6468_v25  ;;  %v6792_v11 = vrot.slane %v1338_v55, %v6468_v25 }
 0x320   :  { %v1118_v31 = vcombine.low %v1094_v63, %v1110_v53  ;;  %v1119_v43 = vcombine.high %v1094_v63, %v1110_v53  ;;  %v1134_v0 = vcombine.low %v1101_v30, %v1117_v33  ;;  %v1135_v3 = vcombine.high %v1101_v30, %v1117_v33  ;;  %5893 = vmatprep.mubr.msk.f32.mxu1 %vm6292_vm1, %v6291_v29  ;;  %v1443_v45 = vpop.permute.xlu1 %1442  ;;  %v1427_v30 = vpop.permute.xlu0 %1426 }
 0x321   :  { %v1286_v12 = vcombine.low %v1262_v22, %v1278_v15  ;;  %v1287_v35 = vcombine.high %v1262_v22, %v1278_v15  ;;  %5898 = vmatprep.mubr.msk.f32.mxu0 %vm6292_vm1, %v6291_v29  ;;  %v1288_v40 = vcombine.low %v1269_v59, %v1285_v5  ;;  %v1289_v6 = vcombine.high %v1269_v59, %v1285_v5 }
 0x322   :  { %v1126_v26 = vrot.slane %v1118_v31, %v6468_v25  ;;  %v1133_v21 = vrot.slane %v1119_v43, %v6468_v25  ;;  %v1142_v27 = vrot.slane %v1134_v0, %v6468_v25  ;;  %v1149_v63 = vrot.slane %v1135_v3, %v6468_v25 }
 0x323   :  { %5892 = vmatpush3.xpose.msk.msra.mxu1 %vm2018_vm2, %v1286_v12  ;;  %5897 = vmatpush3.xpose.msk.msra.mxu0 %vm2018_vm2, %v1287_v35  ;;  %v1474_v32 = vcombine.low %v1427_v30, %v1443_v45  ;;  %v1475_v34 = vcombine.high %v1427_v30, %v1443_v45  ;;  %v1354_v60 = vcombine.low %v6789_v10, %v6792_v11 }
 0x324   :  { %v1358_v37 = vcombine.low %v1126_v26, %v1133_v21  ;;  %v5670_v13 = vcombine.high %v1126_v26, %v1133_v21  ;;  %v1374_v36 = vcombine.low %v1142_v27, %v1149_v63  ;;  %v5671_v22 = vcombine.high %v1142_v27, %v1149_v63  ;;  %5901 = vmatprep.subr.mxu1 %v6291_v29  ;;  %v1451_v62 = vpop.permute.xlu1 %1450 }
 0x325   :  { %5906 = vmatprep.subr.mxu0 %v6291_v29  ;;  %v1482_v55 = vrot.slane %v1474_v32, %v6453_v19  ;;  %v1489_v53 = vrot.slane %v1475_v34, %v6453_v19  ;;  %v1355_v33 = vcombine.high %v6789_v10, %v6792_v11  ;;  %v1490_v15 = vcombine.low %v6763_v61, %v1451_v62 }
 0x326   :  { %v6814_v59 = vrot.slane %v1358_v37, %v6453_v19  ;;  %v1373_v5 = vrot.slane %v5670_v13, %v6453_v19  ;;  %v1381_v31 = vrot.slane %v1374_v36, %v6453_v19  ;;  %v1389_v43 = vrot.slane %v5671_v22, %v6453_v19  ;;  %5894 = vmatmul.mubr.msk.f32.vlgmr.msra.gmra.mrb[4].mxu1 %vm2018_vm2, %v694_v46 }
 0x327   :  { %5899 = vmatmul.mubr.msk.f32.vlgmr.msra.gmra.mrb[8].mxu0 %vm2018_vm2, %v695_v17  ;;  %5902 = vmatpush3.xpose.msk.msra.mxu1 %vm2018_vm2, %v1288_v40  ;;  %v1491_v10 = vcombine.high %v6763_v61, %v1451_v62  ;;  %v1498_v11 = vrot.slane %v1490_v15, %v6453_v19  ;;  %v1337_v0 = vrot.slane %v1323_v9, %v6468_v25 }
 0x328   :  { %v1390_v3 = vcombine.low %v6814_v59, %v1373_v5  ;;  %v1391_v45 = vcombine.high %v6814_v59, %v1373_v5  ;;  %v1406_v12 = vcombine.low %v1381_v31, %v1389_v43  ;;  %v1407_v35 = vcombine.high %v1381_v31, %v1389_v43  ;;  %5907 = vmatpush3.xpose.msk.msra.mxu0 %vm2018_vm2, %v1289_v6  ;;  %v6834_v46 = vpop.permute.xlu1 %1436 }
 0x329   :  { %5903 = vmatprep.mubr.msk.f32.mxu1 %vm6292_vm1, %v6291_v29  ;;  %5908 = vmatprep.mubr.msk.f32.mxu0 %vm6292_vm1, %v6291_v29  ;;  %v1505_v41 = vrot.slane %v1491_v10, %v6453_v19  ;;  %v1506_v44 = vcombine.low %v1482_v55, %v1498_v11  ;;  %v1507_v17 = vcombine.high %v1482_v55, %v1498_v11 }
 0x32a   :  { %5904 = vmatmul.mubr.msk.f32.vlgmr.msra.gmra.mrb[6].mxu1 %vm2018_vm2, %v696_v50  ;;  %5911 = vmatprep.subr.mxu1 %v6291_v29  ;;  %v1353_v61 = vrot.slane %v1339_v2, %v6468_v25  ;;  %v1398_v9 = vrot.slane %v1390_v3, %v6468_v25  ;;  %v1414_v40 = vrot.slane %v1406_v12, %v6468_v25 }
 0x32b   :  { %5909 = vmatmul.mubr.msk.f32.vlgmr.msra.gmra.mrb[10].mxu0 %vm2018_vm2, %v697_v51  ;;  %5916 = vmatprep.subr.mxu0 %v6291_v29  ;;  %v1514_v50 = vrot.slane %v1506_v44, %v6468_v25  ;;  %v1521_v6 = vrot.slane %v1507_v17, %v6468_v25  ;;  %v1522_v26 = vcombine.low %v1489_v53, %v1505_v41  ;;  %v1429_v51 = vpop.permute.xlu0 %1428 }
 0x32c   :  { %5912 = vmatpush3.xpose.msk.msra.mxu1 %vm2018_vm2, %v1354_v60  ;;  %5917 = vmatpush3.xpose.msk.msra.mxu0 %vm2018_vm2, %v1355_v33  ;;  %v1523_v4 = vcombine.high %v1489_v53, %v1505_v41  ;;  %v1356_v52 = vcombine.low %v1337_v0, %v1353_v61  ;;  %v1357_v2 = vcombine.high %v1337_v0, %v1353_v61  ;;  %v1445_v21 = vpop.permute.xlu1 %1444 }
 0x32d   :  { %v1530_v27 = vrot.slane %v1522_v26, %v6468_v25  ;;  %v1746_v47 = vcombine.low %v1514_v50, %v1521_v6  ;;  %v5672_v49 = vcombine.high %v1514_v50, %v1521_v6  ;;  %5913 = vmatprep.mubr.msk.f32.mxu1 %vm6292_vm1, %v6291_v29  ;;  %5918 = vmatprep.mubr.msk.f32.mxu0 %vm6292_vm1, %v6291_v29 }
 0x32e   :  { %v1537_v63 = vrot.slane %v1523_v4, %v6468_v25  ;;  %5921 = vmatprep.subr.mxu1 %v6291_v29  ;;  %5926 = vmatprep.subr.mxu0 %v6291_v29  ;;  %v1422_v30 = vcombine.low %v1398_v9, %v1414_v40  ;;  %v1423_v32 = vcombine.high %v1398_v9, %v1414_v40 }
 0x32f   :  { %v1753_v34 = vrot.slane %v1746_v47, %v6453_v19  ;;  %v1761_v60 = vrot.slane %v5672_v49, %v6453_v19  ;;  %5914 = vmatmul.mubr.msk.f32.vlgmr.msra.gmra.mrb[8].mxu1 %vm2018_vm2, %v762_v54  ;;  %v7624_v37 = vcombine.high %v6647_v23, %v6650_v24  ;;  %v1542_v13 = vcombine.low %v1429_v51, %v1445_v21 }
 0x330   :  { %v1762_v36 = vcombine.low %v1530_v27, %v1537_v63  ;;  %v5673_v22 = vcombine.high %v1530_v27, %v1537_v63  ;;  %5922 = vmatpush3.xpose.msk.msra.mxu1 %vm2018_vm2, %v1356_v52  ;;  %v1543_v62 = vcombine.high %v1429_v51, %v1445_v21  ;;  %v1453_v55 = vpop.permute.xlu1 %1452  ;;  %5923 = vmatprep.mubr.msk.f32.mxu1 %vm6292_vm1, %v6291_v29 }
 0x331   :  { %5919 = vmatmul.mubr.msk.f32.vlgmr.msra.gmra.mrb[12].mxu0 %vm2018_vm2, %v7624_v37  ;;  %v1550_v54 = vrot.slane %v1542_v13, %v6453_v19  ;;  %v1405_v23 = vrot.slane %v1391_v45, %v6468_v25  ;;  %v1421_v24 = vrot.slane %v1407_v35, %v6468_v25  ;;  %5931 = vmatprep.subr.mxu1 %v6291_v29 }
 0x332   :  { %5927 = vmatpush3.xpose.msk.msra.mxu0 %vm2018_vm2, %v1357_v2  ;;  %5928 = vmatprep.mubr.msk.f32.mxu0 %vm6292_vm1, %v6291_v29  ;;  %v1769_v53 = vrot.slane %v1762_v36, %v6453_v19  ;;  %v1777_v33 = vrot.slane %v5673_v22, %v6453_v19  ;;  %v1557_v15 = vrot.slane %v1543_v62, %v6453_v19 }
 0x333   :  { %5936 = vmatprep.subr.mxu0 %v6291_v29  ;;  %v7625_v59 = vcombine.low %v6653_v38, %v6656_v39  ;;  %v7626_v5 = vcombine.high %v6653_v38, %v6656_v39  ;;  %v1424_v31 = vcombine.low %v1405_v23, %v1421_v24  ;;  %v1425_v43 = vcombine.high %v1405_v23, %v1421_v24 }
 0x334   :  { %v1558_v10 = vcombine.low %v6834_v46, %v1453_v55  ;;  %v1559_v11 = vcombine.high %v6834_v46, %v1453_v55  ;;  %v1778_v0 = vcombine.low %v1753_v34, %v1761_v60  ;;  %v1794_v3 = vcombine.low %v1769_v53, %v1777_v33 }
 0x335   :  { %5924 = vmatmul.mubr.msk.f32.vlgmr.msra.gmra.mrb[10].mxu1 %vm2018_vm2, %v7625_v59  ;;  %5929 = vmatmul.mubr.msk.f32.vlgmr.msra.gmra.mrb[14].mxu0 %vm2018_vm2, %v7626_v5  ;;  %v1779_v39 = vcombine.high %v1753_v34, %v1761_v60  ;;  %v1795_v45 = vcombine.high %v1769_v53, %v1777_v33  ;;  %v7627_v41 = vcombine.low %v6659_v48, %v6662_v16  ;;  %v57_v59 = vld [vmem:[%s7609_s1] sm:$0x1]  ;;  %v62_v5 = vsub.s32 0, %v6442_v14  ;;  %s6294_s1 = smov 8  }
 0x336   :  { %5932 = vmatpush3.xpose.msk.msra.mxu1 %vm2018_vm2, %v1422_v30  ;;  %5937 = vmatpush3.xpose.msk.msra.mxu0 %vm2018_vm2, %v1423_v32  ;;  %v1566_v38 = vrot.slane %v1558_v10, %v6453_v19  ;;  %v1573_v12 = vrot.slane %v1559_v11, %v6453_v19  ;;  %v1786_v35 = vrot.slane %v1778_v0, %v6468_v25  ;;  %vm58_vm3 = vcmp.ne.s32.totalorder %v57_v59, 0 }
 0x337   :  { %5933 = vmatprep.mubr.msk.f32.mxu1 %vm6292_vm1, %v6291_v29  ;;  %5938 = vmatprep.mubr.msk.f32.mxu0 %vm6292_vm1, %v6291_v29  ;;  %v1802_v46 = vrot.slane %v1794_v3, %v6468_v25  ;;  %v7628_v44 = vcombine.high %v6659_v48, %v6662_v16  ;;  %v6924_v9 = vrot.slane %v1779_v39, %v6468_v25  ;;  %v7631_v10 = vlaneseq }
 0x338   :  { %5941 = vmatprep.subr.mxu1 %v6291_v29  ;;  %5946 = vmatprep.subr.mxu0 %v6291_v29  ;;  %v1574_v17 = vcombine.low %v1550_v54, %v1566_v38  ;;  %v1575_v61 = vcombine.high %v1550_v54, %v1566_v38  ;;  %v1590_v40 = vcombine.low %v1557_v15, %v1573_v12 }
 0x339   :  { %5934 = vmatmul.mubr.msk.f32.vlgmr.msra.gmra.mrb[12].mxu1 %vm2018_vm2, %v7627_v41  ;;  %5939 = vmatmul.mubr.msk.f32.vlgmr.msra.gmra.mrb[16].mxu0 %vm2018_vm2, %v7628_v44  ;;  %v1591_v50 = vcombine.high %v1557_v15, %v1573_v12  ;;  %v1810_v6 = vcombine.low %v1786_v35, %v1802_v46  ;;  %v1811_v48 = vcombine.high %v1786_v35, %v1802_v46  ;;  %v55_v11 = vand.u32 127, %v7631_v10 }
 0x33a   :  { %5942 = vmatpush3.xpose.msk.msra.mxu1 %vm2018_vm2, %v1424_v31  ;;  %5947 = vmatpush3.xpose.msk.msra.mxu0 %vm2018_vm2, %v1425_v43  ;;  %v1582_v26 = vrot.slane %v1574_v17, %v6468_v25  ;;  %v1589_v4 = vrot.slane %v1575_v61, %v6468_v25  ;;  %v1598_v16 = vrot.slane %v1590_v40, %v6468_v25  ;;  %v6293_v31 = vmov 0  }
 0x33b   :  { %5943 = vmatprep.mubr.msk.f32.mxu1 %vm6292_vm1, %v6291_v29  ;;  %5948 = vmatprep.mubr.msk.f32.mxu0 %vm6292_vm1, %v6291_v29  ;;  %v1605_v52 = vrot.slane %v1591_v50, %v6468_v25  ;;  %v6939_v2 = vrot.slane %v1795_v45, %v6468_v25  ;;  %v7629_v47 = vcombine.low %v6673_v56, %v6676_v57  ;;  %v59_v43 = vsel %vm58_vm3, 1, %v6293_v31 }
 0x33c   :  { %5951 = vmatprep.subr.mxu1 %v6291_v29  ;;  %5956 = vmatprep.subr.mxu0 %v6291_v29  ;;  %v1814_v21 = vcombine.low %v1582_v26, %v1589_v4  ;;  %v5674_v27 = vcombine.high %v1582_v26, %v1589_v4  ;;  %v7630_v49 = vcombine.high %v6673_v56, %v6676_v57 }
 0x33d   :  { %5944 = vmatmul.mubr.msk.f32.vlgmr.msra.gmra.mrb[14].mxu1 %vm2018_vm2, %v7629_v47  ;;  %v1830_v51 = vcombine.low %v1598_v16, %v1605_v52  ;;  %v5675_v63 = vcombine.high %v1598_v16, %v1605_v52  ;;  %v1812_v30 = vcombine.low %v6924_v9, %v6939_v2  ;;  %v1813_v56 = vcombine.high %v6924_v9, %v6939_v2 }
 0x33e   :  { %5949 = vmatmul.mubr.msk.f32.vlgmr.msra.gmra.mrb[18].mxu0 %vm2018_vm2, %v7630_v49  ;;  %5952 = vmatpush3.msra.mxu1 %v1810_v6  ;;  %v1821_v32 = vrot.slane %v1814_v21, %v6453_v19  ;;  %v1829_v34 = vrot.slane %v5674_v27, %v6453_v19  ;;  %v63_v0 = vrot.slane %v59_v43, %v62_v5 }
 0x33f   :  { %5957 = vmatpush3.msra.mxu0 %v1811_v48  ;;  %5953 = vmatprep.mubr.msk.f32.mxu1 %vm6292_vm1, %v6291_v29  ;;  %v1837_v57 = vrot.slane %v1830_v51, %v6453_v19  ;;  %v1845_v60 = vrot.slane %v5675_v63, %v6453_v19  ;;  %vm56_vm4 = vcmp.ge.s32.totalorder %v6442_v14, %v55_v11 }
 0x340   :  { %5958 = vmatprep.mubr.msk.f32.mxu0 %vm6292_vm1, %v6291_v29  ;;  %5961 = vmatprep.subr.mxu1 %v6291_v29  ;;  %v1846_v37 = vcombine.low %v1821_v32, %v1829_v34  ;;  %v1847_v13 = vcombine.high %v1821_v32, %v1829_v34  ;;  %vm64_vm5 = vcmp.eq.s32.totalorder %v63_v0, 1 }
 0x341   :  { %5966 = vmatprep.subr.mxu0 %v6291_v29  ;;  %v1862_v36 = vcombine.low %v1837_v57, %v1845_v60  ;;  %v1863_v22 = vcombine.high %v1837_v57, %v1845_v60  ;;  %vm6989_vm6 = vmand %vm56_vm4, %vm64_vm5 }
 0x342   :  { %v6964_v62 = vrot.slane %v1846_v37, %v6468_v25  ;;  %v6967_v55 = vrot.slane %v1847_v13, %v6468_v25 }
 0x343   :  { %v6970_v54 = vrot.slane %v1862_v36, %v6468_v25  ;;  %v6973_v23 = vrot.slane %v1863_v22, %v6468_v25 }
 0x345   :  { %v1878_v24 = vcombine.low %v6964_v62, %v6970_v54  ;;  %v1879_v53 = vcombine.high %v6964_v62, %v6970_v54  ;;  %v1880_v33 = vcombine.low %v6967_v55, %v6973_v23  ;;  %v1881_v15 = vcombine.high %v6967_v55, %v6973_v23 }
 0x3e9   :  { %v2091_v38 = vpop.f32.mrb[4].mxu0 }
 0x3ea   :  { %v6995_v39 = vsel %vm6989_vm6, %v2091_v38, -3.4028235e+38  ;;  %v2167_v45 = vpop.f32.mrb[0].mxu1  ;;  %v5875_v12 = vpop.f32.mrb[5].mxu0 }
 0x3eb   :  { %v6999_v35 = vsel %vm6989_vm6, %v2167_v45, -3.4028235e+38  ;;  %v5880_v46 = vpop.f32.mrb[1].mxu1  ;;  %v3253_v14 = vsel %vm2018_vm2, %v6995_v39, -inf }
 0x3ec   :  { %v3256_v41 = vsel %vm2018_vm2, %v6999_v35, -inf  ;;  %3254 = vmax.xlane.f32.xlu0 %v3253_v14 }
 0x3ed   :  { %3257 = vmax.xlane.f32.xlu1 %v3256_v41 }
 0x3f2   :  { %v2243_v44 = vpop.f32.mrb[2].mxu1  ;;  %v2319_v17 = vpop.f32.mrb[6].mxu0 }
 0x3f3   :  { %v7007_v61 = vsel %vm6989_vm6, %v2243_v44, -3.4028235e+38  ;;  %v5885_v40 = vpop.f32.mrb[3].mxu1  ;;  %v5890_v50 = vpop.f32.mrb[7].mxu0  ;;  %v7013_v26 = vsel %vm6989_vm6, %v2319_v17, -3.4028235e+38 }
 0x3f4   :  { %v3259_v6 = vsel %vm2018_vm2, %v7007_v61, -inf  ;;  %v3262_v4 = vsel %vm2018_vm2, %v7013_v26, -inf }
 0x3f5   :  { %3260 = vmax.xlane.f32.xlu0 %v3259_v6 }
 0x3f9   :  { %v2395_v48 = vpop.f32.mrb[4].mxu1  ;;  %3263 = vmax.xlane.f32.xlu0 %v3262_v4 }
 0x3fa   :  { %v7019_v16 = vsel %vm6989_vm6, %v2395_v48, -3.4028235e+38  ;;  %v2471_v52 = vpop.f32.mrb[8].mxu0  ;;  %v5895_v21 = vpop.f32.mrb[5].mxu1 }
 0x3fb   :  { %v7023_v27 = vsel %vm6989_vm6, %v2471_v52, -3.4028235e+38  ;;  %v5900_v47 = vpop.f32.mrb[9].mxu0  ;;  %v3265_v51 = vsel %vm2018_vm2, %v7019_v16, -inf }
 0x3fc   :  { %v3268_v49 = vsel %vm2018_vm2, %v7023_v27, -inf }
 0x3fd   :  { %3269 = vmax.xlane.f32.xlu1 %v3268_v49  ;;  %v2547_v63 = vpop.f32.mrb[6].mxu1  ;;  %3266 = vmax.xlane.f32.xlu0 %v3265_v51 }
 0x3fe   :  { %v7031_v32 = vsel %vm6989_vm6, %v2547_v63, -3.4028235e+38  ;;  %v2623_v34 = vpop.f32.mrb[10].mxu0  ;;  %v5905_v57 = vpop.f32.mrb[7].mxu1 }
 0x3ff   :  { %v7035_v60 = vsel %vm6989_vm6, %v2623_v34, -3.4028235e+38  ;;  %v5910_v37 = vpop.f32.mrb[11].mxu0  ;;  %v3271_v36 = vsel %vm2018_vm2, %v7031_v32, -inf }
 0x400   :  { %v3274_v13 = vsel %vm2018_vm2, %v7035_v60, -inf }
 0x401   :  { %3275 = vmax.xlane.f32.xlu1 %v3274_v13  ;;  %3272 = vmax.xlane.f32.xlu0 %v3271_v36 }
 0x402   :  { %v2699_v22 = vpop.f32.mrb[8].mxu1 }
 0x403   :  { %v7043_v5 = vsel %vm6989_vm6, %v2699_v22, -3.4028235e+38  ;;  %v5915_v43 = vpop.f32.mrb[9].mxu1 }
 0x404   :  { %v2775_v59 = vpop.f32.mrb[12].mxu0  ;;  %v3277_v0 = vsel %vm2018_vm2, %v7043_v5, -inf }
 0x405   :  { %v7047_v31 = vsel %vm6989_vm6, %v2775_v59, -3.4028235e+38  ;;  %v5920_v10 = vpop.f32.mrb[13].mxu0  ;;  %3278 = vmax.xlane.f32.xlu0 %v3277_v0 }
 0x406   :  { %v3280_v11 = vsel %vm2018_vm2, %v7047_v31, -inf }
 0x407   :  { %3281 = vmax.xlane.f32.xlu1 %v3280_v11 }
 0x408   :  { %v2851_v38 = vpop.f32.mrb[10].mxu1  ;;  %v2927_v45 = vpop.f32.mrb[14].mxu0 }
 0x409   :  { %v7055_v12 = vsel %vm6989_vm6, %v2851_v38, -3.4028235e+38  ;;  %v7059_v46 = vsel %vm6989_vm6, %v2927_v45, -3.4028235e+38  ;;  %v5925_v14 = vpop.f32.mrb[11].mxu1  ;;  %v5930_v41 = vpop.f32.mrb[15].mxu0 }
 0x40a   :  { %v3286_v44 = vsel %vm2018_vm2, %v7059_v46, -inf  ;;  %v3283_v17 = vsel %vm2018_vm2, %v7055_v12, -inf }
 0x40b   :  { %3287 = vmax.xlane.f32.xlu1 %v3286_v44  ;;  %3284 = vmax.xlane.f32.xlu0 %v3283_v17 }
 0x40c   :  { %v3003_v40 = vpop.f32.mrb[12].mxu1  ;;  %v3079_v50 = vpop.f32.mrb[16].mxu0 }
 0x40d   :  { %v7067_v6 = vsel %vm6989_vm6, %v3003_v40, -3.4028235e+38  ;;  %v7071_v4 = vsel %vm6989_vm6, %v3079_v50, -3.4028235e+38  ;;  %v5935_v48 = vpop.f32.mrb[13].mxu1  ;;  %v5940_v52 = vpop.f32.mrb[17].mxu0 }
 0x40e   :  { %v3292_v21 = vsel %vm2018_vm2, %v7071_v4, -inf  ;;  %v3289_v47 = vsel %vm2018_vm2, %v7067_v6, -inf }
 0x40f   :  { %3293 = vmax.xlane.f32.xlu1 %v3292_v21  ;;  %3290 = vmax.xlane.f32.xlu0 %v3289_v47 }
 0x410   :  { %v3155_v49 = vpop.f32.mrb[14].mxu1 }
 0x411   :  { %v3231_v51 = vpop.f32.mrb[18].mxu0  ;;  %v7079_v63 = vsel %vm6989_vm6, %v3155_v49, -3.4028235e+38  ;;  %v5945_v57 = vpop.f32.mrb[15].mxu1 }
 0x412   :  { %v7083_v34 = vsel %vm6989_vm6, %v3231_v51, -3.4028235e+38  ;;  %v5950_v37 = vpop.f32.mrb[19].mxu0  ;;  %v3295_v13 = vsel %vm2018_vm2, %v7079_v63, -inf }
 0x413   :  { %3296 = vmax.xlane.f32.xlu0 %v3295_v13  ;;  %v3298_v3 = vsel %vm2018_vm2, %v7083_v34, -inf }
 0x420   :  { %1438 = vrot.lane.b32.xlu1 %v6492_v42, %s6290_s19 }
 0x424   :  { %1446 = vrot.lane.b32.xlu1 %v6512_v58, %s6290_s19 }
 0x429   :  { %1430 = vrot.lane.b32.xlu0 %v6427_v7, %s6290_s19 }
 0x448   :  { %3299 = vmax.xlane.f32.xlu1 %v3298_v3 }
 0x459   :  { %1454 = vrot.lane.b32.xlu1 %v6516_v1, %s6290_s19 }
 0x479   :  { %v3255_v36 = vpop.xlane.xlu0 %3254 }
 0x47a   :  { %v3258_v22 = vpop.xlane.xlu1 %3257  ;;  %v3301_v59 = vsub.f32 %v6995_v39, %v3255_v36 }
 0x47b   :  { %v3302_v43 = vsub.f32 %v6999_v35, %v3258_v22 }
 0x47c   :  { %v3317_v42 = vmul.f32 1.442695, %v3301_v59 }
 0x47d   :  { %v3319_v10 = vmul.f32 1.442695, %v3302_v43 }
 0x47e   :  { %6176 = vpow2.f32 %v3317_v42 }
 0x47f   :  { %6178 = vpow2.f32 %v3319_v10 }
 0x482   :  { %v3261_v58 = vpop.xlane.xlu0 %3260 }
 0x483   :  { %v3303_v7 = vsub.f32 %v7007_v61, %v3261_v58 }
 0x485   :  { %v3321_v11 = vmul.f32 1.442695, %v3303_v7 }
 0x486   :  { %v3264_v0 = vpop.xlane.xlu0 %3263 }
 0x487   :  { %6180 = vpow2.f32 %v3321_v11  ;;  %v3304_v38 = vsub.f32 %v7013_v26, %v3264_v0 }
 0x488   :  { %v7101_v45 = vpop.eup %6176 }
 0x489   :  { %v7103_v1 = vpop.eup %6178  ;;  %v3323_v14 = vmul.f32 1.442695, %v3304_v38  ;;  %v3349_v39 = vsel %vm2018_vm2, %v7101_v45, 0.0 }
 0x48a   :  { %v3270_v35 = vpop.xlane.xlu1 %3269  ;;  %v3267_v41 = vpop.xlane.xlu0 %3266  ;;  %v3352_v44 = vsel %vm2018_vm2, %v7103_v1, 0.0  ;;  %3350 = vadd.xlane.f32.xlu0 %v3349_v39 }
 0x48b   :  { %v3306_v61 = vsub.f32 %v7023_v27, %v3270_v35  ;;  %6182 = vpow2.f32 %v3323_v14  ;;  %v3305_v17 = vsub.f32 %v7019_v16, %v3267_v41  ;;  %3353 = vadd.xlane.f32.xlu1 %v3352_v44 }
 0x48d   :  { %v3327_v26 = vmul.f32 1.442695, %v3306_v61  ;;  %v3325_v40 = vmul.f32 1.442695, %v3305_v17 }
 0x48e   :  { %v3276_v50 = vpop.xlane.xlu1 %3275  ;;  %v3273_v48 = vpop.xlane.xlu0 %3272 }
 0x48f   :  { %6184 = vpow2.f32 %v3327_v26  ;;  %v3308_v52 = vsub.f32 %v7035_v60, %v3276_v50  ;;  %v3307_v21 = vsub.f32 %v7031_v32, %v3273_v48 }
 0x490   :  { %6186 = vpow2.f32 %v3325_v40 }
 0x491   :  { %v7113_v47 = vpop.eup %6180  ;;  %v3329_v49 = vmul.f32 1.442695, %v3307_v21  ;;  %v3331_v51 = vmul.f32 1.442695, %v3308_v52 }
 0x492   :  { %v3279_v27 = vpop.xlane.xlu0 %3278  ;;  %v3355_v16 = vsel %vm2018_vm2, %v7113_v47, 0.0 }
 0x493   :  { %v3309_v13 = vsub.f32 %v7043_v5, %v3279_v27  ;;  %3356 = vadd.xlane.f32.xlu0 %v3355_v16  ;;  %6188 = vpow2.f32 %v3329_v49 }
 0x494   :  { %v3282_v57 = vpop.xlane.xlu1 %3281  ;;  %6190 = vpow2.f32 %v3331_v51 }
 0x495   :  { %v3310_v37 = vsub.f32 %v7047_v31, %v3282_v57  ;;  %v7119_v3 = vpop.eup %6182  ;;  %v3333_v36 = vmul.f32 1.442695, %v3309_v13 }
 0x496   :  { %v3358_v59 = vsel %vm2018_vm2, %v7119_v3, 0.0 }
 0x497   :  { %v3335_v60 = vmul.f32 1.442695, %v3310_v37  ;;  %3359 = vadd.xlane.f32.xlu1 %v3358_v59 }
 0x498   :  { %v3288_v32 = vpop.xlane.xlu1 %3287  ;;  %v3285_v22 = vpop.xlane.xlu0 %3284 }
 0x499   :  { %6192 = vpow2.f32 %v3335_v60  ;;  %v3311_v43 = vsub.f32 %v7055_v12, %v3285_v22  ;;  %v7124_v42 = vpop.eup %6184  ;;  %v3312_v5 = vsub.f32 %v7059_v46, %v3288_v32 }
 0x49a   :  { %v7126_v31 = vpop.eup %6186  ;;  %6194 = vpow2.f32 %v3333_v36  ;;  %v3364_v11 = vsel %vm2018_vm2, %v7124_v42, 0.0 }
 0x49b   :  { %v3337_v58 = vmul.f32 1.442695, %v3311_v43  ;;  %3365 = vadd.xlane.f32.xlu1 %v3364_v11  ;;  %v3361_v12 = vsel %vm2018_vm2, %v7126_v31, 0.0  ;;  %v3339_v39 = vmul.f32 1.442695, %v3312_v5 }
 0x49c   :  { %v3294_v10 = vpop.xlane.xlu1 %3293  ;;  %v3291_v7 = vpop.xlane.xlu0 %3290  ;;  %3362 = vadd.xlane.f32.xlu0 %v3361_v12 }
 0x49d   :  { %v3314_v0 = vsub.f32 %v7071_v4, %v3294_v10  ;;  %v7134_v14 = vpop.eup %6188  ;;  %6196 = vpow2.f32 %v3337_v58  ;;  %v3313_v46 = vsub.f32 %v7067_v6, %v3291_v7 }
 0x49e   :  { %v3367_v41 = vsel %vm2018_vm2, %v7134_v14, 0.0  ;;  %v7139_v44 = vpop.eup %6190 }
 0x49f   :  { %v3343_v38 = vmul.f32 1.442695, %v3314_v0  ;;  %v3341_v61 = vmul.f32 1.442695, %v3313_v46  ;;  %v3370_v6 = vsel %vm2018_vm2, %v7139_v44, 0.0 }
 0x4a0   :  { %v3297_v35 = vpop.xlane.xlu0 %3296  ;;  %3368 = vadd.xlane.f32.xlu0 %v3367_v41  ;;  %v1439_v60 = vpop.permute.xlu1 %1438 }
 0x4a1   :  { %6198 = vpow2.f32 %v3343_v38  ;;  %v3315_v17 = vsub.f32 %v7079_v63, %v3297_v35 }
 0x4a2   :  { %6200 = vpow2.f32 %v3339_v39 }
 0x4a3   :  { %v7141_v4 = vpop.eup %6192  ;;  %6202 = vpow2.f32 %v3341_v61  ;;  %v3345_v50 = vmul.f32 1.442695, %v3315_v17 }
 0x4a4   :  { %v3376_v26 = vsel %vm2018_vm2, %v7141_v4, 0.0  ;;  %v7148_v40 = vpop.eup %6194  ;;  %3371 = vadd.xlane.f32.xlu0 %v3370_v6  ;;  %v1447_v32 = vpop.permute.xlu1 %1446 }
 0x4a5   :  { %3377 = vadd.xlane.f32.xlu1 %v3376_v26  ;;  %v3373_v48 = vsel %vm2018_vm2, %v7148_v40, 0.0  ;;  %6204 = vpow2.f32 %v3345_v50  ;;  %v1431_v36 = vpop.permute.xlu0 %1430 }
 0x4a6   :  { %v1610_v43 = vcombine.low %v1431_v36, %v1447_v32  ;;  %v1611_v5 = vcombine.high %v1431_v36, %v1447_v32 }
 0x4a7   :  { %v7152_v52 = vpop.eup %6196 }
 0x4a8   :  { %3374 = vadd.xlane.f32.xlu0 %v3373_v48  ;;  %v3379_v49 = vsel %vm2018_vm2, %v7152_v52, 0.0 }
 0x4ab   :  { %v7154_v21 = vpop.eup %6198 }
 0x4ac   :  { %v3388_v63 = vsel %vm2018_vm2, %v7154_v21, 0.0  ;;  %v7160_v51 = vpop.eup %6200  ;;  %3380 = vadd.xlane.f32.xlu0 %v3379_v49 }
 0x4ad   :  { %3389 = vadd.xlane.f32.xlu1 %v3388_v63  ;;  %v3382_v57 = vsel %vm2018_vm2, %v7160_v51, 0.0  ;;  %v7164_v27 = vpop.eup %6202 }
 0x4ae   :  { %v3385_v16 = vsel %vm2018_vm2, %v7164_v27, 0.0 }
 0x4af   :  { %v7168_v37 = vpop.eup %6204 }
 0x4b0   :  { %3383 = vadd.xlane.f32.xlu0 %v3382_v57  ;;  %v3391_v13 = vsel %vm2018_vm2, %v7168_v37, 0.0 }
 0x4b4   :  { %3386 = vadd.xlane.f32.xlu0 %v3385_v16 }
 0x4b8   :  { %3392 = vadd.xlane.f32.xlu0 %v3391_v13 }
 0x4be   :  { %1440 = vrot.lane.b32.xlu1 %v6528_v18, %s6290_s19  ;;  %v1618_v18 = vrot.slane %v1610_v43, %v6453_v19 }
 0x4c2   :  { %1448 = vrot.lane.b32.xlu1 %v6530_v20, %s6290_s19  ;;  %v1625_v20 = vrot.slane %v1611_v5, %v6453_v19 }
 0x4c6   :  { %1456 = vrot.lane.b32.xlu1 %v6540_v28, %s6290_s19 }
 0x4d5   :  { %v3300_v22 = vpop.xlane.xlu1 %3299 }
 0x4d6   :  { %v3316_v59 = vsub.f32 %v7083_v34, %v3300_v22 }
 0x4d8   :  { %v3347_v10 = vmul.f32 1.442695, %v3316_v59 }
 0x4d9   :  { %v1455_v58 = vpop.permute.xlu1 %1454 }
 0x4da   :  { %6206 = vpow2.f32 %v3347_v10  ;;  %v1626_v7 = vcombine.low %v1439_v60, %v1455_v58  ;;  %v1627_v11 = vcombine.high %v1439_v60, %v1455_v58 }
 0x4dc   :  { %v1634_v0 = vrot.slane %v1626_v7, %v6453_v19  ;;  %v1641_v28 = vrot.slane %v1627_v11, %v6453_v19 }
 0x4de   :  { %v1642_v12 = vcombine.low %v1618_v18, %v1634_v0  ;;  %v1643_v38 = vcombine.high %v1618_v18, %v1634_v0  ;;  %v1658_v39 = vcombine.low %v1625_v20, %v1641_v28  ;;  %v1659_v46 = vcombine.high %v1625_v20, %v1641_v28 }
 0x4e0   :  { %v1650_v34 = vrot.slane %v1642_v12, %v6468_v25  ;;  %v1657_v35 = vrot.slane %v1643_v38, %v6468_v25  ;;  %v1666_v41 = vrot.slane %v1658_v39, %v6468_v25  ;;  %v1673_v61 = vrot.slane %v1659_v46, %v6468_v25 }
 0x4e2   :  { %v1882_v17 = vcombine.low %v1650_v34, %v1657_v35  ;;  %v5676_v26 = vcombine.high %v1650_v34, %v1657_v35  ;;  %v1898_v6 = vcombine.low %v1666_v41, %v1673_v61  ;;  %v5677_v50 = vcombine.high %v1666_v41, %v1673_v61 }
 0x4e4   :  { %v7187_v48 = vpop.eup %6206  ;;  %v1889_v63 = vrot.slane %v1882_v17, %v6453_v19  ;;  %v1897_v49 = vrot.slane %v5676_v26, %v6453_v19  ;;  %v1905_v57 = vrot.slane %v1898_v6, %v6453_v19  ;;  %v1913_v16 = vrot.slane %v5677_v50, %v6453_v19 }
 0x4e5   :  { %v3394_v13 = vsel %vm2018_vm2, %v7187_v48, 0.0 }
 0x4e6   :  { %3395 = vadd.xlane.f32.xlu0 %v3394_v13  ;;  %v1914_v60 = vcombine.low %v1889_v63, %v1897_v49  ;;  %v1930_v32 = vcombine.low %v1905_v57, %v1913_v16  ;;  %v1915_v36 = vcombine.high %v1889_v63, %v1897_v49  ;;  %v1931_v22 = vcombine.high %v1905_v57, %v1913_v16 }
 0x4e8   :  { %v7196_v59 = vrot.slane %v1914_v60, %v6468_v25  ;;  %v7199_v43 = vrot.slane %v1930_v32, %v6468_v25  ;;  %v7202_v5 = vrot.slane %v1915_v36, %v6468_v25  ;;  %v7205_v10 = vrot.slane %v1931_v22, %v6468_v25 }
 0x4ea   :  { %v1946_v58 = vcombine.low %v7196_v59, %v7199_v43  ;;  %v1947_v7 = vcombine.high %v7196_v59, %v7199_v43  ;;  %v1948_v11 = vcombine.low %v7202_v5, %v7205_v10  ;;  %v1949_v18 = vcombine.high %v7202_v5, %v7205_v10 }
 0x4fc   :  { %1432 = vrot.lane.b32.xlu0 %v6433_v8, %s6290_s19 }
 0x517   :  { %v3351_v20 = vpop.xlane.xlu0 %3350 }
 0x518   :  { %v3354_v0 = vpop.xlane.xlu1 %3353  ;;  %6208 = vrcp.f32 %v3351_v20 }
 0x519   :  { %6210 = vrcp.f32 %v3354_v0 }
 0x520   :  { %v3357_v28 = vpop.xlane.xlu0 %3356 }
 0x521   :  { %6212 = vrcp.f32 %v3357_v28 }
 0x522   :  { %v6209_v12 = vpop.eup %6208 }
 0x523   :  { %v6211_v38 = vpop.eup %6210  ;;  %v3413_v39 = vmul.f32 %v6209_v12, %v7101_v45 }
 0x524   :  { %v3414_v46 = vmul.f32 %v6211_v38, %v7103_v1  ;;  %v3360_v34 = vpop.xlane.xlu1 %3359 }
 0x525   :  { %6214 = vrcp.f32 %v3360_v34  ;;  %5954 = vmatmul.mubr.msk.f32.vlgmr.msra.gmra.mrb[16].mxu1 %vm2018_vm2, %v3413_v39 }
 0x526   :  { %5959 = vmatmul.mubr.msk.f32.vlgmr.msra.gmra.mrb[20].mxu0 %vm2018_vm2, %v3414_v46  ;;  %5962 = vmatpush3.msra.mxu1 %v1812_v30 }
 0x527   :  { %5967 = vmatpush3.msra.mxu0 %v1813_v56  ;;  %5963 = vmatprep.mubr.msk.f32.mxu1 %vm6292_vm1, %v6291_v29 }
 0x528   :  { %v3366_v8 = vpop.xlane.xlu1 %3365  ;;  %5971 = vmatprep.subr.mxu1 %v6291_v29  ;;  %5968 = vmatprep.mubr.msk.f32.mxu0 %vm6292_vm1, %v6291_v29 }
 0x529   :  { %6216 = vrcp.f32 %v3366_v8  ;;  %v3363_v45 = vpop.xlane.xlu0 %3362  ;;  %5976 = vmatprep.subr.mxu0 %v6291_v29 }
 0x52a   :  { %6218 = vrcp.f32 %v3363_v45 }
 0x52b   :  { %v6213_v1 = vpop.eup %6212 }
 0x52c   :  { %v3415_v30 = vmul.f32 %v6213_v1, %v7113_v47 }
 0x52d   :  { %v3369_v35 = vpop.xlane.xlu0 %3368 }
 0x52e   :  { %6220 = vrcp.f32 %v3369_v35  ;;  %5964 = vmatmul.mubr.msk.f32.vlgmr.msra.gmra.mrb[18].mxu1 %vm2018_vm2, %v3415_v30 }
 0x52f   :  { %v6215_v9 = vpop.eup %6214  ;;  %5972 = vmatpush3.msra.mxu1 %v1878_v24  ;;  %5973 = vmatprep.mubr.msk.f32.mxu1 %vm6292_vm1, %v6291_v29 }
 0x530   :  { %v3416_v2 = vmul.f32 %v6215_v9, %v7119_v3  ;;  %5981 = vmatprep.subr.mxu1 %v6291_v29 }
 0x531   :  { %v3372_v41 = vpop.xlane.xlu0 %3371 }
 0x532   :  { %v3378_v56 = vpop.xlane.xlu1 %3377  ;;  %6222 = vrcp.f32 %v3372_v41  ;;  %5969 = vmatmul.mubr.msk.f32.vlgmr.msra.gmra.mrb[22].mxu0 %vm2018_vm2, %v3416_v2 }
 0x533   :  { %v6217_v47 = vpop.eup %6216  ;;  %5977 = vmatpush3.msra.mxu0 %v1879_v53  ;;  %5978 = vmatprep.mubr.msk.f32.mxu0 %vm6292_vm1, %v6291_v29  ;;  %6224 = vrcp.f32 %v3378_v56 }
 0x534   :  { %v6219_v24 = vpop.eup %6218  ;;  %v3418_v61 = vmul.f32 %v6217_v47, %v7124_v42  ;;  %5986 = vmatprep.subr.mxu0 %v6291_v29 }
 0x535   :  { %v3417_v3 = vmul.f32 %v6219_v24, %v7126_v31  ;;  %v3375_v17 = vpop.xlane.xlu0 %3374 }
 0x536   :  { %6226 = vrcp.f32 %v3375_v17  ;;  %5979 = vmatmul.mubr.msk.f32.vlgmr.msra.gmra.mrb[24].mxu0 %vm2018_vm2, %v3418_v61 }
 0x537   :  { %5974 = vmatmul.mubr.msk.f32.vlgmr.msra.gmra.mrb[20].mxu1 %vm2018_vm2, %v3417_v3  ;;  %5987 = vmatpush3.msra.mxu0 %v1881_v15 }
 0x538   :  { %v6221_v62 = vpop.eup %6220  ;;  %5982 = vmatpush3.msra.mxu1 %v1880_v33  ;;  %5983 = vmatprep.mubr.msk.f32.mxu1 %vm6292_vm1, %v6291_v29 }
 0x539   :  { %v3419_v54 = vmul.f32 %v6221_v62, %v7134_v14  ;;  %v3381_v53 = vpop.xlane.xlu0 %3380  ;;  %5991 = vmatprep.subr.mxu1 %v6291_v29  ;;  %5988 = vmatprep.mubr.msk.f32.mxu0 %vm6292_vm1, %v6291_v29 }
 0x53a   :  { %6228 = vrcp.f32 %v3381_v53  ;;  %5996 = vmatprep.subr.mxu0 %v6291_v29 }
 0x53b   :  { %5984 = vmatmul.mubr.msk.f32.vlgmr.msra.gmra.mrb[22].mxu1 %vm2018_vm2, %v3419_v54 }
 0x53c   :  { %v6223_v15 = vpop.eup %6222  ;;  %5992 = vmatpush3.msra.mxu1 %v1946_v58  ;;  %5993 = vmatprep.mubr.msk.f32.mxu1 %vm6292_vm1, %v6291_v29 }
 0x53d   :  { %v3420_v55 = vmul.f32 %v6223_v15, %v7139_v44  ;;  %v3384_v23 = vpop.xlane.xlu0 %3383  ;;  %6001 = vmatprep.subr.mxu1 %v6291_v29  ;;  %v6225_v33 = vpop.eup %6224 }
 0x53e   :  { %6230 = vrcp.f32 %v3384_v23  ;;  %v3422_v31 = vmul.f32 %v6225_v33, %v7141_v4 }
 0x53f   :  { %5989 = vmatmul.mubr.msk.f32.vlgmr.msra.gmra.mrb[26].mxu0 %vm2018_vm2, %v3420_v55 }
 0x540   :  { %v6227_v42 = vpop.eup %6226  ;;  %5997 = vmatpush3.msra.mxu0 %v1947_v7  ;;  %5998 = vmatprep.mubr.msk.f32.mxu0 %vm6292_vm1, %v6291_v29 }
 0x541   :  { %v3421_v14 = vmul.f32 %v6227_v42, %v7148_v40  ;;  %6006 = vmatprep.subr.mxu0 %v6291_v29  ;;  %v3387_v50 = vpop.xlane.xlu0 %3386 }
 0x543   :  { %5994 = vmatmul.mubr.msk.f32.vlgmr.msra.gmra.mrb[24].mxu1 %vm2018_vm2, %v3421_v14  ;;  %5999 = vmatmul.mubr.msk.f32.vlgmr.msra.gmra.mrb[28].mxu0 %vm2018_vm2, %v3422_v31 }
 0x544   :  { %v6229_v44 = vpop.eup %6228  ;;  %6002 = vmatpush3.msra.mxu1 %v1948_v11  ;;  %6007 = vmatpush3.msra.mxu0 %v1949_v18 }
 0x545   :  { %v3423_v26 = vmul.f32 %v6229_v44, %v7152_v52  ;;  %6003 = vmatprep.mubr.msk.f32.mxu1 %vm6292_vm1, %v6291_v29  ;;  %6008 = vmatprep.mubr.msk.f32.mxu0 %vm6292_vm1, %v6291_v29  ;;  %v3390_v52 = vpop.xlane.xlu1 %3389  ;;  %v3393_v49 = vpop.xlane.xlu0 %3392 }
 0x546   :  { %6011 = vmatprep.subr.mxu1 %v6291_v29  ;;  %6016 = vmatprep.subr.mxu0 %v6291_v29  ;;  %6232 = vrcp.f32 %v3390_v52 }
 0x547   :  { %6004 = vmatmul.mubr.msk.f32.vlgmr.msra.gmra.mrb[26].mxu1 %vm2018_vm2, %v3423_v26  ;;  %6234 = vrcp.f32 %v3387_v50 }
 0x548   :  { %v6231_v4 = vpop.eup %6230  ;;  %6013 = vmatprep.mubr.msk.f32.mxu1 %vm6292_vm1, %v6291_v29  ;;  %6236 = vrcp.f32 %v3393_v49 }
 0x549   :  { %v3424_v40 = vmul.f32 %v6231_v4, %v7160_v51  ;;  %v1441_v6 = vpop.permute.xlu1 %1440 }
 0x54b   :  { %6009 = vmatmul.mubr.msk.f32.vlgmr.msra.gmra.mrb[30].mxu0 %vm2018_vm2, %v3424_v40 }
 0x54c   :  { %6018 = vmatprep.mubr.msk.f32.mxu0 %vm6292_vm1, %v6291_v29 }
 0x54d   :  { %v1449_v63 = vpop.permute.xlu1 %1448 }
 0x550   :  { %v6233_v30 = vpop.eup %6232 }
 0x551   :  { %v1457_v57 = vpop.permute.xlu1 %1456  ;;  %v6235_v41 = vpop.eup %6234  ;;  %v3426_v15 = vmul.f32 %v6233_v30, %v7154_v21 }
 0x552   :  { %v1694_v13 = vcombine.low %v1441_v6, %v1457_v57  ;;  %v1695_v60 = vcombine.high %v1441_v6, %v1457_v57  ;;  %v6237_v61 = vpop.eup %6236  ;;  %v3425_v55 = vmul.f32 %v6235_v41, %v7164_v27 }
 0x553   :  { %v3427_v42 = vmul.f32 %v6237_v61, %v7168_v37 }
 0x554   :  { %v1702_v51 = vrot.slane %v1694_v13, %v6453_v19  ;;  %v1709_v59 = vrot.slane %v1695_v60, %v6453_v19 }
 0x573   :  { %v3396_v16 = vpop.xlane.xlu0 %3395 }
 0x574   :  { %6238 = vrcp.f32 %v3396_v16 }
 0x577   :  { %v1433_v32 = vpop.permute.xlu0 %1432 }
 0x578   :  { %v1678_v36 = vcombine.low %v1433_v32, %v1449_v63  ;;  %v1679_v22 = vcombine.high %v1433_v32, %v1449_v63 }
 0x57a   :  { %v1686_v43 = vrot.slane %v1678_v36, %v6453_v19  ;;  %v1693_v5 = vrot.slane %v1679_v22, %v6453_v19 }
 0x57c   :  { %v1710_v10 = vcombine.low %v1686_v43, %v1702_v51  ;;  %v1711_v58 = vcombine.high %v1686_v43, %v1702_v51  ;;  %v1726_v7 = vcombine.low %v1693_v5, %v1709_v59  ;;  %v1727_v11 = vcombine.high %v1693_v5, %v1709_v59 }
 0x57e   :  { %v1718_v18 = vrot.slane %v1710_v10, %v6468_v25  ;;  %v1725_v20 = vrot.slane %v1711_v58, %v6468_v25  ;;  %v1734_v0 = vrot.slane %v1726_v7, %v6468_v25  ;;  %v1741_v28 = vrot.slane %v1727_v11, %v6468_v25  ;;  %v6239_v53 = vpop.eup %6238 }
 0x57f   :  { %v3428_v31 = vmul.f32 %v6239_v53, %v7187_v48 }
 0x580   :  { %v1950_v12 = vcombine.low %v1718_v18, %v1725_v20  ;;  %v5678_v38 = vcombine.high %v1718_v18, %v1725_v20  ;;  %v1966_v39 = vcombine.low %v1734_v0, %v1741_v28  ;;  %v5679_v46 = vcombine.high %v1734_v0, %v1741_v28 }
 0x582   :  { %v1957_v34 = vrot.slane %v1950_v12, %v6453_v19  ;;  %v1965_v8 = vrot.slane %v5678_v38, %v6453_v19  ;;  %v1973_v45 = vrot.slane %v1966_v39, %v6453_v19  ;;  %v1981_v1 = vrot.slane %v5679_v46, %v6453_v19 }
 0x584   :  { %v1982_v35 = vcombine.low %v1957_v34, %v1965_v8  ;;  %v1998_v9 = vcombine.low %v1973_v45, %v1981_v1  ;;  %v1983_v2 = vcombine.high %v1957_v34, %v1965_v8  ;;  %v1999_v56 = vcombine.high %v1973_v45, %v1981_v1 }
 0x586   :  { %v1990_v47 = vrot.slane %v1982_v35, %v6468_v25  ;;  %v2006_v24 = vrot.slane %v1998_v9, %v6468_v25  ;;  %v1997_v3 = vrot.slane %v1983_v2, %v6468_v25  ;;  %v2013_v17 = vrot.slane %v1999_v56, %v6468_v25 }
 0x588   :  { %v2014_v62 = vcombine.low %v1990_v47, %v2006_v24  ;;  %v2015_v54 = vcombine.high %v1990_v47, %v2006_v24  ;;  %v2016_v23 = vcombine.low %v1997_v3, %v2013_v17  ;;  %v2017_v33 = vcombine.high %v1997_v3, %v2013_v17 }
 0x58a   :  { %6012 = vmatpush3.msra.mxu1 %v2014_v62  ;;  %6017 = vmatpush3.msra.mxu0 %v2015_v54 }
 0x58b   :  { %6014 = vmatmul.mubr.msk.f32.vlgmr.msra.gmra.mrb[28].mxu1 %vm2018_vm2, %v3425_v55  ;;  %6019 = vmatmul.mubr.msk.f32.vlgmr.msra.gmra.mrb[32].mxu0 %vm2018_vm2, %v3426_v15 }
 0x58c   :  { %6021 = vmatprep.subr.mxu1 %v6291_v29  ;;  %6026 = vmatprep.subr.mxu0 %v6291_v29 }
 0x58d   :  { %6022 = vmatpush3.msra.mxu1 %v2016_v23  ;;  %6027 = vmatpush3.msra.mxu0 %v2017_v33 }
 0x58e   :  { %6023 = vmatprep.mubr.msk.f32.mxu1 %vm6292_vm1, %v6291_v29  ;;  %6028 = vmatprep.mubr.msk.f32.mxu0 %vm6292_vm1, %v6291_v29 }
 0x58f   :  { %6024 = vmatmul.mubr.msk.f32.vlgmr.msra.gmra.mrb[30].mxu1 %vm2018_vm2, %v3427_v42  ;;  %6029 = vmatmul.mubr.msk.f32.vlgmr.msra.gmra.mrb[34].mxu0 %vm2018_vm2, %v3428_v31 }
 0x5f8   :  { %v3498_v21 = vpop.f32.mrb[16].mxu1 }
 0x5f9   :  { %v3571_v27 = vpop.f32.mrb[20].mxu0  ;;  %v5955_v14 = vpop.f32.mrb[17].mxu1 }
 0x5fa   :  { %v5960_v44 = vpop.f32.mrb[21].mxu0 }
 0x601   :  { %v3644_v26 = vpop.f32.mrb[18].mxu1 }
 0x602   :  { %v4597_v37 = vcombine.low %v3498_v21, %v3644_v26  ;;  %v4598_v4 = vcombine.high %v3498_v21, %v3644_v26  ;;  %v5965_v48 = vpop.f32.mrb[19].mxu1 }
 0x604   :  { %v4605_v63 = vrot.slane %v4597_v37, %v6453_v19  ;;  %v4612_v29 = vrot.slane %v4598_v4, %v6453_v19 }
 0x605   :  { %v3717_v40 = vpop.f32.mrb[22].mxu0 }
 0x606   :  { %v4613_v52 = vcombine.low %v3571_v27, %v3717_v40  ;;  %v4614_v6 = vcombine.high %v3571_v27, %v3717_v40  ;;  %v5970_v50 = vpop.f32.mrb[23].mxu0 }
 0x607   :  { %v5204_v50 = vld [vmem:[%s7614_s6 + $0x8] sm:$0xff] }
 0x608   :  { %v4621_v49 = vrot.slane %v4613_v52, %v6453_v19  ;;  %v4628_v57 = vrot.slane %v4614_v6, %v6453_v19  ;;  %v5203_v6 = vld [vmem:[%s7614_s6] sm:$0xff] }
 0x609   :  { %v3863_v16 = vpop.f32.mrb[24].mxu0 }
 0x60a   :  { %v4629_v13 = vcombine.low %v4605_v63, %v4621_v49  ;;  %v4630_v60 = vcombine.high %v4605_v63, %v4621_v49  ;;  %v4645_v32 = vcombine.low %v4612_v29, %v4628_v57  ;;  %v4646_v36 = vcombine.high %v4612_v29, %v4628_v57  ;;  %v3790_v22 = vpop.f32.mrb[20].mxu1  ;;  %v5980_v51 = vpop.f32.mrb[25].mxu0 }
 0x60b   :  { %v5975_v59 = vpop.f32.mrb[21].mxu1  ;;  %v6105_v29 = vpack.c.bf16 %v5204_v50, %v5203_v6 }
 0x60c   :  { %v4637_v43 = vrot.slane %v4629_v13, %v6468_v25  ;;  %v4644_v5 = vrot.slane %v4630_v60, %v6468_v25  ;;  %v4653_v10 = vrot.slane %v4645_v32, %v6468_v25  ;;  %v4660_v58 = vrot.slane %v4646_v36, %v6468_v25 }
 0x60d   :  { %6106 = vmatprep.subr.bf16.mxu0 %v6105_v29 }
 0x60e   :  { %v4869_v7 = vcombine.low %v4637_v43, %v4644_v5  ;;  %v5728_v11 = vcombine.high %v4637_v43, %v4644_v5  ;;  %v4885_v18 = vcombine.low %v4653_v10, %v4660_v58  ;;  %v5729_v20 = vcombine.high %v4653_v10, %v4660_v58  ;;  %v3936_v0 = vpop.f32.mrb[22].mxu1  ;;  %6108 = vmatpush3.bf16.msra.mxu0 %v6105_v29  ;;  %v5205_v5 = vld [vmem:[%s7614_s6 + $0x10] sm:$0xff]  ;;  %v5206_v10 = vld [vmem:[%s7614_s6 + $0x18] sm:$0xff] }
 0x60f   :  { %v4665_v28 = vcombine.low %v3790_v22, %v3936_v0  ;;  %v4666_v12 = vcombine.high %v3790_v22, %v3936_v0  ;;  %v5985_v38 = vpop.f32.mrb[23].mxu1 }
 0x610   :  { %v4876_v39 = vrot.slane %v4869_v7, %v6453_v19  ;;  %v4884_v46 = vrot.slane %v5728_v11, %v6453_v19  ;;  %v4892_v34 = vrot.slane %v4885_v18, %v6453_v19  ;;  %v4900_v8 = vrot.slane %v5729_v20, %v6453_v19 }
 0x611   :  { %v4673_v17 = vrot.slane %v4665_v28, %v6453_v19  ;;  %v4680_v62 = vrot.slane %v4666_v12, %v6453_v19  ;;  %v6109_v11 = vpack.c.bf16 %v5206_v10, %v5205_v5 }
 0x612   :  { %v4009_v45 = vpop.f32.mrb[26].mxu0  ;;  %v4901_v1 = vcombine.low %v4876_v39, %v4884_v46  ;;  %v4917_v30 = vcombine.low %v4892_v34, %v4900_v8  ;;  %v4902_v35 = vcombine.high %v4876_v39, %v4884_v46  ;;  %v4918_v9 = vcombine.high %v4892_v34, %v4900_v8 }
 0x613   :  { %v4681_v2 = vcombine.low %v3863_v16, %v4009_v45  ;;  %v4682_v56 = vcombine.high %v3863_v16, %v4009_v45  ;;  %v5990_v41 = vpop.f32.mrb[27].mxu0  ;;  %6110 = vmatprep.subr.bf16.mxu0 %v6109_v11 }
 0x614   :  { %v7348_v47 = vrot.slane %v4901_v1, %v6468_v25  ;;  %v7351_v24 = vrot.slane %v4917_v30, %v6468_v25  ;;  %v4916_v61 = vrot.slane %v4902_v35, %v6468_v25  ;;  %v4932_v3 = vrot.slane %v4918_v9, %v6468_v25  ;;  %6112 = vmatpush3.bf16.msra.mxu0 %v6109_v11 }
 0x615   :  { %v4689_v54 = vrot.slane %v4681_v2, %v6453_v19  ;;  %v4696_v53 = vrot.slane %v4682_v56, %v6453_v19 }
 0x616   :  { %v4082_v15 = vpop.f32.mrb[24].mxu1  ;;  %v4155_v55 = vpop.f32.mrb[28].mxu0  ;;  %v4934_v23 = vcombine.high %v7348_v47, %v7351_v24  ;;  %v4935_v33 = vcombine.low %v4916_v61, %v4932_v3  ;;  %v4936_v42 = vcombine.high %v4916_v61, %v4932_v3  ;;  %v4933_v31 = vcombine.low %v7348_v47, %v7351_v24 }
 0x617   :  { %v4697_v21 = vcombine.low %v4673_v17, %v4689_v54  ;;  %v4698_v27 = vcombine.high %v4673_v17, %v4689_v54  ;;  %v4713_v14 = vcombine.low %v4680_v62, %v4696_v53  ;;  %v4714_v44 = vcombine.high %v4680_v62, %v4696_v53  ;;  %v5995_v26 = vpop.f32.mrb[25].mxu1  ;;  %v6000_v37 = vpop.f32.mrb[29].mxu0 }
 0x618   :  { %5145 = vrot.lane.b32.xlu0 %v4934_v23, %s6294_s1 }
 0x619   :  { %v4705_v4 = vrot.slane %v4697_v21, %v6468_v25  ;;  %v4712_v48 = vrot.slane %v4698_v27, %v6468_v25  ;;  %v4721_v40 = vrot.slane %v4713_v14, %v6468_v25  ;;  %v4728_v52 = vrot.slane %v4714_v44, %v6468_v25 }
 0x61a   :  { %v4228_v63 = vpop.f32.mrb[26].mxu1 }
 0x61b   :  { %v4937_v49 = vcombine.low %v4705_v4, %v4712_v48  ;;  %v5730_v57 = vcombine.high %v4705_v4, %v4712_v48  ;;  %v4953_v16 = vcombine.low %v4721_v40, %v4728_v52  ;;  %v5731_v13 = vcombine.high %v4721_v40, %v4728_v52  ;;  %v6005_v60 = vpop.f32.mrb[27].mxu1 }
 0x61c   :  { %v4733_v32 = vcombine.low %v4082_v15, %v4228_v63  ;;  %v4734_v36 = vcombine.high %v4082_v15, %v4228_v63  ;;  %5161 = vrot.lane.b32.xlu0 %v4935_v33, %s6295_s26 }
 0x61d   :  { %v4944_v22 = vrot.slane %v4937_v49, %v6453_v19  ;;  %v4952_v51 = vrot.slane %v5730_v57, %v6453_v19  ;;  %v4960_v59 = vrot.slane %v4953_v16, %v6453_v19  ;;  %v4968_v43 = vrot.slane %v5731_v13, %v6453_v19 }
 0x61e   :  { %v4741_v58 = vrot.slane %v4733_v32, %v6453_v19  ;;  %v4301_v7 = vpop.f32.mrb[30].mxu0  ;;  %v4748_v38 = vrot.slane %v4734_v36, %v6453_v19 }
 0x61f   :  { %v4749_v18 = vcombine.low %v4155_v55, %v4301_v7  ;;  %v4750_v20 = vcombine.high %v4155_v55, %v4301_v7  ;;  %v6010_v0 = vpop.f32.mrb[31].mxu0  ;;  %v4969_v28 = vcombine.low %v4944_v22, %v4952_v51  ;;  %v4985_v12 = vcombine.low %v4960_v59, %v4968_v43 }
 0x620   :  { %5177 = vrot.lane.b32.xlu0 %v4936_v42, %s6296_s30  ;;  %v4970_v39 = vcombine.high %v4944_v22, %v4952_v51  ;;  %v4986_v46 = vcombine.high %v4960_v59, %v4968_v43 }
 0x621   :  { %v4757_v34 = vrot.slane %v4749_v18, %v6453_v19  ;;  %v4764_v8 = vrot.slane %v4750_v20, %v6453_v19  ;;  %v7391_v45 = vrot.slane %v4969_v28, %v6468_v25  ;;  %v7394_v1 = vrot.slane %v4985_v12, %v6468_v25 }
 0x622   :  { %v4984_v30 = vrot.slane %v4970_v39, %v6468_v25  ;;  %v5000_v35 = vrot.slane %v4986_v46, %v6468_v25 }
 0x623   :  { %v4765_v9 = vcombine.low %v4741_v58, %v4757_v34  ;;  %v4766_v2 = vcombine.high %v4741_v58, %v4757_v34  ;;  %v4781_v56 = vcombine.low %v4748_v38, %v4764_v8  ;;  %v4782_v41 = vcombine.high %v4748_v38, %v4764_v8 }
 0x624   :  { %v5002_v61 = vcombine.high %v7391_v45, %v7394_v1  ;;  %v5003_v3 = vcombine.low %v4984_v30, %v5000_v35  ;;  %v5004_v17 = vcombine.high %v4984_v30, %v5000_v35  ;;  %v5001_v62 = vcombine.low %v7391_v45, %v7394_v1 }
 0x625   :  { %v4773_v54 = vrot.slane %v4765_v9, %v6468_v25  ;;  %v4780_v53 = vrot.slane %v4766_v2, %v6468_v25  ;;  %v4789_v15 = vrot.slane %v4781_v56, %v6468_v25  ;;  %v4796_v55 = vrot.slane %v4782_v41, %v6468_v25 }
 0x626   :  { %5147 = vrot.lane.b32.xlu1 %v5002_v61, %s6294_s1 }
 0x627   :  { %v5005_v23 = vcombine.low %v4773_v54, %v4780_v53  ;;  %v5732_v33 = vcombine.high %v4773_v54, %v4780_v53  ;;  %v5021_v42 = vcombine.low %v4789_v15, %v4796_v55  ;;  %v5733_v21 = vcombine.high %v4789_v15, %v4796_v55 }
 0x629   :  { %v5012_v27 = vrot.slane %v5005_v23, %v6453_v19  ;;  %v5020_v14 = vrot.slane %v5732_v33, %v6453_v19  ;;  %v5028_v44 = vrot.slane %v5021_v42, %v6453_v19  ;;  %v5036_v26 = vrot.slane %v5733_v21, %v6453_v19 }
 0x62a   :  { %5163 = vrot.lane.b32.xlu1 %v5003_v3, %s6295_s26 }
 0x62b   :  { %v5037_v37 = vcombine.low %v5012_v27, %v5020_v14  ;;  %v5053_v4 = vcombine.low %v5028_v44, %v5036_v26  ;;  %v5038_v48 = vcombine.high %v5012_v27, %v5020_v14  ;;  %v5054_v40 = vcombine.high %v5028_v44, %v5036_v26 }
 0x62d   :  { %v7413_v52 = vrot.slane %v5037_v37, %v6468_v25  ;;  %v7416_v6 = vrot.slane %v5053_v4, %v6468_v25  ;;  %v5052_v50 = vrot.slane %v5038_v48, %v6468_v25  ;;  %v5068_v63 = vrot.slane %v5054_v40, %v6468_v25 }
 0x62e   :  { %5179 = vrot.lane.b32.xlu1 %v5004_v17, %s6296_s30 }
 0x62f   :  { %v5070_v29 = vcombine.high %v7413_v52, %v7416_v6  ;;  %v5071_v49 = vcombine.low %v5052_v50, %v5068_v63  ;;  %v5072_v57 = vcombine.high %v5052_v50, %v5068_v63  ;;  %v5069_v16 = vcombine.low %v7413_v52, %v7416_v6  ;;  %v5736_v52 = vld [vmem:[%s7615_s7] ss:$0 sm:$0xff]  ;;  %s6297_s7 = smov [#allocation2]  }
 0x630   :  { %s5638_s18 = sshll.u32 %s6297_s7, 4  ;;  %s5639_s18 = int_to_ptr.vmem [resolvable:$true] %s5638_s18 }
 0x631   :  { %5149 = vrot.lane.b32.xlu0 %v5070_v29, %s6294_s1  ;;  %p6265_p1 = scmp.lt.s32.totalorder %s5639_s18, %s5639_s18 }
 0x635   :  { %5165 = vrot.lane.b32.xlu0 %v5071_v49, %s6295_s26 }
 0x639   :  { %5181 = vrot.lane.b32.xlu0 %v5072_v57, %s6296_s30 }
 0x65e   :  { %v4374_v13 = vpop.f32.mrb[28].mxu1  ;;  %v4447_v60 = vpop.f32.mrb[32].mxu0 }
 0x65f   :  { %v6015_v32 = vpop.f32.mrb[29].mxu1  ;;  %v6020_v36 = vpop.f32.mrb[33].mxu0 }
 0x662   :  { %v4520_v22 = vpop.f32.mrb[30].mxu1  ;;  %v4593_v51 = vpop.f32.mrb[34].mxu0 }
 0x663   :  { %v4801_v59 = vcombine.low %v4374_v13, %v4520_v22  ;;  %v4802_v43 = vcombine.high %v4374_v13, %v4520_v22  ;;  %v4817_v5 = vcombine.low %v4447_v60, %v4593_v51  ;;  %v4818_v10 = vcombine.high %v4447_v60, %v4593_v51  ;;  %v6025_v58 = vpop.f32.mrb[31].mxu1  ;;  %v6030_v7 = vpop.f32.mrb[35].mxu0 }
 0x664   :  { %v6257_v7 = vld [vmem:[%s7608_s0] sm:$0xff] }
 0x665   :  { %v4809_v11 = vrot.slane %v4801_v59, %v6453_v19  ;;  %v4816_v18 = vrot.slane %v4802_v43, %v6453_v19  ;;  %v4825_v20 = vrot.slane %v4817_v5, %v6453_v19  ;;  %v4832_v0 = vrot.slane %v4818_v10, %v6453_v19  ;;  %v6256_v10 = vld [vmem:[%s7608_s0 + $0x8] sm:$0xff] }
 0x667   :  { %v4833_v28 = vcombine.low %v4809_v11, %v4825_v20  ;;  %v4834_v12 = vcombine.high %v4809_v11, %v4825_v20  ;;  %v4849_v38 = vcombine.low %v4816_v18, %v4832_v0  ;;  %v4850_v39 = vcombine.high %v4816_v18, %v4832_v0 }
 0x669   :  { %v4841_v46 = vrot.slane %v4833_v28, %v6468_v25  ;;  %v4848_v34 = vrot.slane %v4834_v12, %v6468_v25  ;;  %v4857_v8 = vrot.slane %v4849_v38, %v6468_v25  ;;  %v4864_v30 = vrot.slane %v4850_v39, %v6468_v25  ;;  %v6258_v39 = vld [vmem:[%s7608_s0 + $0x10] sm:$0xff] }
 0x66b   :  { %v5073_v35 = vcombine.low %v4841_v46, %v4848_v34  ;;  %v5734_v9 = vcombine.high %v4841_v46, %v4848_v34  ;;  %v5089_v2 = vcombine.low %v4857_v8, %v4864_v30  ;;  %v5735_v56 = vcombine.high %v4857_v8, %v4864_v30  ;;  %v6259_v34 = vld [vmem:[%s7608_s0 + $0x18] sm:$0xff] }
 0x66d   :  { %v5080_v41 = vrot.slane %v5073_v35, %v6453_v19  ;;  %v5088_v61 = vrot.slane %v5734_v9, %v6453_v19  ;;  %v5096_v3 = vrot.slane %v5089_v2, %v6453_v19  ;;  %v5104_v17 = vrot.slane %v5735_v56, %v6453_v19 }
 0x66f   :  { %v5105_v54 = vcombine.low %v5080_v41, %v5088_v61  ;;  %v5121_v53 = vcombine.low %v5096_v3, %v5104_v17  ;;  %v5106_v15 = vcombine.high %v5080_v41, %v5088_v61  ;;  %v5122_v55 = vcombine.high %v5096_v3, %v5104_v17 }
 0x671   :  { %v5113_v23 = vrot.slane %v5105_v54, %v6468_v25  ;;  %v5129_v33 = vrot.slane %v5121_v53, %v6468_v25  ;;  %v5120_v42 = vrot.slane %v5106_v15, %v6468_v25  ;;  %v5136_v21 = vrot.slane %v5122_v55, %v6468_v25  ;;  %v5389_v55 = vld [vmem:[%s7618_s10] sm:$0xff] }
 0x673   :  { %v5138_v27 = vcombine.high %v5113_v23, %v5129_v33  ;;  %v5139_v14 = vcombine.low %v5120_v42, %v5136_v21  ;;  %v5140_v44 = vcombine.high %v5120_v42, %v5136_v21  ;;  %v5137_v26 = vcombine.low %v5113_v23, %v5129_v33  ;;  %v5390_v23 = vld [vmem:[%s7618_s10 + $0x8] sm:$0xff]  ;;  %v5391_v33 = vld [vmem:[%s7618_s10 + $0x10] sm:$0xff]  ;;  %v5392_v21 = vld [vmem:[%s7618_s10 + $0x18] sm:$0xff] }
 0x674   :  { %v6113_v42 = vpack.c.bf16 %v5390_v23, %v5389_v55  ;;  %v5527_v23 = vld [vmem:[%s7620_s12 + $0x50] sm:$0xff] }
 0x675   :  { %5151 = vrot.lane.b32.xlu1 %v5138_v27, %s6294_s1  ;;  %v6117_v27 = vpack.c.bf16 %v5392_v21, %v5391_v33  ;;  %v5528_v33 = vld [vmem:[%s7620_s12 + $0x58] sm:$0xff]  ;;  %v5529_v21 = vld [vmem:[%s7620_s12 + $0x60] sm:$0xff] }
 0x676   :  { %6114 = vmatprep.subr.bf16.mxu0 %v6113_v42 }
 0x679   :  { %5167 = vrot.lane.b32.xlu1 %v5139_v14, %s6295_s26 }
 0x67d   :  { %5183 = vrot.lane.b32.xlu1 %v5140_v44, %s6296_s30 }
 0x68a   :  { %v5146_v19 = vpop.permute.xlu0 %5145 }
 0x68b   :  { %v5189_v4 = vsel %vm2018_vm2, %v4933_v31, %v5146_v19 }
 0x68e   :  { %v5162_v37 = vpop.permute.xlu0 %5161 }
 0x68f   :  { %v5194_v25 = vsel %vm5193_vm7, %v5189_v4, %v5162_v37 }
 0x692   :  { %v5178_v48 = vpop.permute.xlu0 %5177 }
 0x693   :  { %v5199_v40 = vsel %vm5198_vm8, %v5194_v25, %v5178_v48 }
 0x694   :  { %6039 = vmatprep.mubr.msk.f32.mxu0 %vm68_vm0, %v5199_v40 }
 0x698   :  { %v5148_v50 = vpop.permute.xlu1 %5147 }
 0x699   :  { %v5190_v29 = vsel %vm2018_vm2, %v5001_v62, %v5148_v50 }
 0x69c   :  { %v5164_v63 = vpop.permute.xlu1 %5163 }
 0x69d   :  { %v5195_v49 = vsel %vm5193_vm7, %v5190_v29, %v5164_v63  ;;  %v5517_v63 = vld [vmem:[%s7620_s12] sm:$0xff]  ;;  %v5518_v29 = vld [vmem:[%s7620_s12 + $0x8] sm:$0xff] }
 0x6a0   :  { %v5180_v57 = vpop.permute.xlu1 %5179 }
 0x6a1   :  { %v5200_v47 = vsel %vm5198_vm8, %v5195_v49, %v5180_v57  ;;  %v5519_v49 = vld [vmem:[%s7620_s12 + $0x10] sm:$0xff]  ;;  %v6121_v57 = vpack.c.bf16 %v5518_v29, %v5517_v63 }
 0x6a2   :  { %6040 = vmatmul.mubr.msk.f32.vlgmr.msra.gmra.mrb[36].mxu0 %vm68_vm0, %v5200_v47  ;;  %v5520_v47 = vld [vmem:[%s7620_s12 + $0x18] sm:$0xff] }
 0x6a3   :  { %v5150_v24 = vpop.permute.xlu0 %5149  ;;  %6116 = vmatpush3.bf16.msra.mxu0 %v6113_v42  ;;  %6122 = vmatprep.subr.bf16.mxu1 %v6121_v57  ;;  %v6141_v42 = vpack.c.bf16 %v5528_v33, %v5527_v23 }
 0x6a4   :  { %v5191_v13 = vsel %vm2018_vm2, %v5069_v16, %v5150_v24  ;;  %6118 = vmatprep.subr.bf16.mxu0 %v6117_v27  ;;  %v6125_v24 = vpack.c.bf16 %v5520_v47, %v5519_v49  ;;  %6124 = vmatpush3.bf16.msra.mxu1 %v6121_v57 }
 0x6a6   :  { %6126 = vmatprep.subr.bf16.mxu1 %v6125_v24 }
 0x6a7   :  { %v5166_v31 = vpop.permute.xlu0 %5165  ;;  %6120 = vmatpush3.bf16.msra.mxu0 %v6117_v27  ;;  %v5530_v27 = vld [vmem:[%s7620_s12 + $0x68] sm:$0xff] }
 0x6a8   :  { %v5196_v60 = vsel %vm5193_vm7, %v5191_v13, %v5166_v31  ;;  %v5521_v31 = vld [vmem:[%s7620_s12 + $0x20] sm:$0xff]  ;;  %v5522_v13 = vld [vmem:[%s7620_s12 + $0x28] sm:$0xff]  ;;  %6128 = vmatpush3.bf16.msra.mxu1 %v6125_v24 }
 0x6ab   :  { %v5182_v32 = vpop.permute.xlu0 %5181 }
 0x6ac   :  { %v5201_v45 = vsel %vm5198_vm8, %v5196_v60, %v5182_v32  ;;  %v6129_v60 = vpack.c.bf16 %v5522_v13, %v5521_v31 }
 0x6ad   :  { %6042 = vmatprep.mubr.msk.f32.mxu0 %vm68_vm0, %v5201_v45 }
 0x6ae   :  { %6130 = vmatprep.subr.bf16.mxu1 %v6129_v60 }
 0x6af   :  { %6132 = vmatpush3.bf16.msra.mxu1 %v6129_v60 }
 0x6e7   :  { %v5152_v1 = vpop.permute.xlu1 %5151 }
 0x6e8   :  { %v5192_v36 = vsel %vm2018_vm2, %v5137_v26, %v5152_v1 }
 0x6eb   :  { %v5168_v62 = vpop.permute.xlu1 %5167 }
 0x6ec   :  { %v5197_v22 = vsel %vm5193_vm7, %v5192_v36, %v5168_v62 }
 0x6ef   :  { %v5184_v51 = vpop.permute.xlu1 %5183 }
 0x6f0   :  { %v5202_v59 = vsel %vm5198_vm8, %v5197_v22, %v5184_v51 }
 0x6f1   :  { %6043 = vmatmul.mubr.msk.f32.gmra.mrb[38].mxu0 %vm68_vm0, %v5202_v59  ;;  %v5741_v59 = vld [vmem:[%s7616_s8] ss:$0 sm:$0xff] }
 0x775   :  { %v6041_v6 = vpop.f32.mrb[36].mxu0 }
 0x776   :  { %v5298_v16 = vadd.f32 %v6041_v6, %v5736_v52  ;;  %v5292_v43 = vpop.f32.mrb[37].mxu0 }
 0x777   :  { %v5293_v5 = vadd.f32 %v5736_v52, %v5292_v43  ;;  %v5742_v43 = vld [vmem:[%s7617_s9] ss:$0 sm:$0xff] }
 0x778   :  { %v7478_v58 = vadd.f32 %v6256_v10, %v5298_v16 }
 0x779   :  { %v7483_v11 = vadd.f32 %v6257_v7, %v5293_v5 }
 0x77a   :  { %v5320_v18 = vsel %vm68_vm0, %v7478_v58, 0.0 }
 0x77b   :  { %5321 = vadd.xlane.f32.xlu1 %v5320_v18  ;;  %v5317_v20 = vsel %vm68_vm0, %v7483_v11, 0.0 }
 0x77c   :  { %5318 = vadd.xlane.f32.xlu0 %v5317_v20 }
 0x7c4   :  { %v6044_v0 = vpop.f32.mrb[38].mxu0 }
 0x7c5   :  { %v5302_v28 = vpop.f32.mrb[39].mxu0  ;;  %v5308_v12 = vadd.f32 %v6044_v0, %v5736_v52 }
 0x7c6   :  { %v5303_v38 = vadd.f32 %v5736_v52, %v5302_v28 }
 0x7c7   :  { %v7497_v8 = vadd.f32 %v6259_v34, %v5308_v12 }
 0x7c8   :  { %v7492_v46 = vadd.f32 %v6258_v39, %v5303_v38 }
 0x7c9   :  { %v5326_v35 = vsel %vm68_vm0, %v7497_v8, 0.0 }
 0x7ca   :  { %v5323_v30 = vsel %vm68_vm0, %v7492_v46, 0.0 }
 0x7cb   :  { %5324 = vadd.xlane.f32.xlu0 %v5323_v30 }
 0x7cf   :  { %5327 = vadd.xlane.f32.xlu0 %v5326_v35 }
 0x808   :  { %v5322_v9 = vpop.xlane.xlu1 %5321 }
 0x809   :  { %v5330_v2 = vmul.f32 0.03125, %v5322_v9  ;;  %v5319_v56 = vpop.xlane.xlu0 %5318 }
 0x80a   :  { %v5329_v41 = vmul.f32 0.03125, %v5319_v56 }
 0x80b   :  { %v5334_v61 = vsub.f32 %v7478_v58, %v5330_v2 }
 0x80c   :  { %v5333_v3 = vsub.f32 %v7483_v11, %v5329_v41 }
 0x80d   :  { %v5338_v17 = vmul.f32 %v5334_v61, %v5334_v61 }
 0x80e   :  { %v5337_v54 = vmul.f32 %v5333_v3, %v5333_v3 }
 0x80f   :  { %v5344_v53 = vsel %vm68_vm0, %v5338_v17, 0.0  ;;  %v5524_v17 = vld [vmem:[%s7620_s12 + $0x38] sm:$0xff] }
 0x810   :  { %5345 = vadd.xlane.f32.xlu1 %v5344_v53  ;;  %v5341_v15 = vsel %vm68_vm0, %v5337_v54, 0.0  ;;  %v5525_v53 = vld [vmem:[%s7620_s12 + $0x40] sm:$0xff] }
 0x811   :  { %5342 = vadd.xlane.f32.xlu0 %v5341_v15  ;;  %v5526_v15 = vld [vmem:[%s7620_s12 + $0x48] sm:$0xff] }
 0x812   :  { %v6137_v55 = vpack.c.bf16 %v5526_v15, %v5525_v53 }
 0x858   :  { %v5325_v14 = vpop.xlane.xlu0 %5324 }
 0x859   :  { %v5331_v44 = vmul.f32 0.03125, %v5325_v14  ;;  %v5531_v14 = vld [vmem:[%s7620_s12 + $0x70] sm:$0xff] }
 0x85b   :  { %v5335_v26 = vsub.f32 %v7492_v46, %v5331_v44  ;;  %v6145_v44 = vpack.c.bf16 %v5530_v27, %v5529_v21 }
 0x85c   :  { %v5328_v19 = vpop.xlane.xlu0 %5327 }
 0x85d   :  { %v5332_v37 = vmul.f32 0.03125, %v5328_v19  ;;  %v5339_v4 = vmul.f32 %v5335_v26, %v5335_v26 }
 0x85f   :  { %v5336_v25 = vsub.f32 %v7497_v8, %v5332_v37  ;;  %v5347_v48 = vsel %vm68_vm0, %v5339_v4, 0.0  ;;  %v5743_v37 = vld [vmem:[%s7619_s11] ss:$0 sm:$0xff] }
 0x860   :  { %5348 = vadd.xlane.f32.xlu0 %v5347_v48 }
 0x861   :  { %v5340_v40 = vmul.f32 %v5336_v25, %v5336_v25 }
 0x863   :  { %v5350_v50 = vsel %vm68_vm0, %v5340_v40, 0.0 }
 0x864   :  { %5351 = vadd.xlane.f32.xlu1 %v5350_v50 }
 0x89d   :  { %v5346_v32 = vpop.xlane.xlu1 %5345 }
 0x89e   :  { %v5354_v45 = vmul.f32 0.03125, %v5346_v32  ;;  %v5343_v1 = vpop.xlane.xlu0 %5342 }
 0x89f   :  { %v5353_v62 = vmul.f32 0.03125, %v5343_v1 }
 0x8a0   :  { %v5358_v36 = vadd.f32 1e-05, %v5354_v45 }
 0x8a1   :  { %v5357_v22 = vadd.f32 1e-05, %v5353_v62 }
 0x8a2   :  { %6240 = vrsqrt.f32 %v5358_v36 }
 0x8a3   :  { %6242 = vrsqrt.f32 %v5357_v22 }
 0x8ac   :  { %v6241_v51 = vpop.eup %6240 }
 0x8ad   :  { %v6243_v52 = vpop.eup %6242  ;;  %v5366_v6 = vmul.f32 %v6241_v51, %v5334_v61 }
 0x8ae   :  { %v5365_v16 = vmul.f32 %v6243_v52, %v5333_v3  ;;  %v5523_v3 = vld [vmem:[%s7620_s12 + $0x30] sm:$0xff] }
 0x8af   :  { %v5376_v5 = vmul.f32 %v5741_v59, %v5366_v6  ;;  %v6133_v54 = vpack.c.bf16 %v5524_v17, %v5523_v3 }
 0x8b0   :  { %v5375_v10 = vmul.f32 %v5741_v59, %v5365_v16 }
 0x8b1   :  { %v5386_v18 = vadd.f32 %v5742_v43, %v5376_v5  ;;  %6134 = vmatprep.subr.bf16.mxu1 %v6133_v54 }
 0x8b2   :  { %v5385_v7 = vadd.f32 %v5742_v43, %v5375_v10  ;;  %6136 = vmatpush3.bf16.msra.mxu1 %v6133_v54 }
 0x8b3   :  { %6138 = vmatprep.subr.bf16.mxu1 %v6137_v55 }
 0x8b4   :  { %6053 = vmatprep.mubr.msk.f32.mxu0 %vm68_vm0, %v5385_v7  ;;  %v5748_v7 = vld [vmem:[%s7621_s13] ss:$0 sm:$0xff]  ;;  %s6260_s13 = scalar_lea.vmem %s5639_s18, 512 }
 0x8b5   :  { %6054 = vmatmul.mubr.msk.f32.vlgmr.msra.gmra.mrb[40].mxu0 %vm68_vm0, %v5386_v18  ;;  %p6261_p0 = scmp.ne.s32.totalorder %s5639_s18, %s6260_s13  ;;  %p6266_p2 = scmp.lt.s32.totalorder %s6260_s13, %s6260_s13 }
 0x8b6   :  { %6140 = vmatpush3.bf16.msra.mxu1 %v6137_v55 }
 0x8b7   :  { %6142 = vmatprep.subr.bf16.mxu1 %v6141_v42  ;;  %p6267_p3 = por %p6266_p2, %p6265_p1 }
 0x8b9   :  { %p6268_p4 = pnand %p6267_p3, %p6261_p0 }
 0x8ba   :  { %6144 = vmatpush3.bf16.msra.mxu1 %v6141_v42 }
 0x8bb   :  { %6146 = vmatprep.subr.bf16.mxu1 %v6145_v44 }
 0x8be   :  { %6148 = vmatpush3.bf16.msra.mxu1 %v6145_v44 }
 0x8ed   :  { %v5349_v20 = vpop.xlane.xlu0 %5348 }
 0x8ee   :  { %v5355_v0 = vmul.f32 0.03125, %v5349_v20 }
 0x8f0   :  { %v5359_v28 = vadd.f32 1e-05, %v5355_v0 }
 0x8f1   :  { %v5352_v12 = vpop.xlane.xlu1 %5351 }
 0x8f2   :  { %6244 = vrsqrt.f32 %v5359_v28  ;;  %v5356_v38 = vmul.f32 0.03125, %v5352_v12 }
 0x8f4   :  { %v5360_v39 = vadd.f32 1e-05, %v5356_v38 }
 0x8f6   :  { %6246 = vrsqrt.f32 %v5360_v39 }
 0x8fc   :  { %v6245_v34 = vpop.eup %6244 }
 0x8fd   :  { %v5367_v30 = vmul.f32 %v6245_v34, %v5335_v26  ;;  %v5532_v26 = vld [vmem:[%s7620_s12 + $0x78] sm:$0xff] }
 0x8fe   :  { %v6149_v19 = vpack.c.bf16 %v5532_v26, %v5531_v14 }
 0x8ff   :  { %v5377_v35 = vmul.f32 %v5741_v59, %v5367_v30 }
 0x900   :  { %v6247_v9 = vpop.eup %6246  ;;  %6150 = vmatprep.subr.bf16.mxu1 %v6149_v19 }
 0x901   :  { %v5387_v2 = vadd.f32 %v5742_v43, %v5377_v35  ;;  %v5368_v56 = vmul.f32 %v6247_v9, %v5336_v25  ;;  %6152 = vmatpush3.bf16.msra.mxu1 %v6149_v19 }
 0x903   :  { %6056 = vmatprep.mubr.msk.f32.mxu0 %vm68_vm0, %v5387_v2  ;;  %v5378_v41 = vmul.f32 %v5741_v59, %v5368_v56 }
 0x905   :  { %v5388_v61 = vadd.f32 %v5742_v43, %v5378_v41 }
 0x907   :  { %6057 = vmatmul.mubr.msk.f32.gmra.mrb[42].mxu0 %vm68_vm0, %v5388_v61 }
 0x988   :  { %v6055_v4 = vpop.f32.mrb[40].mxu0 }
 0x989   :  { %v5484_v25 = vadd.f32 %v6055_v4, %v5743_v37  ;;  %v5478_v48 = vpop.f32.mrb[41].mxu0 }
 0x98a   :  { %v5479_v40 = vadd.f32 %v5743_v37, %v5478_v48 }
 0x98b   :  { %v5502_v50 = vmul.f32 0.70710677, %v5484_v25  ;;  %v5498_v31 = vmul.f32 0.5, %v5484_v25 }
 0x98c   :  { %v5501_v63 = vmul.f32 0.70710677, %v5479_v40  ;;  %v5497_v47 = vmul.f32 0.5, %v5479_v40 }
 0x98d   :  { %6248 = verf.f32 %v5502_v50 }
 0x98e   :  { %6250 = verf.f32 %v5501_v63 }
 0x997   :  { %v6249_v29 = vpop.eup %6248 }
 0x998   :  { %v6251_v49 = vpop.eup %6250  ;;  %v5510_v57 = vadd.f32 1.0, %v6249_v29 }
 0x999   :  { %v5509_v24 = vadd.f32 1.0, %v6251_v49 }
 0x99a   :  { %v5514_v60 = vmul.f32 %v5510_v57, %v5498_v31 }
 0x99b   :  { %v5513_v13 = vmul.f32 %v5509_v24, %v5497_v47 }
 0x99d   :  { %6091 = vmatprep.mubr.f32.mxu1 %v5513_v13 }
 0x99e   :  { %6092 = vmatmul.mubr.f32.vlgmr.msra.gmra.mrb[32].mxu1 %v5514_v60 }
 0x9da   :  { %v6058_v32 = vpop.f32.mrb[42].mxu0 }
 0x9db   :  { %v5494_v45 = vadd.f32 %v6058_v32, %v5743_v37  ;;  %v5488_v1 = vpop.f32.mrb[43].mxu0 }
 0x9dc   :  { %v5489_v62 = vadd.f32 %v5743_v37, %v5488_v1 }
 0x9dd   :  { %v5504_v36 = vmul.f32 0.70710677, %v5494_v45  ;;  %v5500_v43 = vmul.f32 0.5, %v5494_v45 }
 0x9de   :  { %v5503_v22 = vmul.f32 0.70710677, %v5489_v62  ;;  %v5499_v6 = vmul.f32 0.5, %v5489_v62 }
 0x9df   :  { %6252 = verf.f32 %v5504_v36 }
 0x9e0   :  { %6254 = verf.f32 %v5503_v22 }
 0x9e9   :  { %v6253_v51 = vpop.eup %6252 }
 0x9ea   :  { %v6255_v59 = vpop.eup %6254  ;;  %v5512_v52 = vadd.f32 1.0, %v6253_v51 }
 0x9eb   :  { %v5511_v16 = vadd.f32 1.0, %v6255_v59 }
 0x9ec   :  { %v5516_v10 = vmul.f32 %v5512_v52, %v5500_v43 }
 0x9ed   :  { %v5515_v5 = vmul.f32 %v5511_v16, %v5499_v6 }
 0x9ef   :  { %6094 = vmatprep.mubr.f32.mxu1 %v5515_v5 }
 0x9f0   :  { %6095 = vmatmul.mubr.f32.gmra.mrb[34].mxu1 %v5516_v10 }
 0xa71   :  { %v6093_v18 = vpop.f32.mrb[32].mxu1 }
 0xa72   :  { %v5612_v20 = vadd.f32 %v6093_v18, %v5748_v7  ;;  %v5606_v0 = vpop.f32.mrb[33].mxu1 }
 0xa73   :  { %v5607_v28 = vadd.f32 %v5748_v7, %v5606_v0 }
 0xa74   :  { %v5626_v12 = vadd.f32 %v5612_v20, %v7478_v58 }
 0xa75   :  { %v5625_v38 = vadd.f32 %v5607_v28, %v7483_v11 }
 0xa76   :  { %5630 = vst.msk [vmem:[#allocation2 + $0x8] sm:$0xff] %vm68_vm0, %v5626_v12 }
 0xa77   :  { %5629 = vst.msk [vmem:[#allocation2] sm:$0xff] %vm68_vm0, %v5625_v38 }
 0xac3   :  { %v6096_v39 = vpop.f32.mrb[34].mxu1 }
 0xac4   :  { %v5622_v34 = vadd.f32 %v6096_v39, %v5748_v7  ;;  %v5616_v30 = vpop.f32.mrb[35].mxu1 }
 0xac5   :  { %v5617_v35 = vadd.f32 %v5748_v7, %v5616_v30 }
 0xac6   :  { %v5628_v9 = vadd.f32 %v5622_v34, %v7497_v8 }
 0xac7   :  { %v5627_v2 = vadd.f32 %v5617_v35, %v7492_v46 }
 0xac8   :  { %5632 = vst.msk [vmem:[#allocation2 + $0x18] sm:$0xff] %vm68_vm0, %v5628_v9 }
 0xac9   :  { %5631 = vst.msk [vmem:[#allocation2 + $0x10] sm:$0xff] %vm68_vm0, %v5627_v2 }
 0xaca   :  { %6271 = shalt.err (!%p6268_p4)
}
 0xacb   :  { %s6272_s8 = scalar_lea.hbm %s7622_s14, 512 }
 0xacc   :  { %p6273_p5 = scmp.ne.s32.totalorder %s7622_s14, %s6272_s8  ;;  %p6276_p6 = scmp.lt.u32.totalorder %s6272_s8, %s7622_s14 }
 0xace   :  { %p6278_p7 = pnand %p6276_p6, %p6273_p5 }
 0xad0   :  { %6281 = shalt.err (!%p6278_p7)
}
 0xad1   :  { %s6298_s22 = smov 128  }
 0xad2   :  { %5644 = dma.vmem_to_hbm [thread:$0]  %s5639_s18, 512, %s7622_s14, [#allocation3], %s6298_s22, %s6298_s22, %s6294_s1  }
 0xad3   :  { %6282 = dma.done.wait [#allocation3], 512  }
 0xad4   :  { %6283 = vsyncadd [#allocation3], 4294966784 }
 0xad5   :  { %5648 = vsyncpa [#allocation3], 1 }

// kernel: tpu_custom_call.1
= control target key start
LH: loop header
LB: loop body
LE: loop exit
PB: predicated region body
PF: predicated region fallthrough
CT: control target
= control target key end

     0   :  { %s2438_s0 = inlined_call_operand.vmem [shape: f32[4,8,32], index: 0, kind: input, shape index: {}]   ;;  %s2439_s1 = inlined_call_operand.vmem [shape: s32[1,8], index: 1, kind: input, shape index: {}]   ;;  %s2440_s2 = inlined_call_operand.vmem [shape: f32[1,32], index: 2, kind: input, shape index: {}]   ;;  %s2441_s3 = inlined_call_operand.vmem [shape: f32[1,32], index: 3, kind: input, shape index: {}]   ;;  %s2442_s4 = inlined_call_operand.vmem [shape: f32[32,96], index: 4, kind: input, shape index: {}]   ;;  %s2443_s5 = inlined_call_operand.vmem [shape: f32[1,96], index: 5, kind: input, shape index: {}]   ;;  %s2444_s6 = inlined_call_operand.vmem [shape: f32[32,32], index: 6, kind: input, shape index: {}]   ;;  %s2445_s7 = inlined_call_operand.vmem [shape: f32[1,32], index: 7, kind: input, shape index: {}]   ;;  %s2446_s8 = inlined_call_operand.vmem [shape: f32[1,32], index: 8, kind: input, shape index: {}]   ;;  %s2447_s9 = inlined_call_operand.vmem [shape: f32[1,32], index: 9, kind: input, shape index: {}]   ;;  %s2448_s10 = inlined_call_operand.vmem [shape: f32[32,128], index: 10, kind: input, shape index: {}]   ;;  %s2449_s11 = inlined_call_operand.vmem [shape: f32[1,128], index: 11, kind: input, shape index: {}]   ;;  %s2450_s12 = inlined_call_operand.vmem [shape: f32[128,32], index: 12, kind: input, shape index: {}]   ;;  %s2451_s13 = inlined_call_operand.vmem [shape: f32[1,32], index: 13, kind: input, shape index: {}]   ;;  %s2452_s14 = inlined_call_operand.hbm [shape: f32[4,8,32], index: 14, kind: output, shape index: {}]  }
   0x1   :  { %2453 = sst [smem:[#allocation5_spill]] %s2438_s0 }
   0x2   :  { %2454 = sst [smem:[#allocation6_spill]] %s2439_s1 }
   0x3   :  { %2455 = sst [smem:[#allocation7_spill]] %s2440_s2 }
   0x4   :  { %2456 = sst [smem:[#allocation8_spill]] %s2441_s3 }
   0x5   :  { %19 = vsyncpa [#allocation3], 0 }
   0x6   :  { %21 = vsyncpa [#allocation3 + $0x1], 0  ;;  %s2103_s29 = smov 0   ;;  %s2105_s30 = smov 0  }
   0x7   :  { %s2107_s15 = smov 0   ;;  %s2109_s16 = smov 0  }
   0x8 LB: > { %s2124_s17 = sadd.s32 4294967295, %s2013_s16   ;;  %s1647_s18 = sadd.s32 4294967294, %s2013_s16   ;;  %s2013_s16 = sphi %s2109_s16, %s2468_s16   ;;  %s2009_s15 = sphi %s2107_s15, %s2467_s15   ;;  %s2005_s30 = sphi %s2105_s30, %s2466_s30   ;;  %s2001_s29 = sphi %s2103_s29, %s2465_s29  }
   0x9   : > { %s2128_s19 = sadd.s32 1, %s2013_s16   ;;  %s333_s20 = sadd.s32 1, %s2009_s15 }
   0xa   : > { %s330_s21 = ssub.s32 %s2013_s16, %s2128_s19  ;;  %p343_p0 = scmp.ne.s32.totalorder %s2009_s15, %s2005_s30 }
   0xb   : > { %p331_p1 = scmp.eq.s32.totalorder %s330_s21, 0  ;;  %p344_p2 = scmp.eq.s32.totalorder %s2124_s17, 3 }
   0xc   : > { %p349_p3 = scmp.ne.s32.totalorder %s2005_s30, %s2001_s29  ;;  %p350_p4 = scmp.eq.s32.totalorder %s1647_s18, 3 }
   0xd   : > { %s2139_s22 = scalar_select %p331_p1, %s2009_s15, %s333_s20  }
   0xe   : > { %p2141_p5 = por %p344_p2, %p343_p0  ;;  %p2145_p6 = por %p350_p4, %p349_p3 }
   0xf   : > { %p1650_p7 = scmp.ge.s32.totalorder %s2013_s16, 1  ;;  %p414_p8 = scmp.lt.s32.totalorder %s2013_s16, 5 }
  0x11   : > { %p415_p9 = pnand %p1650_p7, %p414_p8 }
  0x12   : > { %p459_p10 = scmp.lt.s32.totalorder (!%p415_p9), %s2124_s17, 3  ;;  %vm480_vm0 = vcmask (!%p415_p9), 261120   ;;  %s2459_s0 = sld [smem:[#allocation5_spill]] (!%p415_p9)  ;;  %v509_v7 = vld [vmem:[%s2442_s4] sm:$0xff] (!%p415_p9)  ;;  %v510_v8 = vld [vmem:[%s2442_s4 + $0x8] sm:$0xff] (!%p415_p9)  ;;  %v511_v9 = vld [vmem:[%s2442_s4 + $0x10] sm:$0xff] (!%p415_p9)  ;;  %v464_v35 = vlaneseq (!%p415_p9) }
  0x13   : > { %418 = sbr.rel (%p415_p9) target bundleno = 2644 (0xa54), region = 76  ;;  %v2015_v10 = vmov (!%p415_p9), 0.0|0.0   ;;  %v1837_v11 = vpack.c.bf16 (!%p415_p9), %v510_v8, %v509_v7  ;;  %v512_v12 = vld [vmem:[%s2442_s4 + $0x18] sm:$0xff] (!%p415_p9)  ;;  %vm2016_vm1 = vmmov (!%p415_p9), 0   ;;  %v2017_v13 = vmov (!%p415_p9), 0.0   ;;  %s2460_s2 = sld [smem:[#allocation7_spill]] (!%p415_p9) }
  0x14   : > { %1836 = vmatprep.subr.bf16.mxu1 (!%p415_p9), %v2015_v10  ;;  %1736 = vmatprep.mubr.msk.f32.mxu1 (!%p415_p9), %vm2016_vm1, %v2017_v13  ;;  %v1840_v14 = vpack.c.bf16 (!%p415_p9), %v512_v12, %v511_v9  ;;  %s2461_s3 = sld [smem:[#allocation8_spill]] (!%p415_p9)  ;;  %v1655_v24 = vld [vmem:[%s2443_s5] ss:$0 sm:$0xff] (!%p415_p9)  ;;  %s2018_s28 = smov (!%p415_p9), 104   ;;  %vm602_vm2 = vcmask (!%p415_p9), 64512   ;;  %v465_v37 = vshrl.u32 (!%p415_p9), %v464_v35, 7 }
  0x15   : > { %1749 = vmatprep.subr.mxu0 (!%p415_p9), %v2017_v13  ;;  %1751 = vmatprep.mubr.msk.f32.mxu0 (!%p415_p9), %vm2016_vm1, %v2017_v13  ;;  %s2021_s20 = smov (!%p415_p9), 96   ;;  %s2462_s1 = sld [smem:[#allocation6_spill]] (!%p415_p9)  ;;  %v2022_v39 = vmov (!%p415_p9), 0   ;;  %v467_v41 = vand.u32 (!%p415_p9), 127, %v464_v35  ;;  %vm1272_vm7 = vcmask (!%p415_p9), 130048   ;;  %vm1274_vm8 = vcmask (!%p415_p9), 195584  }
  0x16   : > { %1838 = vmatpush3.bf16.msra.mxu1 (!%p415_p9), %v1837_v11  ;;  %v474_v38 = vsub.s32 (!%p415_p9), 0, %v465_v37  ;;  %s2024_s27 = smov (!%p415_p9), 8  }
  0x17   : > { %1839 = vmatprep.subr.bf16.mxu1 (!%p415_p9), %v2015_v10  ;;  %vm468_vm4 = vcmp.ge.s32.totalorder (!%p415_p9), %v465_v37, %v467_v41  ;;  %v1276_v37 = vld [vmem:[%s2444_s6] sm:$0xff] (!%p415_p9)  ;;  %v1279_v41 = vld [vmem:[%s2444_s6 + $0x18] sm:$0xff] (!%p415_p9) }
  0x19   : > { %v1653_v19 = vld [vmem:[%s2460_s2] ss:$0 sm:$0xff] (!%p415_p9) }
  0x1a   : > { %s460_s25 = scalar_select %p459_p10, %s2124_s17, 3  ;;  %1841 = vmatpush3.bf16.msra.mxu1 %v1840_v14  ;;  %v1654_v21 = vld [vmem:[%s2461_s3] ss:$0 sm:$0xff] }
  0x1b   : > { %1739 = vmatprep.subr.mxu1 %v2017_v13  ;;  %v469_v36 = vld [vmem:[%s2462_s1] sm:$0x1]  ;;  %s1677_s1 = sshll.u32 %s2124_s17, 7 }
  0x1c   : > { %s1652_s26 = sshll.u32 %s460_s25, 3  ;;  %vm470_vm3 = vcmp.ne.s32.totalorder %v469_v36, 0 }
  0x1d   : > { %s462_s18 = scalar_lea.vmem %s2459_s0, %s1652_s26  ;;  %s2020_s0 = smov 112   ;;  %v471_v40 = vsel %vm470_vm3, 1, %v2022_v39 }
  0x1e   : > { %v2156_v0 = vld [vmem:[%s462_s18] sm:$0xff]  ;;  %s2019_s18 = smov 120   ;;  %v475_v42 = vrot.slane %v471_v40, %v474_v38  ;;  %s2023_s26 = smov 64   ;;  %v1277_v38 = vld [vmem:[%s2444_s6 + $0x8] sm:$0xff]  ;;  %v1278_v40 = vld [vmem:[%s2444_s6 + $0x10] sm:$0xff] }
  0x1f   : > { %v481_v1 = vsel %vm480_vm0, %v2156_v0, 0.0  ;;  %v1843_v39 = vpack.c.bf16 %v1277_v38, %v1276_v37  ;;  %v1492_v37 = vld [vmem:[%s2450_s12 + $0x68] sm:$0xff] }
  0x20   : > { %482 = vadd.xlane.f32.xlu0 %v481_v1  ;;  %vm476_vm5 = vcmp.eq.s32.totalorder %v475_v42, 1  ;;  %v1846_v42 = vpack.c.bf16 %v1279_v41, %v1278_v40  ;;  %v1494_v40 = vld [vmem:[%s2450_s12 + $0x78] sm:$0xff] }
  0x21   : > { %vm2236_vm6 = vmand %vm468_vm4, %vm476_vm5 }
  0xad   : > { %v483_v2 = vpop.xlane.xlu0 %482 }
  0xae   : > { %v485_v3 = vmul.f32 0.03125, %v483_v2 }
  0xb0   : > { %v486_v4 = vsub.f32 %v2156_v0, %v485_v3 }
  0xb2   : > { %v487_v5 = vmul.f32 %v486_v4, %v486_v4 }
  0xb4   : > { %v488_v6 = vsel %vm480_vm0, %v487_v5, 0.0 }
  0xb5   : > { %489 = vadd.xlane.f32.xlu0 %v488_v6 }
 0x142   : > { %v490_v15 = vpop.xlane.xlu0 %489 }
 0x143   : > { %v491_v16 = vmul.f32 0.03125, %v490_v15 }
 0x145   : > { %v492_v17 = vadd.f32 1e-05, %v491_v16 }
 0x147   : > { %1929 = vrsqrt.f32 %v492_v17 }
 0x151   : > { %v1930_v18 = vpop.eup %1929 }
 0x152   : > { %v494_v20 = vmul.f32 %v1930_v18, %v486_v4 }
 0x154   : > { %v501_v22 = vmul.f32 %v1653_v19, %v494_v20 }
 0x156   : > { %v508_v23 = vadd.f32 %v1654_v21, %v501_v22 }
 0x158   : > { %1737 = vmatmul.mubr.msk.f32.vlgmr.msra.gmra.mrb[0].mxu1 %vm480_vm0, %v508_v23 }
 0x159   : > { %1741 = vmatprep.mubr.msk.f32.mxu1 %vm2016_vm1, %v2017_v13 }
 0x22b   : > { %v589_v25 = vpop.f32.mrb[0].mxu1 }
 0x22c   : > { %v2194_v26 = vadd.f32 %v1655_v24, %v589_v25  ;;  %v1738_v27 = vpop.f32.mrb[1].mxu1 }
 0x22e   : > { %598 = vrot.lane.b32.xlu0 %v2194_v26, %s2018_s28  ;;  %594 = vrot.lane.b32.xlu1 %v2194_v26, %s2019_s18  ;;  %s2025_s28 = smov 16   ;;  %s2026_s18 = smov 24  }
 0x232   : > { %596 = vrot.lane.b32.xlu1 %v2194_v26, %s2020_s0  ;;  %s456_s0 = sand.u32 1, %s2005_s30  }
 0x233   : > { %s1575_s21 = scalar_lea.sflag [#allocation3], %s456_s0 }
 0x236   : > { %600 = vrot.lane.b32.xlu1 %v2194_v26, %s2021_s20 }
 0x2a0   : > { %v2200_v28 = vpop.permute.xlu1 %594  ;;  %v2206_v30 = vpop.permute.xlu0 %598 }
 0x2a1   : > { %677 = vrot.lane.b32.xlu1 %v2200_v28, %s2021_s20 }
 0x2a4   : > { %v2203_v29 = vpop.permute.xlu1 %596 }
 0x2a5   : > { %753 = vrot.lane.b32.xlu1 %v2203_v29, %s2021_s20 }
 0x2a8   : > { %v601_v31 = vpop.permute.xlu1 %600 }
 0x2a9   : > { %829 = vrot.lane.b32.xlu1 %v2206_v30, %s2021_s20  ;;  %1740 = vmatpush3.xpose.msk.msra.mxu1 %vm602_vm2, %v601_v31  ;;  %s1651_s20 = sshll.u32 %s456_s0, 3 }
 0x2aa   : > { %1744 = vmatprep.subr.mxu1 %v2017_v13  ;;  %s458_s2 = scalar_lea.vmem [#allocation2], %s1651_s20  ;;  %s2027_s20 = smov [#allocation2]  }
 0x2ab   : > { %s1955_s25 = sshll.u32 %s2027_s20, 4  ;;  %s1956_s25 = int_to_ptr.vmem [resolvable:$false] %s1955_s25 }
 0x2ac   : > { %1742 = vmatmul.mubr.msk.f32.vlgmr.msra.gmra.mrb[2].mxu1 %vm602_vm2, %v2194_v26  ;;  %s1957_s3 = scalar_lea.vmem %s1956_s25, 256 }
 0x2ad   : > { %1746 = vmatprep.mubr.msk.f32.mxu1 %vm2016_vm1, %v2017_v13 }
 0x313   : > { %v678_v32 = vpop.permute.xlu1 %677 }
 0x314   : > { %1745 = vmatpush3.xpose.msk.msra.mxu1 %vm602_vm2, %v678_v32 }
 0x315   : > { %1754 = vmatprep.subr.mxu1 %v2017_v13 }
 0x317   : > { %1747 = vmatmul.mubr.msk.f32.vlgmr.msra.gmra.mrb[4].mxu1 %vm602_vm2, %v2200_v28  ;;  %v754_v33 = vpop.permute.xlu1 %753 }
 0x318   : > { %1750 = vmatpush3.xpose.msk.msra.mxu0 %vm602_vm2, %v754_v33  ;;  %1756 = vmatprep.mubr.msk.f32.mxu1 %vm2016_vm1, %v2017_v13 }
 0x319   : > { %1759 = vmatprep.subr.mxu0 %v2017_v13 }
 0x31b   : > { %1752 = vmatmul.mubr.msk.f32.vlgmr.msra.gmra.mrb[0].mxu0 %vm602_vm2, %v2203_v29  ;;  %v830_v34 = vpop.permute.xlu1 %829 }
 0x31c   : > { %1755 = vmatpush3.xpose.msk.msra.mxu1 %vm602_vm2, %v830_v34  ;;  %1761 = vmatprep.mubr.msk.f32.mxu0 %vm2016_vm1, %v2017_v13 }
 0x31d   : > { %1764 = vmatprep.subr.mxu1 %v2017_v13 }
 0x31f   : > { %1757 = vmatmul.mubr.msk.f32.vlgmr.msra.gmra.mrb[6].mxu1 %vm602_vm2, %v2206_v30 }
 0x320   : > { %1766 = vmatprep.mubr.msk.f32.mxu1 %vm2016_vm1, %v2017_v13 }
 0x37f   : > { %v673_v44 = vpop.f32.mrb[2].mxu1 }
 0x380   : > { %v907_v45 = vsel %vm2236_vm6, %v673_v44, -3.4028235e+38  ;;  %v1743_v46 = vpop.f32.mrb[3].mxu1 }
 0x381   : > { %v911_v47 = vsel %vm602_vm2, %v907_v45, -inf }
 0x382   : > { %912 = vmax.xlane.f32.xlu1 %v911_v47 }
 0x3ea   : > { %v749_v48 = vpop.f32.mrb[4].mxu1 }
 0x3eb   : > { %v908_v49 = vsel %vm2236_vm6, %v749_v48, -3.4028235e+38  ;;  %v1748_v50 = vpop.f32.mrb[5].mxu1 }
 0x3ec   : > { %v914_v51 = vsel %vm602_vm2, %v908_v49, -inf }
 0x3ed   : > { %915 = vmax.xlane.f32.xlu0 %v914_v51 }
 0x3ee   : > { %v825_v52 = vpop.f32.mrb[0].mxu0 }
 0x3ef   : > { %v909_v53 = vsel %vm2236_vm6, %v825_v52, -3.4028235e+38  ;;  %v1753_v54 = vpop.f32.mrb[1].mxu0 }
 0x3f0   : > { %v917_v55 = vsel %vm602_vm2, %v909_v53, -inf }
 0x3f1   : > { %918 = vmax.xlane.f32.xlu1 %v917_v55  ;;  %v1669_v55 = vld [vmem:[%s2445_s7] ss:$0 sm:$0xff] }
 0x3f2   : > { %v901_v56 = vpop.f32.mrb[6].mxu1 }
 0x3f3   : > { %v910_v57 = vsel %vm2236_vm6, %v901_v56, -3.4028235e+38  ;;  %v1758_v58 = vpop.f32.mrb[7].mxu1 }
 0x3f4   : > { %v920_v59 = vsel %vm602_vm2, %v910_v57, -inf }
 0x3f5   : > { %921 = vmax.xlane.f32.xlu0 %v920_v59 }
 0x402   : > { %955 = vrot.lane.b32.xlu1 %v2194_v26, %s2023_s26 }
 0x40f   : > { %v913_v60 = vpop.xlane.xlu1 %912 }
 0x410   : > { %v923_v61 = vsub.f32 %v907_v45, %v913_v60 }
 0x412   : > { %v927_v62 = vmul.f32 1.442695, %v923_v61 }
 0x414   : > { %1931 = vpow2.f32 %v927_v62 }
 0x41e   : > { %v1932_v63 = vpop.eup %1931 }
 0x41f   : > { %v935_v1 = vsel %vm602_vm2, %v1932_v63, 0.0 }
 0x426   : > { %936 = vadd.xlane.f32.xlu1 %v935_v1 }
 0x47a   : > { %v916_v2 = vpop.xlane.xlu0 %915 }
 0x47b   : > { %v924_v3 = vsub.f32 %v908_v49, %v916_v2  ;;  %v1390_v2 = vld [vmem:[%s2448_s10] sm:$0xff] }
 0x47d   : > { %v929_v4 = vmul.f32 1.442695, %v924_v3 }
 0x47e   : > { %v919_v5 = vpop.xlane.xlu1 %918 }
 0x47f   : > { %1933 = vpow2.f32 %v929_v4  ;;  %v925_v6 = vsub.f32 %v909_v53, %v919_v5  ;;  %v1392_v4 = vld [vmem:[%s2448_s10 + $0x10] sm:$0xff]  ;;  %v1393_v5 = vld [vmem:[%s2448_s10 + $0x18] sm:$0xff] }
 0x481   : > { %v931_v7 = vmul.f32 1.442695, %v925_v6  ;;  %v1852_v6 = vpack.c.bf16 %v1393_v5, %v1392_v4 }
 0x482   : > { %v956_v8 = vpop.permute.xlu1 %955  ;;  %v922_v9 = vpop.xlane.xlu0 %921 }
 0x483   : > { %1935 = vpow2.f32 %v931_v7  ;;  %v926_v11 = vsub.f32 %v910_v57, %v922_v9  ;;  %1760 = vmatpush3.msra.mxu0 %v956_v8  ;;  %v1479_v7 = vld [vmem:[%s2450_s12] sm:$0xff]  ;;  %v1480_v8 = vld [vmem:[%s2450_s12 + $0x8] sm:$0xff]  ;;  %v1481_v9 = vld [vmem:[%s2450_s12 + $0x10] sm:$0xff] }
 0x484   : > { %1769 = vmatprep.subr.mxu0 %v2017_v13 }
 0x485   : > { %v933_v12 = vmul.f32 1.442695, %v926_v11  ;;  %v1855_v11 = vpack.c.bf16 %v1480_v8, %v1479_v7 }
 0x487   : > { %1937 = vpow2.f32 %v933_v12  ;;  %v1482_v12 = vld [vmem:[%s2450_s12 + $0x18] sm:$0xff] }
 0x489   : > { %v1934_v14 = vpop.eup %1933 }
 0x48a   : > { %v938_v15 = vsel %vm602_vm2, %v1934_v14, 0.0 }
 0x48b   : > { %939 = vadd.xlane.f32.xlu0 %v938_v15  ;;  %v1483_v15 = vld [vmem:[%s2450_s12 + $0x20] sm:$0xff] }
 0x48d   : > { %v1936_v16 = vpop.eup %1935 }
 0x48e   : > { %v941_v17 = vsel %vm602_vm2, %v1936_v16, 0.0 }
 0x48f   : > { %942 = vadd.xlane.f32.xlu1 %v941_v17 }
 0x491   : > { %v1938_v18 = vpop.eup %1937 }
 0x492   : > { %v944_v19 = vsel %vm602_vm2, %v1938_v18, 0.0 }
 0x493   : > { %945 = vadd.xlane.f32.xlu0 %v944_v19 }
 0x4a0   : > { %1107 = vrot.lane.b32.xlu1 %v2203_v29, %s2023_s26 }
 0x4a4   : > { %1183 = vrot.lane.b32.xlu1 %v2206_v30, %s2023_s26 }
 0x4a9   : > { %1031 = vrot.lane.b32.xlu0 %v2200_v28, %s2023_s26  ;;  %s1588_s26 = sshll.u32 %s458_s2, 4  ;;  %s2397_s26 = int_to_ptr.vmem [resolvable:$true] %s1588_s26 }
 0x4aa   : > { %s1951_s17 = scalar_lea.vmem %s2397_s26, 128  ;;  %p1958_p0 = scmp.lt.s32.totalorder %s2397_s26, %s1956_s25 }
 0x4ab   : > { %p1952_p11 = scmp.ne.s32.totalorder %s2397_s26, %s1951_s17  ;;  %p1959_p1 = scmp.lt.s32.totalorder %s1957_s3, %s1951_s17 }
 0x4ad   : > { %p1953_p12 = pnand %p1952_p11, %p2141_p5  ;;  %p1960_p2 = por %p1959_p1, %p1958_p0 }
 0x4af   : > { %p1954_p13 = pneg %p1953_p12 }
 0x4b1   : > { %p1961_p3 = pnand %p1960_p2, %p1954_p13 }
 0x4b3   : > { %v937_v20 = vpop.xlane.xlu1 %936 }
 0x4b4   : > { %1939 = vrcp.f32 %v937_v20 }
 0x4be   : > { %v1940_v21 = vpop.eup %1939 }
 0x4bf   : > { %v951_v22 = vmul.f32 %v1940_v21, %v1932_v63 }
 0x4c1   : > { %1762 = vmatmul.mubr.msk.f32.vlgmr.msra.gmra.mrb[2].mxu0 %vm602_vm2, %v951_v22  ;;  %v1671_v22 = vld [vmem:[%s2446_s8] ss:$0 sm:$0xff] }
 0x4c2   : > { %1771 = vmatprep.mubr.msk.f32.mxu0 %vm2016_vm1, %v2017_v13 }
 0x518   : > { %v940_v23 = vpop.xlane.xlu0 %939 }
 0x519   : > { %1941 = vrcp.f32 %v940_v23 }
 0x51c   : > { %v943_v24 = vpop.xlane.xlu1 %942 }
 0x51d   : > { %1943 = vrcp.f32 %v943_v24  ;;  %v1672_v24 = vld [vmem:[%s2447_s9] ss:$0 sm:$0xff] }
 0x520   : > { %v1108_v25 = vpop.permute.xlu1 %1107  ;;  %v946_v26 = vpop.xlane.xlu0 %945 }
 0x521   : > { %1945 = vrcp.f32 %v946_v26  ;;  %1770 = vmatpush3.msra.mxu0 %v1108_v25 }
 0x522   : > { %1854 = vmatprep.subr.bf16.mxu0 %v2015_v10 }
 0x523   : > { %v1942_v27 = vpop.eup %1941 }
 0x524   : > { %v952_v28 = vmul.f32 %v1942_v27, %v1934_v14  ;;  %v1032_v29 = vpop.permute.xlu0 %1031  ;;  %v1184_v30 = vpop.permute.xlu1 %1183  ;;  %v1858_v14 = vpack.c.bf16 %v1482_v12, %v1481_v9  ;;  %v1485_v27 = vld [vmem:[%s2450_s12 + $0x30] sm:$0xff] }
 0x525   : > { %1765 = vmatpush3.msra.mxu1 %v1032_v29 }
 0x526   : > { %1767 = vmatmul.mubr.msk.f32.vlgmr.msra.gmra.mrb[8].mxu1 %vm602_vm2, %v952_v28  ;;  %1774 = vmatprep.subr.mxu1 %v2017_v13  ;;  %v1486_v28 = vld [vmem:[%s2450_s12 + $0x38] sm:$0xff] }
 0x527   : > { %v1944_v31 = vpop.eup %1943  ;;  %1775 = vmatpush3.msra.mxu1 %v1184_v30  ;;  %1776 = vmatprep.mubr.msk.f32.mxu1 %vm2016_vm1, %v2017_v13  ;;  %v1864_v29 = vpack.c.bf16 %v1486_v28, %v1485_v27  ;;  %v1487_v30 = vld [vmem:[%s2450_s12 + $0x40] sm:$0xff] }
 0x528   : > { %v953_v32 = vmul.f32 %v1944_v31, %v1936_v16  ;;  %1842 = vmatprep.subr.bf16.mxu1 %v2015_v10  ;;  %v1484_v16 = vld [vmem:[%s2450_s12 + $0x28] sm:$0xff] }
 0x529   : > { %v1861_v17 = vpack.c.bf16 %v1484_v16, %v1483_v15  ;;  %v1488_v31 = vld [vmem:[%s2450_s12 + $0x48] sm:$0xff] }
 0x52a   : > { %1772 = vmatmul.mubr.msk.f32.vlgmr.msra.gmra.mrb[4].mxu0 %vm602_vm2, %v953_v32  ;;  %v1867_v32 = vpack.c.bf16 %v1488_v31, %v1487_v30 }
 0x52b   : > { %v1946_v33 = vpop.eup %1945  ;;  %1833 = vmatprep.mubr.msk.f32.mxu0 %vm2016_vm1, %v2017_v13  ;;  %1856 = vmatpush3.bf16.msra.mxu0 %v1855_v11 }
 0x52c   : > { %v954_v34 = vmul.f32 %v1946_v33, %v1938_v18  ;;  %1857 = vmatprep.subr.bf16.mxu0 %v2015_v10  ;;  %v1489_v33 = vld [vmem:[%s2450_s12 + $0x50] sm:$0xff] }
 0x52e   : > { %1777 = vmatmul.mubr.msk.f32.vlgmr.msra.gmra.mrb[10].mxu1 %vm602_vm2, %v954_v34  ;;  %v1490_v34 = vld [vmem:[%s2450_s12 + $0x58] sm:$0xff] }
 0x52f   : > { %1787 = vmatprep.mubr.msk.f32.mxu1 %vm2016_vm1, %v2017_v13  ;;  %1844 = vmatpush3.bf16.msra.mxu1 %v1843_v39  ;;  %v1493_v39 = vld [vmem:[%s2450_s12 + $0x70] sm:$0xff] }
 0x530   : > { %1845 = vmatprep.subr.bf16.mxu1 %v2015_v10  ;;  %1859 = vmatpush3.bf16.msra.mxu0 %v1858_v14  ;;  %v1876_v41 = vpack.c.bf16 %v1494_v40, %v1493_v39 }
 0x531   : > { %1860 = vmatprep.subr.bf16.mxu0 %v2015_v10 }
 0x533   : > { %1847 = vmatpush3.bf16.msra.mxu1 %v1846_v42  ;;  %v1673_v42 = vld [vmem:[%s2449_s11] ss:$0 sm:$0xff] }
 0x534   : > { %1848 = vmatprep.subr.bf16.mxu1 %v2015_v10  ;;  %1862 = vmatpush3.bf16.msra.mxu0 %v1861_v17 }
 0x535   : > { %1863 = vmatprep.subr.bf16.mxu0 %v2015_v10 }
 0x538   : > { %1865 = vmatpush3.bf16.msra.mxu0 %v1864_v29 }
 0x539   : > { %1866 = vmatprep.subr.bf16.mxu0 %v2015_v10 }
 0x53c   : > { %1868 = vmatpush3.bf16.msra.mxu0 %v1867_v32 }
 0x53d   : > { %1869 = vmatprep.subr.bf16.mxu0 %v2015_v10 }
 0x594   : > { %v1027_v35 = vpop.f32.mrb[2].mxu0 }
 0x595   : > { %v1763_v36 = vpop.f32.mrb[3].mxu0 }
 0x596   : > { %v1491_v36 = vld [vmem:[%s2450_s12 + $0x60] sm:$0xff] }
 0x597   : > { %v1873_v38 = vpack.c.bf16 %v1492_v37, %v1491_v36 }
 0x5f9   : > { %v1103_v43 = vpop.f32.mrb[8].mxu1 }
 0x5fa   : > { %1260 = vrot.lane.b32.xlu0 %v1103_v43, %s2024_s27  ;;  %v1768_v44 = vpop.f32.mrb[9].mxu1 }
 0x5fd   : > { %v1179_v45 = vpop.f32.mrb[4].mxu0 }
 0x5fe   : > { %1264 = vrot.lane.b32.xlu1 %v1179_v45, %s2025_s28  ;;  %v1773_v46 = vpop.f32.mrb[5].mxu0 }
 0x601   : > { %v1255_v47 = vpop.f32.mrb[10].mxu1 }
 0x602   : > { %1268 = vrot.lane.b32.xlu0 %v1255_v47, %s2026_s18  ;;  %v1778_v48 = vpop.f32.mrb[11].mxu1  ;;  %s2395_s18 = scalar_lea.hbm %s2452_s14, %s1677_s1 }
 0x66c   : > { %v1261_v49 = vpop.permute.xlu0 %1260 }
 0x66d   : > { %v1271_v51 = vsel %vm602_vm2, %v1027_v35, %v1261_v49  ;;  %v1870_v35 = vpack.c.bf16 %v1490_v34, %v1489_v33 }
 0x66f   : > { %1871 = vmatpush3.bf16.msra.mxu0 %v1870_v35 }
 0x670   : > { %v1265_v50 = vpop.permute.xlu1 %1264  ;;  %1872 = vmatprep.subr.bf16.mxu0 %v2015_v10 }
 0x671   : > { %v1273_v52 = vsel %vm1272_vm7, %v1271_v51, %v1265_v50  ;;  %v1675_v50 = vld [vmem:[%s2451_s13] ss:$0 sm:$0xff] }
 0x673   : > { %1874 = vmatpush3.bf16.msra.mxu0 %v1873_v38 }
 0x674   : > { %v1269_v53 = vpop.permute.xlu0 %1268  ;;  %1875 = vmatprep.subr.bf16.mxu0 %v2015_v10 }
 0x675   : > { %v1275_v54 = vsel %vm1274_vm8, %v1273_v52, %v1269_v53 }
 0x676   : > { %1788 = vmatmul.mubr.msk.f32.vlgmr.msra.gmra.mrb[12].mxu1 %vm480_vm0, %v1275_v54 }
 0x677   : > { %1798 = vmatprep.mubr.msk.f32.mxu1 %vm2016_vm1, %v2017_v13  ;;  %1877 = vmatpush3.bf16.msra.mxu0 %v1876_v41 }
 0x749   : > { %v1356_v56 = vpop.f32.mrb[12].mxu1 }
 0x74a   : > { %v1357_v57 = vadd.f32 %v1669_v55, %v1356_v56  ;;  %v1789_v58 = vpop.f32.mrb[13].mxu1 }
 0x74c   : > { %v2302_v59 = vadd.f32 %v1357_v57, %v2156_v0  ;;  %v1391_v0 = vld [vmem:[%s2448_s10 + $0x8] sm:$0xff] }
 0x74d   : > { %v1849_v3 = vpack.c.bf16 %v1391_v0, %v1390_v2 }
 0x74e   : > { %v1363_v60 = vsel %vm480_vm0, %v2302_v59, 0.0 }
 0x74f   : > { %1364 = vadd.xlane.f32.xlu1 %v1363_v60  ;;  %1850 = vmatpush3.bf16.msra.mxu1 %v1849_v3 }
 0x750   : > { %1851 = vmatprep.subr.bf16.mxu1 %v2015_v10 }
 0x753   : > { %1853 = vmatpush3.bf16.msra.mxu1 %v1852_v6 }
 0x7dc   : > { %v1365_v61 = vpop.xlane.xlu1 %1364 }
 0x7dd   : > { %v1366_v62 = vmul.f32 0.03125, %v1365_v61 }
 0x7df   : > { %v1367_v63 = vsub.f32 %v2302_v59, %v1366_v62 }
 0x7e1   : > { %v1368_v1 = vmul.f32 %v1367_v63, %v1367_v63 }
 0x7e3   : > { %v1369_v13 = vsel %vm480_vm0, %v1368_v1, 0.0 }
 0x7e4   : > { %1370 = vadd.xlane.f32.xlu0 %v1369_v13 }
 0x871   : > { %v1371_v18 = vpop.xlane.xlu0 %1370 }
 0x872   : > { %v1372_v19 = vmul.f32 0.03125, %v1371_v18 }
 0x874   : > { %v1373_v20 = vadd.f32 1e-05, %v1372_v19 }
 0x876   : > { %1947 = vrsqrt.f32 %v1373_v20 }
 0x880   : > { %v1948_v21 = vpop.eup %1947 }
 0x881   : > { %v1375_v23 = vmul.f32 %v1948_v21, %v1367_v63 }
 0x883   : > { %v1382_v25 = vmul.f32 %v1671_v22, %v1375_v23 }
 0x885   : > { %v1389_v26 = vadd.f32 %v1672_v24, %v1382_v25 }
 0x887   : > { %1799 = vmatmul.mubr.msk.f32.vlgmr.msra.gmra.mrb[14].mxu1 %vm480_vm0, %v1389_v26 }
 0x95a   : > { %v1470_v43 = vpop.f32.mrb[14].mxu1 }
 0x95b   : > { %v1471_v44 = vadd.f32 %v1673_v42, %v1470_v43  ;;  %v1800_v45 = vpop.f32.mrb[15].mxu1 }
 0x95d   : > { %v1475_v10 = vmul.f32 0.70710677, %v1471_v44  ;;  %v1474_v47 = vmul.f32 0.5, %v1471_v44 }
 0x95f   : > { %1949 = verf.f32 %v1475_v10 }
 0x969   : > { %v1950_v46 = vpop.eup %1949 }
 0x96a   : > { %v1477_v48 = vadd.f32 1.0, %v1950_v46 }
 0x96c   : > { %v1478_v49 = vmul.f32 %v1477_v48, %v1474_v47 }
 0x96e   : > { %1834 = vmatmul.mubr.f32.vlgmr.msra.gmra.mrb[6].mxu0 %v1478_v49 }
 0xa41   : > { %v1568_v51 = vpop.f32.mrb[6].mxu0 }
 0xa42   : > { %v1569_v52 = vadd.f32 %v1675_v50, %v1568_v51  ;;  %v1835_v53 = vpop.f32.mrb[7].mxu0 }
 0xa44   : > { %v1572_v54 = vadd.f32 %v1569_v52, %v2302_v59 }
 0xa46   : > { %1573 = vst.msk [vmem:[%s458_s2] sm:$0xff] %vm480_vm0, %v1572_v54 }
 0xa47   : > { %1964 = shalt.err (!%p1961_p3)
}
 0xa48   : > { %s1965_s0 = scalar_lea.hbm %s2395_s18, 128  ;;  %s1969_s27 = scalar_lea.hbm %s2452_s14, 512 }
 0xa49   : > { %p1966_p4 = scmp.ne.s32.totalorder %s2395_s18, %s1965_s0  ;;  %p1970_p9 = scmp.lt.u32.totalorder %s2395_s18, %s2452_s14 }
 0xa4a   : > { %p1971_p10 = scmp.lt.u32.totalorder %s1969_s27, %s1965_s0  ;;  %p1973_p12 = scmp.lt.u32.totalorder %s1965_s0, %s2395_s18 }
 0xa4b   : > { %p1967_p7 = pnand %p1966_p4, %p2141_p5 }
 0xa4c   : > { %p1972_p11 = por %p1971_p10, %p1970_p9 }
 0xa4d   : > { %p1968_p8 = pneg %p1967_p7 }
 0xa4e   : > { %p1974_p13 = por %p1973_p12, %p1972_p11 }
 0xa50   : > { %p1975_p0 = pnand %p1974_p13, %p1968_p8 }
 0xa52   : > { %1978 = shalt.err (!%p1975_p0)
}
 0xa53   : > { %1878 = dma.vmem_to_hbm [thread:$0]  (%p2141_p5), %s2397_s26, 128, %s2395_s18, %s1575_s21  }
 0xa54 PF: > { %p1884_p1 = scmp.ge.s32.totalorder %s2013_s16, 2  ;;  %s1600_s3 = sand.u32 1, %s2001_s29  }
 0xa55   : > { %s1601_s17 = scalar_lea.sflag [#allocation3], %s1600_s3 }
 0xa56   : > { %p1881_p2 = pnand %p1884_p1, %p2145_p6 }
 0xa58   : > { %1996 = dma.done.wait (!%p1881_p2), %s1601_s17, 128  }
 0xa59   : > { %1998 = vsyncadd (!%p1881_p2), %s1601_s17, 4294967168  ;;  %p24_p3 = scmp.ge.s32.totalorder %s2128_s19, 6   ;;  %s2465_s29 = smov %s2005_s30 }
 0xa5a   : > { %s2466_s30 = smov %s2009_s15  ;;  %s2467_s15 = smov %s2139_s22 }
 0xa5b   : > { %s2468_s16 = smov %s2128_s19  ;;  %26 = sbr.rel (!%p24_p3) target bundleno = 8 (0x8), region = 111 }
 0xa62   :  { %1606 = vsyncpa [#allocation3], 1 }
 0xa63   :  { %1608 = vsyncpa [#allocation3 + $0x1], 1 }

</bundles_post_ra>
